<compile_context>
chip_gen: v7x
topology: tpu7x:2x2x1
jax: 0.10.0
libtpu: 0.0.40
codegen_flags: <defaults>
</compile_context>

<pallas_src>
import functools

import jax
import jax.numpy as jnp
from jax import lax
from jax.experimental import pallas as pl
from jax.experimental.pallas import tpu as pltpu


# ---------------------------------------------------------------------------
# Kernel
# ---------------------------------------------------------------------------
def _brm_kernel(x_ref, xt_ref, xb_ref, w1_ref, b1_ref, w2_ref, b2_ref,
                o_ref, p_ref, s_ref, acc_ref, *, h_true):
    # x_ref  : (1, TH, W, C)     current row slab (padded image, NHWC)
    # xt_ref : (1, 2, W, C)      2 rows just above the slab (clamped at edges)
    # xb_ref : (1, 2, W, C)      2 rows just below the slab (clamped at edges)
    # w*_ref : (3, 3C, C)        per-dy weight panels (K order = dx*C + c_in)
    # b*_ref : (1, C)            float32 bias
    # o_ref  : (1, TH, W, C)
    # p_ref  : (TH+4, W+2, C)    x slab with 2-row halo + 1-col zero pad
    # s_ref  : (TH+4, W, 3C)     dx-im2col buffer (reused by conv1 and conv2)
    # acc_ref: (TH+2, W, C) f32  accumulator (conv1 over TH+2 rows, then conv2)
    _, TH, W, C = x_ref.shape
    i = pl.program_id(1)
    f32 = jnp.float32
    sdt = s_ref.dtype

    # ---- 1) padded x slab: zero ONLY the 1-wide W borders, fill interior ----
    zcol = jnp.zeros((TH + 4, 1, C), dtype=p_ref.dtype)
    p_ref[:, 0:1, :] = zcol
    p_ref[:, W + 1:W + 2, :] = zcol
    p_ref[2:TH + 2, 1:W + 1, :] = x_ref[0]

    # halo rows, masked by *global* row index (covers the image top/bottom
    # edge and the zero-padded H remainder in one branch-free path).
    xt = xt_ref[0]
    top_g = i * TH - 2 + lax.broadcasted_iota(jnp.int32, (2, 1, 1), 0)
    p_ref[0:2, 1:W + 1, :] = jnp.where(top_g >= 0, xt, jnp.zeros_like(xt))

    xb = xb_ref[0]
    bot_g = (i + 1) * TH + lax.broadcasted_iota(jnp.int32, (2, 1, 1), 0)
    p_ref[TH + 2:TH + 4, 1:W + 1, :] = jnp.where(bot_g < h_true, xb,
                                                 jnp.zeros_like(xb))

    # ---- 2) dx-im2col for conv1:  s[r, x, dx*C + c] = p[r, x + dx, c] -------
    for dx in range(3):
        s_ref[:, :, dx * C:(dx + 1) * C] = p_ref[:, dx:dx + W, :]

    # ---- 3) conv1 + bias on TH+2 rows (1-row halo each side for conv2) ------
    #         3 matmuls with K = 3C, accumulated into the f32 VMEM scratch.
    m1 = (TH + 2) * W
    lhs = s_ref[0:TH + 2, :, :].reshape(m1, 3 * C)
    acc_ref[...] = (jnp.dot(lhs, w1_ref[0], preferred_element_type=f32)
                    + b1_ref[...]).reshape(TH + 2, W, C)
    for dy in (1, 2):
        lhs = s_ref[dy:dy + TH + 2, :, :].reshape(m1, 3 * C)
        acc_ref[...] += jnp.dot(lhs, w1_ref[dy],
                                preferred_element_type=f32).reshape(TH + 2, W, C)

    # ---- 4) relu + zero rows outside the real image (= conv2's zero padding
    #         at the top/bottom edge and the padded-H remainder), written
    #         W-shifted straight into the reused shift buffer (no q staging).
    row_g = i * TH - 1 + lax.broadcasted_iota(jnp.int32, (TH + 2, 1, 1), 0)
    row_ok = jnp.logical_and(row_g >= 0, row_g < h_true)
    acc_ref[...] = jnp.where(row_ok, jnp.maximum(acc_ref[...], 0.0), 0.0)

    R = TH + 2
    zc1 = jnp.zeros((R, 1, C), dtype=sdt)
    # dx = 1 (centre column)
    s_ref[0:R, :, C:2 * C] = acc_ref[...].astype(sdt)
    # dx = 0 (left neighbour; column 0 is conv2's zero pad)
    s_ref[0:R, 0:1, 0:C] = zc1
    s_ref[0:R, 1:W, 0:C] = acc_ref[:, 0:W - 1, :].astype(sdt)
    # dx = 2 (right neighbour; column W-1 is conv2's zero pad)
    s_ref[0:R, W - 1:W, 2 * C:3 * C] = zc1
    s_ref[0:R, 0:W - 1, 2 * C:3 * C] = acc_ref[:, 1:W, :].astype(sdt)

    # ---- 5) conv2 + bias: 3 matmuls with K = 3C; accumulate into the first
    #         TH rows of the same f32 scratch (conv1 contents already consumed)
    m2 = TH * W
    lhs = s_ref[0:TH, :, :].reshape(m2, 3 * C)
    acc_ref[0:TH] = (jnp.dot(lhs, w2_ref[0], preferred_element_type=f32)
                     + b2_ref[...]).reshape(TH, W, C)
    for dy in (1, 2):
        lhs = s_ref[dy:dy + TH, :, :].reshape(m2, 3 * C)
        acc_ref[0:TH] += jnp.dot(lhs, w2_ref[dy],
                                 preferred_element_type=f32).reshape(TH, W, C)

    # ---- 6) residual add + store --------------------------------------------
    o_ref[0] = (x_ref[0].astype(f32) + acc_ref[0:TH]).astype(o_ref.dtype)


# ---------------------------------------------------------------------------
# Wrapper (tiling / VMEM budgeting / grid setup)
# ---------------------------------------------------------------------------
def _round_up(a, b):
    return -(-a // b) * b


def _vmem_budget_bytes():
    """Generation-aware scoped-VMEM budget (~40 MiB on 64-MiB v7x, 48 MiB on
    128-MiB v5e/v6e)."""
    cap = 128 * 2 ** 20
    try:
        info = pltpu.get_tpu_info()
        cap = int(getattr(info, "vmem_capacity_bytes", cap))
    except Exception:
        pass
    return min(48 * 2 ** 20, int(cap * 0.625))


def _vmem_estimate_bytes(th, w, c, itemsize):
    """Per-step VMEM footprint, modelling the (8, 128) tile padding that a
    narrow C minor dimension incurs, and double buffering per input/output."""
    def tile2(sub, lane):
        return _round_up(max(sub, 1), 8) * _round_up(max(lane, 1), 128)

    blocks = (
        2 * th * tile2(w, c)              # x slab (double buffered)
        + 2 * th * tile2(w, c)            # out slab
        + 2 * 2 * 2 * tile2(w, c)         # xt + xb halo rows
        + 2 * 2 * 3 * tile2(3 * c, c)     # both weight panels (3, 3C, C)
        + 2 * 2 * tile2(1, c)             # both biases
    )
    scratch = (
        (th + 4) * tile2(w + 2, c)        # padded x slab
        + (th + 4) * tile2(w, 3 * c)      # dx-im2col buffer
    )
    acc = (th + 2) * tile2(w, c) * 4      # f32 accumulator
    return (blocks + scratch) * itemsize + acc


def _pick_row_tile(h, w, c, n, itemsize, budget, max_tile=128):
    upper = max(2, min(max_tile, _round_up(h, 2)))
    th = 2
    for cand in range(upper, 1, -2):
        if _vmem_estimate_bytes(cand, w, c, itemsize) <= 0.75 * budget:
            th = cand
            break
    if n == 1 and h > 2:
        # keep >= 2 row slabs so both v7x TensorCores get work on N == 1
        th = min(th, _round_up((h + 1) // 2, 2))
    return th


def boundary_refine(x_nchw, w1, b1, w2, b2, *, max_row_tile=128):
    """x_nchw: (N, C, H, W).  w1/w2: (3, 3, C, C) HWIO.  b1/b2: (C,)."""
    N, C, H, W = x_nchw.shape
    assert w1.shape == (3, 3, C, C) and w2.shape == (3, 3, C, C)
    assert W >= 2, "W >= 2 required"
    dtype = x_nchw.dtype
    itemsize = jnp.dtype(dtype).itemsize

    budget = _vmem_budget_bytes()
    TH = _pick_row_tile(H, W, C, N, itemsize, budget, max_row_tile)
    Hp = _round_up(H, TH)
    n_slabs = Hp // TH
    hb = TH // 2                              # halo block stride (2-row blocks)

    x_nhwc = jnp.transpose(x_nchw, (0, 2, 3, 1))        # NCHW -> NHWC
    if Hp != H:
        x_nhwc = jnp.pad(x_nhwc, ((0, 0), (0, Hp - H), (0, 0), (0, 0)))

    # Per-dy (3C, C) weight panels; K order = dx*C + c_in matches the kernel's
    # dx-concatenated im2col buffer.  Biases in f32 (f32 accumulation).
    w1p = w1.reshape(3, 3 * C, C)
    w2p = w2.reshape(3, 3 * C, C)
    b1r = b1.reshape(1, C).astype(jnp.float32)
    b2r = b2.reshape(1, C).astype(jnp.float32)

    def x_map(n, i):
        return (n, i, 0, 0)

    def xt_map(n, i):                         # 2 rows just above the slab
        return (n, jnp.maximum(i * hb - 1, 0), 0, 0)

    def xb_map(n, i):                         # 2 rows just below the slab
        return (n, jnp.minimum((i + 1) * hb, Hp // 2 - 1), 0, 0)

    const3 = lambda n, i: (0, 0, 0)
    const2 = lambda n, i: (0, 0)

    est = _vmem_estimate_bytes(TH, W, C, itemsize)
    vmem_limit = int(min(max(int(est * 1.4) + (2 << 20), 16 << 20), budget))

    kernel = functools.partial(_brm_kernel, h_true=H)

    out_nhwc = pl.pallas_call(
        kernel,
        out_shape=jax.ShapeDtypeStruct((N, Hp, W, C), dtype),
        grid_spec=pltpu.PrefetchScalarGridSpec(
            num_scalar_prefetch=0,
            grid=(N, n_slabs),
            in_specs=[
                pl.BlockSpec((1, TH, W, C), x_map),
                pl.BlockSpec((1, 2, W, C), xt_map),
                pl.BlockSpec((1, 2, W, C), xb_map),
                pl.BlockSpec((3, 3 * C, C), const3),
                pl.BlockSpec((1, C), const2),
                pl.BlockSpec((3, 3 * C, C), const3),
                pl.BlockSpec((1, C), const2),
            ],
            out_specs=pl.BlockSpec((1, TH, W, C), x_map),
            scratch_shapes=[
                pltpu.VMEM((TH + 4, W + 2, C), dtype),       # padded x slab
                pltpu.VMEM((TH + 4, W, 3 * C), dtype),       # dx-im2col buffer
                pltpu.VMEM((TH + 2, W, C), jnp.float32),     # f32 accumulator
            ],
        ),
        compiler_params=pltpu.CompilerParams(
            dimension_semantics=("parallel", "parallel"),
            vmem_limit_bytes=vmem_limit,
        ),
    )(x_nhwc, x_nhwc, x_nhwc, w1p, b1r, w2p, b2r)

    if Hp != H:
        out_nhwc = out_nhwc[:, :H]
    return jnp.transpose(out_nhwc, (0, 3, 1, 2))             # back to NCHW


# ---------------------------------------------------------------------------
# Reference + test harness
# ---------------------------------------------------------------------------
def _reference(x_nchw, w1, b1, w2, b2):
    """Pure-JAX reference (same semantics as the PyTorch module)."""
    x = jnp.transpose(x_nchw, (0, 2, 3, 1))
    dn = ("NHWC", "HWIO", "NHWC")
    r = lax.conv_general_dilated(x, w1, (1, 1), "SAME", dimension_numbers=dn,
                                 precision=lax.Precision.HIGHEST) + b1
    r = jnp.maximum(r, 0.0)
    r = lax.conv_general_dilated(r, w2, (1, 1), "SAME", dimension_numbers=dn,
                                 precision=lax.Precision.HIGHEST) + b2
    return jnp.transpose(x + r, (0, 3, 1, 2))


def _init_params(dim, key):
    # Deterministic synthetic init mimicking PyTorch Conv2d default
    # (uniform in [-1/sqrt(fan_in), 1/sqrt(fan_in)], fan_in = dim*3*3).
    k1, k2, k3, k4 = jax.random.split(key, 4)
    fan_in = dim * 3 * 3
    bound = 1.0 / jnp.sqrt(fan_in)
    w1 = jax.random.uniform(k1, (3, 3, dim, dim), jnp.float32, -bound, bound)
    b1 = jax.random.uniform(k2, (dim,), jnp.float32, -bound, bound)
    w2 = jax.random.uniform(k3, (3, 3, dim, dim), jnp.float32, -bound, bound)
    b2 = jax.random.uniform(k4, (dim,), jnp.float32, -bound, bound)
    return w1, b1, w2, b2


if __name__ == "__main__":
    key = jax.random.PRNGKey(0)
    kx, kp, kx2 = jax.random.split(key, 3)

    # Primary shape (dim = num_classes style small C).
    N, C, H, W = 2, 4, 16, 16
    x = jax.random.normal(kx, (N, C, H, W), jnp.float32)
    w1, b1, w2, b2 = _init_params(C, kp)

    out = jax.block_until_ready(boundary_refine(x, w1, b1, w2, b2))
    ref = jax.block_until_ready(_reference(x, w1, b1, w2, b2))
    assert out.shape == (N, C, H, W)
    assert jnp.allclose(out, ref, atol=1e-3, rtol=1e-3), "mismatch vs reference"

    # Remainder / single-batch path: H not divisible by the chosen row tile,
    # exercising the padded-H row masking and the >=2-slab rule for N == 1.
    N2, C2, H2, W2 = 1, 4, 10, 16
    x2 = jax.random.normal(kx2, (N2, C2, H2, W2), jnp.float32)
    out2 = jax.block_until_ready(boundary_refine(x2, w1, b1, w2, b2))
    ref2 = jax.block_until_ready(_reference(x2, w1, b1, w2, b2))
    assert out2.shape == (N2, C2, H2, W2)
    assert jnp.allclose(out2, ref2, atol=1e-3, rtol=1e-3), "mismatch (remainder)"

    print("KERNEL_OK")
</pallas_src>

<mosaic_0001>
module attributes {stable_mosaic.version = 11 : i64} {
  func.func @_brm_kernel(%arg0: i32, %arg1: i32, %arg2: memref<1x16x16x4xf32, #tpu.memory_space<vmem>>, %arg3: memref<1x2x16x4xf32, #tpu.memory_space<vmem>>, %arg4: memref<1x2x16x4xf32, #tpu.memory_space<vmem>>, %arg5: memref<3x12x4xf32, #tpu.memory_space<vmem>>, %arg6: memref<1x4xf32, #tpu.memory_space<vmem>>, %arg7: memref<3x12x4xf32, #tpu.memory_space<vmem>>, %arg8: memref<1x4xf32, #tpu.memory_space<vmem>>, %arg9: memref<1x16x16x4xf32, #tpu.memory_space<vmem>>, %arg10: memref<20x18x4xf32, #tpu.memory_space<vmem>>, %arg11: memref<20x16x12xf32, #tpu.memory_space<vmem>>, %arg12: memref<18x16x4xf32, #tpu.memory_space<vmem>>) attributes {dimension_semantics = [#tpu.dimension_semantics<parallel>, #tpu.dimension_semantics<parallel>], iteration_bounds = array<i64: 2, 1>, scalar_prefetch = 0 : i64, scratch_operands = 3 : i64, tpu.core_type = #tpu.core_type<tc>, window_params = [{transform_indices = @transform_0, window_bounds = array<i64: 1, 16, 16, 4>}, {transform_indices = @transform_1, window_bounds = array<i64: 1, 2, 16, 4>}, {transform_indices = @transform_2, window_bounds = array<i64: 1, 2, 16, 4>}, {pipeline_mode = #tpu.pipeline_mode<synchronous>, transform_indices = @transform_3, window_bounds = array<i64: 3, 12, 4>}, {pipeline_mode = #tpu.pipeline_mode<synchronous>, transform_indices = @transform_4, window_bounds = array<i64: 1, 4>}, {pipeline_mode = #tpu.pipeline_mode<synchronous>, transform_indices = @transform_5, window_bounds = array<i64: 3, 12, 4>}, {pipeline_mode = #tpu.pipeline_mode<synchronous>, transform_indices = @transform_6, window_bounds = array<i64: 1, 4>}, {transform_indices = @transform_7, window_bounds = array<i64: 1, 16, 16, 4>}]} {
    %cst = arith.constant 0.000000e+00 : f32
    %0 = vector.broadcast %cst : f32 to vector<20x1x4xf32>
    %c0 = arith.constant 0 : index
    %c0_0 = arith.constant 0 : index
    %c0_1 = arith.constant 0 : index
    %1 = vector.load %arg10[%c0, %c0_0, %c0_1] : memref<20x18x4xf32, #tpu.memory_space<vmem>>, vector<20x1x4xf32>
    tpu.vector_store %arg10[%c0, %c0_0, %c0_1], %0 {strides = array<i32>} : memref<20x18x4xf32, #tpu.memory_space<vmem>>, vector<20x1x4xf32>,
    %c0_2 = arith.constant 0 : index
    %c17 = arith.constant 17 : index
    %c0_3 = arith.constant 0 : index
    %2 = vector.load %arg10[%c0_2, %c17, %c0_3] : memref<20x18x4xf32, #tpu.memory_space<vmem>>, vector<20x1x4xf32>
    tpu.vector_store %arg10[%c0_2, %c17, %c0_3], %0 {strides = array<i32>} : memref<20x18x4xf32, #tpu.memory_space<vmem>>, vector<20x1x4xf32>,
    %c0_4 = arith.constant 0 : index
    %c0_5 = arith.constant 0 : index
    %c0_6 = arith.constant 0 : index
    %c0_7 = arith.constant 0 : index
    %3 = vector.load %arg2[%c0_4, %c0_5, %c0_6, %c0_7] : memref<1x16x16x4xf32, #tpu.memory_space<vmem>>, vector<1x16x16x4xf32>
    %4 = vector.shape_cast %3 : vector<1x16x16x4xf32> to vector<16x16x4xf32>
    %c2 = arith.constant 2 : index
    %c1 = arith.constant 1 : index
    %c0_8 = arith.constant 0 : index
    %5 = vector.load %arg10[%c2, %c1, %c0_8] : memref<20x18x4xf32, #tpu.memory_space<vmem>>, vector<16x16x4xf32>
    tpu.vector_store %arg10[%c2, %c1, %c0_8], %4 {strides = array<i32>} : memref<20x18x4xf32, #tpu.memory_space<vmem>>, vector<16x16x4xf32>,
    %c0_9 = arith.constant 0 : index
    %c0_10 = arith.constant 0 : index
    %c0_11 = arith.constant 0 : index
    %c0_12 = arith.constant 0 : index
    %6 = vector.load %arg3[%c0_9, %c0_10, %c0_11, %c0_12] : memref<1x2x16x4xf32, #tpu.memory_space<vmem>>, vector<1x2x16x4xf32>
    %7 = vector.shape_cast %6 : vector<1x2x16x4xf32> to vector<2x16x4xf32>
    %c16_i32 = arith.constant 16 : i32
    %8 = arith.muli %arg1, %c16_i32 : i32
    %c2_i32 = arith.constant 2 : i32
    %9 = arith.subi %8, %c2_i32 : i32
    %10 = tpu.iota {dimensions = array<i32: 0>} : vector<2x1x1xi32>
    %11 = vector.broadcast %9 : i32 to vector<2x1x1xi32>
    %12 = arith.addi %11, %10 : vector<2x1x1xi32>
    %c0_i32 = arith.constant 0 : i32
    %13 = vector.broadcast %c0_i32 : i32 to vector<2x1x1xi32>
    %14 = arith.cmpi sge, %12, %13 : vector<2x1x1xi32>
    %cst_13 = arith.constant 0.000000e+00 : f32
    %15 = vector.broadcast %cst_13 : f32 to vector<2x16x4xf32>
    %16 = vector.shape_cast %14 : vector<2x1x1xi1> to vector<2x1x1xi1>
    %17 = vector.broadcast %16 : vector<2x1x1xi1> to vector<2x16x4xi1>
    %18 = arith.select %17, %7, %15 : vector<2x16x4xi1>, vector<2x16x4xf32>
    %c0_14 = arith.constant 0 : index
    %c1_15 = arith.constant 1 : index
    %c0_16 = arith.constant 0 : index
    %19 = vector.load %arg10[%c0_14, %c1_15, %c0_16] : memref<20x18x4xf32, #tpu.memory_space<vmem>>, vector<2x16x4xf32>
    tpu.vector_store %arg10[%c0_14, %c1_15, %c0_16], %18 {strides = array<i32>} : memref<20x18x4xf32, #tpu.memory_space<vmem>>, vector<2x16x4xf32>,
    %c0_17 = arith.constant 0 : index
    %c0_18 = arith.constant 0 : index
    %c0_19 = arith.constant 0 : index
    %c0_20 = arith.constant 0 : index
    %20 = vector.load %arg4[%c0_17, %c0_18, %c0_19, %c0_20] : memref<1x2x16x4xf32, #tpu.memory_space<vmem>>, vector<1x2x16x4xf32>
    %21 = vector.shape_cast %20 : vector<1x2x16x4xf32> to vector<2x16x4xf32>
    %c1_i32 = arith.constant 1 : i32
    %22 = arith.addi %arg1, %c1_i32 : i32
    %c16_i32_21 = arith.constant 16 : i32
    %23 = arith.muli %22, %c16_i32_21 : i32
    %24 = tpu.iota {dimensions = array<i32: 0>} : vector<2x1x1xi32>
    %25 = vector.broadcast %23 : i32 to vector<2x1x1xi32>
    %26 = arith.addi %25, %24 : vector<2x1x1xi32>
    %c16_i32_22 = arith.constant 16 : i32
    %27 = vector.broadcast %c16_i32_22 : i32 to vector<2x1x1xi32>
    %28 = arith.cmpi slt, %26, %27 : vector<2x1x1xi32>
    %cst_23 = arith.constant 0.000000e+00 : f32
    %29 = vector.broadcast %cst_23 : f32 to vector<2x16x4xf32>
    %30 = vector.shape_cast %28 : vector<2x1x1xi1> to vector<2x1x1xi1>
    %31 = vector.broadcast %30 : vector<2x1x1xi1> to vector<2x16x4xi1>
    %32 = arith.select %31, %21, %29 : vector<2x16x4xi1>, vector<2x16x4xf32>
    %c18 = arith.constant 18 : index
    %c1_24 = arith.constant 1 : index
    %c0_25 = arith.constant 0 : index
    %33 = vector.load %arg10[%c18, %c1_24, %c0_25] : memref<20x18x4xf32, #tpu.memory_space<vmem>>, vector<2x16x4xf32>
    tpu.vector_store %arg10[%c18, %c1_24, %c0_25], %32 {strides = array<i32>} : memref<20x18x4xf32, #tpu.memory_space<vmem>>, vector<2x16x4xf32>,
    %c0_26 = arith.constant 0 : index
    %c0_27 = arith.constant 0 : index
    %c0_28 = arith.constant 0 : index
    %34 = vector.load %arg10[%c0_26, %c0_27, %c0_28] : memref<20x18x4xf32, #tpu.memory_space<vmem>>, vector<20x16x4xf32>
    %c0_29 = arith.constant 0 : index
    %c0_30 = arith.constant 0 : index
    %c0_31 = arith.constant 0 : index
    %35 = vector.load %arg11[%c0_29, %c0_30, %c0_31] : memref<20x16x12xf32, #tpu.memory_space<vmem>>, vector<20x16x4xf32>
    tpu.vector_store %arg11[%c0_29, %c0_30, %c0_31], %34 {strides = array<i32>} : memref<20x16x12xf32, #tpu.memory_space<vmem>>, vector<20x16x4xf32>,
    %c0_32 = arith.constant 0 : index
    %c1_33 = arith.constant 1 : index
    %c0_34 = arith.constant 0 : index
    %36 = vector.load %arg10[%c0_32, %c1_33, %c0_34] : memref<20x18x4xf32, #tpu.memory_space<vmem>>, vector<20x16x4xf32>
    %c0_35 = arith.constant 0 : index
    %c0_36 = arith.constant 0 : index
    %c4 = arith.constant 4 : index
    %37 = vector.load %arg11[%c0_35, %c0_36, %c4] : memref<20x16x12xf32, #tpu.memory_space<vmem>>, vector<20x16x4xf32>
    tpu.vector_store %arg11[%c0_35, %c0_36, %c4], %36 {strides = array<i32>} : memref<20x16x12xf32, #tpu.memory_space<vmem>>, vector<20x16x4xf32>,
    %c0_37 = arith.constant 0 : index
    %c2_38 = arith.constant 2 : index
    %c0_39 = arith.constant 0 : index
    %38 = vector.load %arg10[%c0_37, %c2_38, %c0_39] : memref<20x18x4xf32, #tpu.memory_space<vmem>>, vector<20x16x4xf32>
    %c0_40 = arith.constant 0 : index
    %c0_41 = arith.constant 0 : index
    %c8 = arith.constant 8 : index
    %39 = vector.load %arg11[%c0_40, %c0_41, %c8] : memref<20x16x12xf32, #tpu.memory_space<vmem>>, vector<20x16x4xf32>
    tpu.vector_store %arg11[%c0_40, %c0_41, %c8], %38 {strides = array<i32>} : memref<20x16x12xf32, #tpu.memory_space<vmem>>, vector<20x16x4xf32>,
    %c0_42 = arith.constant 0 : index
    %c0_43 = arith.constant 0 : index
    %c0_44 = arith.constant 0 : index
    %40 = vector.load %arg11[%c0_42, %c0_43, %c0_44] : memref<20x16x12xf32, #tpu.memory_space<vmem>>, vector<18x16x12xf32>
    %41 = vector.shape_cast %40 : vector<18x16x12xf32> to vector<288x12xf32>
    %c0_45 = arith.constant 0 : index
    %c0_46 = arith.constant 0 : index
    %c0_47 = arith.constant 0 : index
    %42 = vector.load %arg5[%c0_45, %c0_46, %c0_47] : memref<3x12x4xf32, #tpu.memory_space<vmem>>, vector<1x12x4xf32>
    %43 = vector.shape_cast %42 : vector<1x12x4xf32> to vector<12x4xf32>
    %cst_48 = arith.constant dense<0.000000e+00> : vector<288x4xf32>
    %44 = tpu.matmul %41, %43, %cst_48 {dimension_numbers = #tpu.dot_dimension_numbers<[1], [0], [0], [1], [0, 0, 1, 1], [], []>} : vector<288x12xf32>, vector<12x4xf32>, vector<288x4xf32> -> vector<288x4xf32>
    %c0_49 = arith.constant 0 : index
    %c0_50 = arith.constant 0 : index
    %45 = vector.load %arg6[%c0_49, %c0_50] : memref<1x4xf32, #tpu.memory_space<vmem>>, vector<1x4xf32>
    %46 = vector.broadcast %45 : vector<1x4xf32> to vector<288x4xf32>
    %47 = arith.addf %44, %46 : vector<288x4xf32>
    %48 = vector.shape_cast %47 : vector<288x4xf32> to vector<18x16x4xf32>
    %c0_51 = arith.constant 0 : index
    %c0_52 = arith.constant 0 : index
    %c0_53 = arith.constant 0 : index
    %49 = vector.load %arg12[%c0_51, %c0_52, %c0_53] : memref<18x16x4xf32, #tpu.memory_space<vmem>>, vector<18x16x4xf32>
    tpu.vector_store %arg12[%c0_51, %c0_52, %c0_53], %48 {strides = array<i32>} : memref<18x16x4xf32, #tpu.memory_space<vmem>>, vector<18x16x4xf32>,
    %c1_54 = arith.constant 1 : index
    %c0_55 = arith.constant 0 : index
    %c0_56 = arith.constant 0 : index
    %50 = vector.load %arg11[%c1_54, %c0_55, %c0_56] : memref<20x16x12xf32, #tpu.memory_space<vmem>>, vector<18x16x12xf32>
    %51 = vector.shape_cast %50 : vector<18x16x12xf32> to vector<288x12xf32>
    %c0_57 = arith.constant 0 : index
    %c0_58 = arith.constant 0 : index
    %c0_59 = arith.constant 0 : index
    %52 = vector.load %arg12[%c0_57, %c0_58, %c0_59] : memref<18x16x4xf32, #tpu.memory_space<vmem>>, vector<18x16x4xf32>
    %c1_60 = arith.constant 1 : index
    %c0_61 = arith.constant 0 : index
    %c0_62 = arith.constant 0 : index
    %53 = vector.load %arg5[%c1_60, %c0_61, %c0_62] : memref<3x12x4xf32, #tpu.memory_space<vmem>>, vector<1x12x4xf32>
    %54 = vector.shape_cast %53 : vector<1x12x4xf32> to vector<12x4xf32>
    %cst_63 = arith.constant dense<0.000000e+00> : vector<288x4xf32>
    %55 = tpu.matmul %51, %54, %cst_63 {dimension_numbers = #tpu.dot_dimension_numbers<[1], [0], [0], [1], [0, 0, 1, 1], [], []>} : vector<288x12xf32>, vector<12x4xf32>, vector<288x4xf32> -> vector<288x4xf32>
    %56 = vector.shape_cast %55 : vector<288x4xf32> to vector<18x16x4xf32>
    %57 = arith.addf %52, %56 : vector<18x16x4xf32>
    %c0_64 = arith.constant 0 : index
    %c0_65 = arith.constant 0 : index
    %c0_66 = arith.constant 0 : index
    %58 = vector.load %arg12[%c0_64, %c0_65, %c0_66] : memref<18x16x4xf32, #tpu.memory_space<vmem>>, vector<18x16x4xf32>
    tpu.vector_store %arg12[%c0_64, %c0_65, %c0_66], %57 {strides = array<i32>} : memref<18x16x4xf32, #tpu.memory_space<vmem>>, vector<18x16x4xf32>,
    %c2_67 = arith.constant 2 : index
    %c0_68 = arith.constant 0 : index
    %c0_69 = arith.constant 0 : index
    %59 = vector.load %arg11[%c2_67, %c0_68, %c0_69] : memref<20x16x12xf32, #tpu.memory_space<vmem>>, vector<18x16x12xf32>
    %60 = vector.shape_cast %59 : vector<18x16x12xf32> to vector<288x12xf32>
    %c0_70 = arith.constant 0 : index
    %c0_71 = arith.constant 0 : index
    %c0_72 = arith.constant 0 : index
    %61 = vector.load %arg12[%c0_70, %c0_71, %c0_72] : memref<18x16x4xf32, #tpu.memory_space<vmem>>, vector<18x16x4xf32>
    %c2_73 = arith.constant 2 : index
    %c0_74 = arith.constant 0 : index
    %c0_75 = arith.constant 0 : index
    %62 = vector.load %arg5[%c2_73, %c0_74, %c0_75] : memref<3x12x4xf32, #tpu.memory_space<vmem>>, vector<1x12x4xf32>
    %63 = vector.shape_cast %62 : vector<1x12x4xf32> to vector<12x4xf32>
    %cst_76 = arith.constant dense<0.000000e+00> : vector<288x4xf32>
    %64 = tpu.matmul %60, %63, %cst_76 {dimension_numbers = #tpu.dot_dimension_numbers<[1], [0], [0], [1], [0, 0, 1, 1], [], []>} : vector<288x12xf32>, vector<12x4xf32>, vector<288x4xf32> -> vector<288x4xf32>
    %65 = vector.shape_cast %64 : vector<288x4xf32> to vector<18x16x4xf32>
    %66 = arith.addf %61, %65 : vector<18x16x4xf32>
    %c0_77 = arith.constant 0 : index
    %c0_78 = arith.constant 0 : index
    %c0_79 = arith.constant 0 : index
    %67 = vector.load %arg12[%c0_77, %c0_78, %c0_79] : memref<18x16x4xf32, #tpu.memory_space<vmem>>, vector<18x16x4xf32>
    tpu.vector_store %arg12[%c0_77, %c0_78, %c0_79], %66 {strides = array<i32>} : memref<18x16x4xf32, #tpu.memory_space<vmem>>, vector<18x16x4xf32>,
    %c16_i32_80 = arith.constant 16 : i32
    %68 = arith.muli %arg1, %c16_i32_80 : i32
    %c1_i32_81 = arith.constant 1 : i32
    %69 = arith.subi %68, %c1_i32_81 : i32
    %70 = tpu.iota {dimensions = array<i32: 0>} : vector<18x1x1xi32>
    %71 = vector.broadcast %69 : i32 to vector<18x1x1xi32>
    %72 = arith.addi %71, %70 : vector<18x1x1xi32>
    %c0_i32_82 = arith.constant 0 : i32
    %73 = vector.broadcast %c0_i32_82 : i32 to vector<18x1x1xi32>
    %74 = arith.cmpi sge, %72, %73 : vector<18x1x1xi32>
    %c16_i32_83 = arith.constant 16 : i32
    %75 = vector.broadcast %c16_i32_83 : i32 to vector<18x1x1xi32>
    %76 = arith.cmpi slt, %72, %75 : vector<18x1x1xi32>
    %77 = arith.andi %74, %76 : vector<18x1x1xi1>
    %c0_84 = arith.constant 0 : index
    %c0_85 = arith.constant 0 : index
    %c0_86 = arith.constant 0 : index
    %78 = vector.load %arg12[%c0_84, %c0_85, %c0_86] : memref<18x16x4xf32, #tpu.memory_space<vmem>>, vector<18x16x4xf32>
    %cst_87 = arith.constant 0.000000e+00 : f32
    %79 = vector.broadcast %cst_87 : f32 to vector<18x16x4xf32>
    %80 = arith.maximumf %78, %79 : vector<18x16x4xf32>
    %cst_88 = arith.constant 0.000000e+00 : f32
    %81 = vector.shape_cast %77 : vector<18x1x1xi1> to vector<18x1x1xi1>
    %82 = vector.broadcast %81 : vector<18x1x1xi1> to vector<18x16x4xi1>
    %83 = vector.broadcast %cst_88 : f32 to vector<18x16x4xf32>
    %84 = arith.select %82, %80, %83 : vector<18x16x4xi1>, vector<18x16x4xf32>
    %c0_89 = arith.constant 0 : index
    %c0_90 = arith.constant 0 : index
    %c0_91 = arith.constant 0 : index
    %85 = vector.load %arg12[%c0_89, %c0_90, %c0_91] : memref<18x16x4xf32, #tpu.memory_space<vmem>>, vector<18x16x4xf32>
    tpu.vector_store %arg12[%c0_89, %c0_90, %c0_91], %84 {strides = array<i32>} : memref<18x16x4xf32, #tpu.memory_space<vmem>>, vector<18x16x4xf32>,
    %cst_92 = arith.constant 0.000000e+00 : f32
    %86 = vector.broadcast %cst_92 : f32 to vector<18x1x4xf32>
    %c0_93 = arith.constant 0 : index
    %c0_94 = arith.constant 0 : index
    %c0_95 = arith.constant 0 : index
    %87 = vector.load %arg12[%c0_93, %c0_94, %c0_95] : memref<18x16x4xf32, #tpu.memory_space<vmem>>, vector<18x16x4xf32>
    %c0_96 = arith.constant 0 : index
    %c0_97 = arith.constant 0 : index
    %c4_98 = arith.constant 4 : index
    %88 = vector.load %arg11[%c0_96, %c0_97, %c4_98] : memref<20x16x12xf32, #tpu.memory_space<vmem>>, vector<18x16x4xf32>
    tpu.vector_store %arg11[%c0_96, %c0_97, %c4_98], %87 {strides = array<i32>} : memref<20x16x12xf32, #tpu.memory_space<vmem>>, vector<18x16x4xf32>,
    %c0_99 = arith.constant 0 : index
    %c0_100 = arith.constant 0 : index
    %c0_101 = arith.constant 0 : index
    %89 = vector.load %arg11[%c0_99, %c0_100, %c0_101] : memref<20x16x12xf32, #tpu.memory_space<vmem>>, vector<18x1x4xf32>
    tpu.vector_store %arg11[%c0_99, %c0_100, %c0_101], %86 {strides = array<i32>} : memref<20x16x12xf32, #tpu.memory_space<vmem>>, vector<18x1x4xf32>,
    %c0_102 = arith.constant 0 : index
    %c0_103 = arith.constant 0 : index
    %c0_104 = arith.constant 0 : index
    %90 = vector.load %arg12[%c0_102, %c0_103, %c0_104] : memref<18x16x4xf32, #tpu.memory_space<vmem>>, vector<18x15x4xf32>
    %c0_105 = arith.constant 0 : index
    %c1_106 = arith.constant 1 : index
    %c0_107 = arith.constant 0 : index
    %91 = vector.load %arg11[%c0_105, %c1_106, %c0_107] : memref<20x16x12xf32, #tpu.memory_space<vmem>>, vector<18x15x4xf32>
    tpu.vector_store %arg11[%c0_105, %c1_106, %c0_107], %90 {strides = array<i32>} : memref<20x16x12xf32, #tpu.memory_space<vmem>>, vector<18x15x4xf32>,
    %c0_108 = arith.constant 0 : index
    %c15 = arith.constant 15 : index
    %c8_109 = arith.constant 8 : index
    %92 = vector.load %arg11[%c0_108, %c15, %c8_109] : memref<20x16x12xf32, #tpu.memory_space<vmem>>, vector<18x1x4xf32>
    tpu.vector_store %arg11[%c0_108, %c15, %c8_109], %86 {strides = array<i32>} : memref<20x16x12xf32, #tpu.memory_space<vmem>>, vector<18x1x4xf32>,
    %c0_110 = arith.constant 0 : index
    %c1_111 = arith.constant 1 : index
    %c0_112 = arith.constant 0 : index
    %93 = vector.load %arg12[%c0_110, %c1_111, %c0_112] : memref<18x16x4xf32, #tpu.memory_space<vmem>>, vector<18x15x4xf32>
    %c0_113 = arith.constant 0 : index
    %c0_114 = arith.constant 0 : index
    %c8_115 = arith.constant 8 : index
    %94 = vector.load %arg11[%c0_113, %c0_114, %c8_115] : memref<20x16x12xf32, #tpu.memory_space<vmem>>, vector<18x15x4xf32>
    tpu.vector_store %arg11[%c0_113, %c0_114, %c8_115], %93 {strides = array<i32>} : memref<20x16x12xf32, #tpu.memory_space<vmem>>, vector<18x15x4xf32>,
    %c0_116 = arith.constant 0 : index
    %c0_117 = arith.constant 0 : index
    %c0_118 = arith.constant 0 : index
    %95 = vector.load %arg11[%c0_116, %c0_117, %c0_118] : memref<20x16x12xf32, #tpu.memory_space<vmem>>, vector<16x16x12xf32>
    %96 = vector.shape_cast %95 : vector<16x16x12xf32> to vector<256x12xf32>
    %c0_119 = arith.constant 0 : index
    %c0_120 = arith.constant 0 : index
    %c0_121 = arith.constant 0 : index
    %97 = vector.load %arg7[%c0_119, %c0_120, %c0_121] : memref<3x12x4xf32, #tpu.memory_space<vmem>>, vector<1x12x4xf32>
    %98 = vector.shape_cast %97 : vector<1x12x4xf32> to vector<12x4xf32>
    %cst_122 = arith.constant dense<0.000000e+00> : vector<256x4xf32>
    %99 = tpu.matmul %96, %98, %cst_122 {dimension_numbers = #tpu.dot_dimension_numbers<[1], [0], [0], [1], [0, 0, 1, 1], [], []>} : vector<256x12xf32>, vector<12x4xf32>, vector<256x4xf32> -> vector<256x4xf32>
    %c0_123 = arith.constant 0 : index
    %c0_124 = arith.constant 0 : index
    %100 = vector.load %arg8[%c0_123, %c0_124] : memref<1x4xf32, #tpu.memory_space<vmem>>, vector<1x4xf32>
    %101 = vector.broadcast %100 : vector<1x4xf32> to vector<256x4xf32>
    %102 = arith.addf %99, %101 : vector<256x4xf32>
    %103 = vector.shape_cast %102 : vector<256x4xf32> to vector<16x16x4xf32>
    %c0_125 = arith.constant 0 : index
    %c0_126 = arith.constant 0 : index
    %c0_127 = arith.constant 0 : index
    %104 = vector.load %arg12[%c0_125, %c0_126, %c0_127] : memref<18x16x4xf32, #tpu.memory_space<vmem>>, vector<16x16x4xf32>
    tpu.vector_store %arg12[%c0_125, %c0_126, %c0_127], %103 {strides = array<i32>} : memref<18x16x4xf32, #tpu.memory_space<vmem>>, vector<16x16x4xf32>,
    %c1_128 = arith.constant 1 : index
    %c0_129 = arith.constant 0 : index
    %c0_130 = arith.constant 0 : index
    %105 = vector.load %arg11[%c1_128, %c0_129, %c0_130] : memref<20x16x12xf32, #tpu.memory_space<vmem>>, vector<16x16x12xf32>
    %106 = vector.shape_cast %105 : vector<16x16x12xf32> to vector<256x12xf32>
    %c0_131 = arith.constant 0 : index
    %c0_132 = arith.constant 0 : index
    %c0_133 = arith.constant 0 : index
    %107 = vector.load %arg12[%c0_131, %c0_132, %c0_133] : memref<18x16x4xf32, #tpu.memory_space<vmem>>, vector<16x16x4xf32>
    %c1_134 = arith.constant 1 : index
    %c0_135 = arith.constant 0 : index
    %c0_136 = arith.constant 0 : index
    %108 = vector.load %arg7[%c1_134, %c0_135, %c0_136] : memref<3x12x4xf32, #tpu.memory_space<vmem>>, vector<1x12x4xf32>
    %109 = vector.shape_cast %108 : vector<1x12x4xf32> to vector<12x4xf32>
    %cst_137 = arith.constant dense<0.000000e+00> : vector<256x4xf32>
    %110 = tpu.matmul %106, %109, %cst_137 {dimension_numbers = #tpu.dot_dimension_numbers<[1], [0], [0], [1], [0, 0, 1, 1], [], []>} : vector<256x12xf32>, vector<12x4xf32>, vector<256x4xf32> -> vector<256x4xf32>
    %111 = vector.shape_cast %110 : vector<256x4xf32> to vector<16x16x4xf32>
    %112 = arith.addf %107, %111 : vector<16x16x4xf32>
    %c0_138 = arith.constant 0 : index
    %c0_139 = arith.constant 0 : index
    %c0_140 = arith.constant 0 : index
    %113 = vector.load %arg12[%c0_138, %c0_139, %c0_140] : memref<18x16x4xf32, #tpu.memory_space<vmem>>, vector<16x16x4xf32>
    tpu.vector_store %arg12[%c0_138, %c0_139, %c0_140], %112 {strides = array<i32>} : memref<18x16x4xf32, #tpu.memory_space<vmem>>, vector<16x16x4xf32>,
    %c2_141 = arith.constant 2 : index
    %c0_142 = arith.constant 0 : index
    %c0_143 = arith.constant 0 : index
    %114 = vector.load %arg11[%c2_141, %c0_142, %c0_143] : memref<20x16x12xf32, #tpu.memory_space<vmem>>, vector<16x16x12xf32>
    %115 = vector.shape_cast %114 : vector<16x16x12xf32> to vector<256x12xf32>
    %c0_144 = arith.constant 0 : index
    %c0_145 = arith.constant 0 : index
    %c0_146 = arith.constant 0 : index
    %116 = vector.load %arg12[%c0_144, %c0_145, %c0_146] : memref<18x16x4xf32, #tpu.memory_space<vmem>>, vector<16x16x4xf32>
    %c2_147 = arith.constant 2 : index
    %c0_148 = arith.constant 0 : index
    %c0_149 = arith.constant 0 : index
    %117 = vector.load %arg7[%c2_147, %c0_148, %c0_149] : memref<3x12x4xf32, #tpu.memory_space<vmem>>, vector<1x12x4xf32>
    %118 = vector.shape_cast %117 : vector<1x12x4xf32> to vector<12x4xf32>
    %cst_150 = arith.constant dense<0.000000e+00> : vector<256x4xf32>
    %119 = tpu.matmul %115, %118, %cst_150 {dimension_numbers = #tpu.dot_dimension_numbers<[1], [0], [0], [1], [0, 0, 1, 1], [], []>} : vector<256x12xf32>, vector<12x4xf32>, vector<256x4xf32> -> vector<256x4xf32>
    %120 = vector.shape_cast %119 : vector<256x4xf32> to vector<16x16x4xf32>
    %121 = arith.addf %116, %120 : vector<16x16x4xf32>
    %c0_151 = arith.constant 0 : index
    %c0_152 = arith.constant 0 : index
    %c0_153 = arith.constant 0 : index
    %122 = vector.load %arg12[%c0_151, %c0_152, %c0_153] : memref<18x16x4xf32, #tpu.memory_space<vmem>>, vector<16x16x4xf32>
    tpu.vector_store %arg12[%c0_151, %c0_152, %c0_153], %121 {strides = array<i32>} : memref<18x16x4xf32, #tpu.memory_space<vmem>>, vector<16x16x4xf32>,
    %c0_154 = arith.constant 0 : index
    %c0_155 = arith.constant 0 : index
    %c0_156 = arith.constant 0 : index
    %c0_157 = arith.constant 0 : index
    %123 = vector.load %arg2[%c0_154, %c0_155, %c0_156, %c0_157] : memref<1x16x16x4xf32, #tpu.memory_space<vmem>>, vector<1x16x16x4xf32>
    %124 = vector.shape_cast %123 : vector<1x16x16x4xf32> to vector<16x16x4xf32>
    %c0_158 = arith.constant 0 : index
    %c0_159 = arith.constant 0 : index
    %c0_160 = arith.constant 0 : index
    %125 = vector.load %arg12[%c0_158, %c0_159, %c0_160] : memref<18x16x4xf32, #tpu.memory_space<vmem>>, vector<16x16x4xf32>
    %126 = arith.addf %124, %125 : vector<16x16x4xf32>
    %c0_161 = arith.constant 0 : index
    %c0_162 = arith.constant 0 : index
    %c0_163 = arith.constant 0 : index
    %c0_164 = arith.constant 0 : index
    %127 = vector.load %arg9[%c0_161, %c0_162, %c0_163, %c0_164] : memref<1x16x16x4xf32, #tpu.memory_space<vmem>>, vector<1x16x16x4xf32>
    %128 = vector.shape_cast %127 : vector<1x16x16x4xf32> to vector<16x16x4xf32>
    %129 = vector.shape_cast %126 : vector<16x16x4xf32> to vector<1x16x16x4xf32>
    tpu.vector_store %arg9[%c0_161, %c0_162, %c0_163, %c0_164], %129 {strides = array<i32>} : memref<1x16x16x4xf32, #tpu.memory_space<vmem>>, vector<1x16x16x4xf32>,
    return
  }
  func.func @transform_0(%arg0: i32, %arg1: i32) -> (i32, i32, i32, i32) {
    %c0_i32 = arith.constant 0 : i32
    %c0_i32_0 = arith.constant 0 : i32
    %c0_i32_1 = arith.constant 0 : i32
    return %arg0, %arg1, %c0_i32, %c0_i32_0 : i32, i32, i32, i32
  }
  func.func @transform_1(%arg0: i32, %arg1: i32) -> (i32, i32, i32, i32) {
    %c8_i32 = arith.constant 8 : i32
    %0 = arith.muli %arg1, %c8_i32 : i32
    %c1_i32 = arith.constant 1 : i32
    %1 = arith.subi %0, %c1_i32 : i32
    %c0_i32 = arith.constant 0 : i32
    %2 = arith.maxsi %1, %c0_i32 : i32
    %c0_i32_0 = arith.constant 0 : i32
    %c0_i32_1 = arith.constant 0 : i32
    %c0_i32_2 = arith.constant 0 : i32
    return %arg0, %2, %c0_i32_0, %c0_i32_1 : i32, i32, i32, i32
  }
  func.func @transform_2(%arg0: i32, %arg1: i32) -> (i32, i32, i32, i32) {
    %c1_i32 = arith.constant 1 : i32
    %0 = arith.addi %arg1, %c1_i32 : i32
    %c8_i32 = arith.constant 8 : i32
    %1 = arith.muli %0, %c8_i32 : i32
    %c7_i32 = arith.constant 7 : i32
    %2 = arith.minsi %1, %c7_i32 : i32
    %c0_i32 = arith.constant 0 : i32
    %c0_i32_0 = arith.constant 0 : i32
    %c0_i32_1 = arith.constant 0 : i32
    return %arg0, %2, %c0_i32, %c0_i32_0 : i32, i32, i32, i32
  }
  func.func @transform_3(%arg0: i32, %arg1: i32) -> (i32, i32, i32) {
    %c0_i32 = arith.constant 0 : i32
    %c0_i32_0 = arith.constant 0 : i32
    %c0_i32_1 = arith.constant 0 : i32
    %c0_i32_2 = arith.constant 0 : i32
    return %c0_i32, %c0_i32_0, %c0_i32_1 : i32, i32, i32
  }
  func.func @transform_4(%arg0: i32, %arg1: i32) -> (i32, i32) {
    %c0_i32 = arith.constant 0 : i32
    %c0_i32_0 = arith.constant 0 : i32
    %c0_i32_1 = arith.constant 0 : i32
    return %c0_i32, %c0_i32_0 : i32, i32
  }
  func.func @transform_5(%arg0: i32, %arg1: i32) -> (i32, i32, i32) {
    %c0_i32 = arith.constant 0 : i32
    %c0_i32_0 = arith.constant 0 : i32
    %c0_i32_1 = arith.constant 0 : i32
    %c0_i32_2 = arith.constant 0 : i32
    return %c0_i32, %c0_i32_0, %c0_i32_1 : i32, i32, i32
  }
  func.func @transform_6(%arg0: i32, %arg1: i32) -> (i32, i32) {
    %c0_i32 = arith.constant 0 : i32
    %c0_i32_0 = arith.constant 0 : i32
    %c0_i32_1 = arith.constant 0 : i32
    return %c0_i32, %c0_i32_0 : i32, i32
  }
  func.func @transform_7(%arg0: i32, %arg1: i32) -> (i32, i32, i32, i32) {
    %c0_i32 = arith.constant 0 : i32
    %c0_i32_0 = arith.constant 0 : i32
    %c0_i32_1 = arith.constant 0 : i32
    return %arg0, %arg1, %c0_i32, %c0_i32_0 : i32, i32, i32, i32
  }
}

</mosaic_0001>

<bundles_post_ra>
// kernel: tpu_custom_call.1
= control target key start
LH: loop header
LB: loop body
LE: loop exit
PB: predicated region body
PF: predicated region fallthrough
CT: control target
= control target key end

     0   :  { %s5907_s24 = smov 0   ;;  %s5909_s1 = smov 0   ;;  %s7743_s0 = inlined_call_operand.vmem [shape: f32[2,16,16,4], index: 0, kind: input, shape index: {}]   ;;  %s7744_s1 = inlined_call_operand.vmem [shape: f32[2,16,16,4], index: 1, kind: input, shape index: {}]   ;;  %s7745_s2 = inlined_call_operand.vmem [shape: f32[2,16,16,4], index: 2, kind: input, shape index: {}]   ;;  %s7746_s3 = inlined_call_operand.vmem [shape: f32[3,12,4], index: 3, kind: input, shape index: {}]   ;;  %s7747_s4 = inlined_call_operand.vmem [shape: f32[1,4], index: 4, kind: input, shape index: {}]   ;;  %s7748_s5 = inlined_call_operand.vmem [shape: f32[3,12,4], index: 5, kind: input, shape index: {}]   ;;  %s7749_s6 = inlined_call_operand.vmem [shape: f32[1,4], index: 6, kind: input, shape index: {}]   ;;  %s7750_s7 = inlined_call_operand.vmem [shape: f32[2,16,16,4], index: 7, kind: output, shape index: {}]  }
   0x1   :  { %s5911_s2 = smov 0  }
   0x2 LB: > { %s29_s25 = sadd.s32 1, %s5857_s1  ;;  %p4991_p0 = scmp.ge.s32.totalorder %s5861_s2, 1  ;;  %s5861_s2 = sphi %s5911_s2, %s17_s2   ;;  %s5857_s1 = sphi %s5909_s1, %s7754_s1   ;;  %s5853_s24 = sphi %s5907_s24, %s7753_s24  }
   0x3   : > { %p31_p1 = scmp.ge.s32.totalorder %s29_s25, 2  ;;  %p327_p2 = scmp.lt.s32.totalorder %s5861_s2, 3 }
   0x5   : > { %s7756_s25 = smov (%p31_p1, %s29_s25), 0  ;;  %p328_p3 = pnand %p4991_p0, %p327_p2 }
   0x6   : > { %vm531_vm0 = vcmask (!%p328_p3), 31744   ;;  %vm457_vm1 = vcmask (!%p328_p3), 24576   ;;  %v5863_v0 = vmov (!%p328_p3), 0.0   ;;  %p398_p4 = scmp.lt.s32.totalorder (!%p328_p3), %s5853_s24, 1  ;;  %v1207_v1 = vld [vmem:[%s7746_s3] sm:$0xff] (!%p328_p3)  ;;  %vm1325_vm2 = vcmask (!%p328_p3), 1043456  }
   0x7   : > { %331 = sbr.rel (%p328_p3) target bundleno = 1070 (0x42e), region = 48  ;;  %582 = vst.msk [vmem:[#allocation2 + $0x1] sm:$0xff] (!%p328_p3), %vm531_vm0, %v5863_v0  ;;  %583 = vst.msk [vmem:[#allocation2 + $0x9] sm:$0xff] (!%p328_p3), %vm531_vm0, %v5863_v0  ;;  %v1208_v2 = vld [vmem:[%s7746_s3 + $0x8] sm:$0xf] (!%p328_p3)  ;;  %vm5864_vm3 = vmmov (!%p328_p3), 1  }
   0x8   : > { %584 = vst.msk [vmem:[#allocation2 + $0x19] sm:$0xff] (!%p328_p3), %vm531_vm0, %v5863_v0  ;;  %585 = vst.msk [vmem:[#allocation2 + $0x21] sm:$0xff] (!%p328_p3), %vm531_vm0, %v5863_v0  ;;  %v5773_v3 = vpack.c.bf16 (!%p328_p3), %v1208_v2, %v1207_v1  ;;  %s5865_s11 = smov (!%p328_p3), 4   ;;  %s5866_s12 = smov (!%p328_p3), 8   ;;  %vm889_vm5 = vcmask (!%p328_p3), 64544   ;;  %vm1130_vm6 = vcmask (!%p328_p3), 97344  }
   0x9   : > { %605 = vst.msk [vmem:[#allocation2 + $0x1b1] sm:$0xff] (!%p328_p3), %vm531_vm0, %v5863_v0  ;;  %606 = vst.msk [vmem:[#allocation2 + $0x1b9] sm:$0xff] (!%p328_p3), %vm531_vm0, %v5863_v0  ;;  %vm1216_vm7 = vcmask (!%p328_p3), 97280   ;;  %vm3142_vm8 = vcmask (!%p328_p3), 30720   ;;  %vm3178_vm9 = vcmask (!%p328_p3), 90176   ;;  %vm3378_vm10 = vcmask (!%p328_p3), 96320  }
   0xa   : > { %607 = vst.msk [vmem:[#allocation2 + $0x1c9] sm:$0xff] (!%p328_p3), %vm531_vm0, %v5863_v0  ;;  %608 = vst.msk [vmem:[#allocation2 + $0x1d1] sm:$0xff] (!%p328_p3), %vm531_vm0, %v5863_v0 }
   0xb   : > { %478 = vst.msk [vmem:[#allocation2 + $0x11] sm:$0x1] (!%p328_p3), %vm457_vm1, %v5863_v0  ;;  %458 = vst.msk [vmem:[#allocation2] sm:$0x1] (!%p328_p3), %vm457_vm1, %v5863_v0 }
   0xc   : > { %459 = vst.msk [vmem:[#allocation2 + $0x18] sm:$0x1] (!%p328_p3), %vm457_vm1, %v5863_v0  ;;  %460 = vst.msk [vmem:[#allocation2 + $0x30] sm:$0x1] (!%p328_p3), %vm457_vm1, %v5863_v0 }
   0xd   : > { %461 = vst.msk [vmem:[#allocation2 + $0x48] sm:$0x1] (!%p328_p3), %vm457_vm1, %v5863_v0  ;;  %462 = vst.msk [vmem:[#allocation2 + $0x60] sm:$0x1] (!%p328_p3), %vm457_vm1, %v5863_v0 }
   0xe   : > { %463 = vst.msk [vmem:[#allocation2 + $0x78] sm:$0x1] %vm457_vm1, %v5863_v0  ;;  %464 = vst.msk [vmem:[#allocation2 + $0x90] sm:$0x1] %vm457_vm1, %v5863_v0  ;;  %s7758_s24 = smov (!%p398_p4, %s5853_s24), 1  ;;  %v689_v8 = vld [vmem:[#allocation2 + $0x1] sm:$0xff] }
   0xf   : > { %465 = vst.msk [vmem:[#allocation2 + $0xa8] sm:$0x1] %vm457_vm1, %v5863_v0  ;;  %466 = vst.msk [vmem:[#allocation2 + $0xc0] sm:$0x1] %vm457_vm1, %v5863_v0  ;;  %s5222_s30 = sshll.u32 %s7758_s24, 8  ;;  %v930_v9 = vld [vmem:[#allocation2 + $0x2] sm:$0xff]  ;;  %769 = vrot.lane.b32.xlu0 %v689_v8, %s5865_s11 }
  0x10   : > { %467 = vst.msk [vmem:[#allocation2 + $0xd8] sm:$0x1] %vm457_vm1, %v5863_v0  ;;  %468 = vst.msk [vmem:[#allocation2 + $0xf0] sm:$0x1] %vm457_vm1, %v5863_v0  ;;  %s6047_s10 = scalar_lea.vmem %s7743_s0, %s5222_s30  ;;  %1010 = vrot.lane.b32.xlu1 %v930_v9, %s5866_s12  ;;  %v690_v10 = vld [vmem:[#allocation2 + $0x9] sm:$0xff]  ;;  %v691_v16 = vld [vmem:[#allocation2 + $0x19] sm:$0xff]  ;;  %s7560_s20 = scalar_lea.vmem %s7750_s7, %s5222_s30 }
  0x11   : > { %469 = vst.msk [vmem:[#allocation2 + $0x108] sm:$0x1] %vm457_vm1, %v5863_v0  ;;  %470 = vst.msk [vmem:[#allocation2 + $0x120] sm:$0x1] %vm457_vm1, %v5863_v0  ;;  %v498_v5 = vld [vmem:[%s6047_s10] sm:$0xff]  ;;  %v499_v6 = vld [vmem:[%s6047_s10 + $0x8] sm:$0xff] }
  0x12   : > { %471 = vst.msk [vmem:[#allocation2 + $0x138] sm:$0x1] %vm457_vm1, %v5863_v0  ;;  %472 = vst.msk [vmem:[#allocation2 + $0x150] sm:$0x1] %vm457_vm1, %v5863_v0  ;;  %v500_v7 = vld [vmem:[%s6047_s10 + $0x10] sm:$0xff]  ;;  %v501_v12 = vld [vmem:[%s6047_s10 + $0x18] sm:$0xff] }
  0x13   : > { %473 = vst.msk [vmem:[#allocation2 + $0x168] sm:$0x1] %vm457_vm1, %v5863_v0  ;;  %474 = vst.msk [vmem:[#allocation2 + $0x180] sm:$0x1] %vm457_vm1, %v5863_v0  ;;  %v931_v11 = vld [vmem:[#allocation2 + $0xa] sm:$0xff]  ;;  %v502_v13 = vld [vmem:[%s6047_s10 + $0x20] sm:$0xff]  ;;  %771 = vrot.lane.b32.xlu0 %v690_v10, %s5865_s11 }
  0x14   : > { %475 = vst.msk [vmem:[#allocation2 + $0x198] sm:$0x1] %vm457_vm1, %v5863_v0  ;;  %476 = vst.msk [vmem:[#allocation2 + $0x1b0] sm:$0x1] %vm457_vm1, %v5863_v0  ;;  %v503_v14 = vld [vmem:[%s6047_s10 + $0x28] sm:$0xff]  ;;  %v504_v15 = vld [vmem:[%s6047_s10 + $0x30] sm:$0xff]  ;;  %1012 = vrot.lane.b32.xlu1 %v931_v11, %s5866_s12 }
  0x15   : > { %477 = vst.msk [vmem:[#allocation2 + $0x1c8] sm:$0x1] %vm457_vm1, %v5863_v0  ;;  %479 = vst.msk [vmem:[#allocation2 + $0x29] sm:$0x1] %vm457_vm1, %v5863_v0  ;;  %v692_v17 = vld [vmem:[#allocation2 + $0x21] sm:$0xff]  ;;  %v505_v18 = vld [vmem:[%s6047_s10 + $0x38] sm:$0xff] }
  0x16   : > { %480 = vst.msk [vmem:[#allocation2 + $0x41] sm:$0x1] %vm457_vm1, %v5863_v0  ;;  %481 = vst.msk [vmem:[#allocation2 + $0x59] sm:$0x1] %vm457_vm1, %v5863_v0  ;;  %v506_v19 = vld [vmem:[%s6047_s10 + $0x40] sm:$0xff]  ;;  %v507_v20 = vld [vmem:[%s6047_s10 + $0x48] sm:$0xff] }
  0x17   : > { %482 = vst.msk [vmem:[#allocation2 + $0x71] sm:$0x1] %vm457_vm1, %v5863_v0  ;;  %483 = vst.msk [vmem:[#allocation2 + $0x89] sm:$0x1] %vm457_vm1, %v5863_v0  ;;  %v508_v21 = vld [vmem:[%s6047_s10 + $0x50] sm:$0xff]  ;;  %v509_v22 = vld [vmem:[%s6047_s10 + $0x58] sm:$0xff]  ;;  %773 = vrot.lane.b32.xlu0 %v691_v16, %s5865_s11 }
  0x18   : > { %484 = vst.msk [vmem:[#allocation2 + $0xa1] sm:$0x1] %vm457_vm1, %v5863_v0  ;;  %485 = vst.msk [vmem:[#allocation2 + $0xb9] sm:$0x1] %vm457_vm1, %v5863_v0  ;;  %v609_v23 = vld [vmem:[#allocation2] sm:$0xff]  ;;  %v511_v25 = vld [vmem:[%s6047_s10 + $0x68] sm:$0xff]  ;;  %775 = vrot.lane.b32.xlu1 %v692_v17, %s5865_s11 }
  0x19   : > { %486 = vst.msk [vmem:[#allocation2 + $0xd1] sm:$0x1] %vm457_vm1, %v5863_v0  ;;  %487 = vst.msk [vmem:[#allocation2 + $0xe9] sm:$0x1] %vm457_vm1, %v5863_v0  ;;  %v510_v24 = vld [vmem:[%s6047_s10 + $0x60] sm:$0xff]  ;;  %v512_v26 = vld [vmem:[%s6047_s10 + $0x70] sm:$0xff] }
  0x1a   : > { %488 = vst.msk [vmem:[#allocation2 + $0x101] sm:$0x1] %vm457_vm1, %v5863_v0  ;;  %489 = vst.msk [vmem:[#allocation2 + $0x119] sm:$0x1] %vm457_vm1, %v5863_v0  ;;  %v513_v27 = vld [vmem:[%s6047_s10 + $0x78] sm:$0xff]  ;;  %v514_v28 = vld [vmem:[%s6047_s10 + $0x80] sm:$0xff] }
  0x1b   : > { %490 = vst.msk [vmem:[#allocation2 + $0x131] sm:$0x1] %vm457_vm1, %v5863_v0  ;;  %491 = vst.msk [vmem:[#allocation2 + $0x149] sm:$0x1] %vm457_vm1, %v5863_v0  ;;  %v515_v29 = vld [vmem:[%s6047_s10 + $0x88] sm:$0xff]  ;;  %v932_v31 = vld [vmem:[#allocation2 + $0x1a] sm:$0xff] }
  0x1c   : > { %492 = vst.msk [vmem:[#allocation2 + $0x161] sm:$0x1] %vm457_vm1, %v5863_v0  ;;  %493 = vst.msk [vmem:[#allocation2 + $0x179] sm:$0x1] %vm457_vm1, %v5863_v0  ;;  %v610_v30 = vld [vmem:[#allocation2 + $0x8] sm:$0xff]  ;;  %1014 = vrot.lane.b32.xlu0 %v932_v31, %s5866_s12  ;;  %v516_v39 = vld [vmem:[%s6047_s10 + $0x90] sm:$0xff] }
  0x1d   : > { %494 = vst.msk [vmem:[#allocation2 + $0x191] sm:$0x1] %vm457_vm1, %v5863_v0  ;;  %495 = vst.msk [vmem:[#allocation2 + $0x1a9] sm:$0x1] %vm457_vm1, %v5863_v0  ;;  %v933_v32 = vld [vmem:[#allocation2 + $0x22] sm:$0xff]  ;;  %v517_v40 = vld [vmem:[%s6047_s10 + $0x98] sm:$0xff] }
  0x1e   : > { %496 = vst.msk [vmem:[#allocation2 + $0x1c1] sm:$0x1] %vm457_vm1, %v5863_v0  ;;  %497 = vst.msk [vmem:[#allocation2 + $0x1d9] sm:$0x1] %vm457_vm1, %v5863_v0  ;;  %1016 = vrot.lane.b32.xlu1 %v933_v32, %s5866_s12  ;;  %v518_v41 = vld [vmem:[%s6047_s10 + $0xa0] sm:$0xff]  ;;  %v519_v42 = vld [vmem:[%s6047_s10 + $0xa8] sm:$0xff] }
  0x1f   : > { %vm6033_vm4 = vmpackc.low %vm1325_vm2, %vm5864_vm3  ;;  %532 = vst.msk [vmem:[#allocation2 + $0x31] sm:$0xff] %vm531_vm0, %v498_v5  ;;  %v611_v43 = vld [vmem:[#allocation2 + $0x18] sm:$0xff]  ;;  %v520_v44 = vld [vmem:[%s6047_s10 + $0xb0] sm:$0xff] }
  0x20   : > { %5775 = vmatprep.subr.msk.bf16.mxu0 %vm6033_vm4, %v5773_v3  ;;  %5809 = vmatprep.subr.msk.bf16.mxu1 %vm6033_vm4, %v5773_v3  ;;  %533 = vst.msk [vmem:[#allocation2 + $0x39] sm:$0xff] %vm531_vm0, %v499_v6  ;;  %534 = vst.msk [vmem:[#allocation2 + $0x49] sm:$0xff] %vm531_vm0, %v500_v7  ;;  %v521_v45 = vld [vmem:[%s6047_s10 + $0xb8] sm:$0xff]  ;;  %v528_v46 = vld [vmem:[%s6047_s10 + $0xf0] sm:$0xff] }
  0x21   : > { %5778 = vmatpush3.bf16.msk.msra.mxu0 %vm6033_vm4, %v5773_v3  ;;  %5810 = vmatpush3.bf16.msk.msra.mxu1 %vm6033_vm4, %v5773_v3  ;;  %535 = vst.msk [vmem:[#allocation2 + $0x51] sm:$0xff] %vm531_vm0, %v501_v12  ;;  %536 = vst.msk [vmem:[#allocation2 + $0x61] sm:$0xff] %vm531_vm0, %v502_v13  ;;  %v529_v47 = vld [vmem:[%s6047_s10 + $0xf8] sm:$0xff]  ;;  %v522_v48 = vld [vmem:[%s6047_s10 + $0xc0] sm:$0xff] }
  0x22   : > { %537 = vst.msk [vmem:[#allocation2 + $0x69] sm:$0xff] %vm531_vm0, %v503_v14  ;;  %538 = vst.msk [vmem:[#allocation2 + $0x79] sm:$0xff] %vm531_vm0, %v504_v15  ;;  %v523_v49 = vld [vmem:[%s6047_s10 + $0xc8] sm:$0xff]  ;;  %v612_v52 = vld [vmem:[#allocation2 + $0x20] sm:$0xff] }
  0x23   : > { %539 = vst.msk [vmem:[#allocation2 + $0x81] sm:$0xff] %vm531_vm0, %v505_v18  ;;  %540 = vst.msk [vmem:[#allocation2 + $0x91] sm:$0xff] %vm531_vm0, %v506_v19  ;;  %v524_v53 = vld [vmem:[%s6047_s10 + $0xd0] sm:$0xff]  ;;  %v525_v54 = vld [vmem:[%s6047_s10 + $0xd8] sm:$0xff] }
  0x24   : > { %541 = vst.msk [vmem:[#allocation2 + $0x99] sm:$0xff] %vm531_vm0, %v507_v20  ;;  %542 = vst.msk [vmem:[#allocation2 + $0xa9] sm:$0xff] %vm531_vm0, %v508_v21  ;;  %v526_v57 = vld [vmem:[%s6047_s10 + $0xe0] sm:$0xff]  ;;  %v527_v58 = vld [vmem:[%s6047_s10 + $0xe8] sm:$0xff] }
  0x25   : > { %543 = vst.msk [vmem:[#allocation2 + $0xb1] sm:$0xff] %vm531_vm0, %v509_v22  ;;  %649 = vst.msk [vmem:[#allocation3] sm:$0xff] %vm531_vm0, %v609_v23 }
  0x26   : > { %544 = vst.msk [vmem:[#allocation2 + $0xc1] sm:$0xff] %vm531_vm0, %v510_v24  ;;  %545 = vst.msk [vmem:[#allocation2 + $0xc9] sm:$0xff] %vm531_vm0, %v511_v25  ;;  %v693_v33 = vld [vmem:[#allocation2 + $0x31] sm:$0xff] }
  0x27   : > { %546 = vst.msk [vmem:[#allocation2 + $0xd9] sm:$0xff] %vm531_vm0, %v512_v26  ;;  %547 = vst.msk [vmem:[#allocation2 + $0xe1] sm:$0xff] %vm531_vm0, %v513_v27  ;;  %v694_v34 = vld [vmem:[#allocation2 + $0x39] sm:$0xff]  ;;  %777 = vrot.lane.b32.xlu0 %v693_v33, %s5865_s11  ;;  %v695_v37 = vld [vmem:[#allocation2 + $0x49] sm:$0xff] }
  0x28   : > { %548 = vst.msk [vmem:[#allocation2 + $0xf1] sm:$0xff] %vm531_vm0, %v514_v28  ;;  %549 = vst.msk [vmem:[#allocation2 + $0xf9] sm:$0xff] %vm531_vm0, %v515_v29  ;;  %779 = vrot.lane.b32.xlu1 %v694_v34, %s5865_s11  ;;  %v934_v35 = vld [vmem:[#allocation2 + $0x32] sm:$0xff]  ;;  %v935_v36 = vld [vmem:[#allocation2 + $0x3a] sm:$0xff] }
  0x29   : > { %650 = vst.msk [vmem:[#allocation3 + $0x8] sm:$0xff] %vm531_vm0, %v610_v30  ;;  %v696_v38 = vld [vmem:[#allocation2 + $0x51] sm:$0xff]  ;;  %550 = vst.msk [vmem:[#allocation2 + $0x109] sm:$0xff] %vm531_vm0, %v516_v39  ;;  %v615_v59 = vld [vmem:[#allocation2 + $0x48] sm:$0xff] }
  0x2a   : > { %551 = vst.msk [vmem:[#allocation2 + $0x111] sm:$0xff] %vm531_vm0, %v517_v40  ;;  %552 = vst.msk [vmem:[#allocation2 + $0x121] sm:$0xff] %vm531_vm0, %v518_v41  ;;  %v936_v50 = vld [vmem:[#allocation2 + $0x4a] sm:$0xff]  ;;  %v937_v51 = vld [vmem:[#allocation2 + $0x52] sm:$0xff] }
  0x2b   : > { %1018 = vrot.lane.b32.xlu0 %v934_v35, %s5866_s12  ;;  %553 = vst.msk [vmem:[#allocation2 + $0x129] sm:$0xff] %vm531_vm0, %v519_v42  ;;  %651 = vst.msk [vmem:[#allocation3 + $0x10] sm:$0xff] %vm531_vm0, %v611_v43  ;;  %v613_v55 = vld [vmem:[#allocation2 + $0x30] sm:$0xff]  ;;  %v614_v56 = vld [vmem:[#allocation2 + $0x38] sm:$0xff] }
  0x2c   : > { %1020 = vrot.lane.b32.xlu1 %v935_v36, %s5866_s12  ;;  %554 = vst.msk [vmem:[#allocation2 + $0x139] sm:$0xff] %vm531_vm0, %v520_v44  ;;  %555 = vst.msk [vmem:[#allocation2 + $0x141] sm:$0xff] %vm531_vm0, %v521_v45  ;;  %v616_v60 = vld [vmem:[#allocation2 + $0x50] sm:$0xff]  ;;  %v617_v61 = vld [vmem:[#allocation2 + $0x60] sm:$0xff] }
  0x2d   : > { %562 = vst.msk [vmem:[#allocation2 + $0x199] sm:$0xff] %vm531_vm0, %v528_v46  ;;  %563 = vst.msk [vmem:[#allocation2 + $0x1a1] sm:$0xff] %vm531_vm0, %v529_v47  ;;  %v618_v62 = vld [vmem:[#allocation2 + $0x68] sm:$0xff]  ;;  %v619_v63 = vld [vmem:[#allocation2 + $0x78] sm:$0xff] }
  0x2e   : > { %556 = vst.msk [vmem:[#allocation2 + $0x151] sm:$0xff] %vm531_vm0, %v522_v48  ;;  %557 = vst.msk [vmem:[#allocation2 + $0x159] sm:$0xff] %vm531_vm0, %v523_v49  ;;  %v697_v1 = vld [vmem:[#allocation2 + $0x61] sm:$0xff]  ;;  %v698_v2 = vld [vmem:[#allocation2 + $0x69] sm:$0xff] }
  0x2f   : > { %781 = vrot.lane.b32.xlu0 %v695_v37, %s5865_s11  ;;  %652 = vst.msk [vmem:[#allocation3 + $0x18] sm:$0xff] %vm531_vm0, %v612_v52  ;;  %558 = vst.msk [vmem:[#allocation2 + $0x169] sm:$0xff] %vm531_vm0, %v524_v53  ;;  %v938_v3 = vld [vmem:[#allocation2 + $0x62] sm:$0xff]  ;;  %v939_v5 = vld [vmem:[#allocation2 + $0x6a] sm:$0xff] }
  0x30   : > { %783 = vrot.lane.b32.xlu1 %v696_v38, %s5865_s11  ;;  %559 = vst.msk [vmem:[#allocation2 + $0x171] sm:$0xff] %vm531_vm0, %v525_v54  ;;  %653 = vst.msk [vmem:[#allocation3 + $0x20] sm:$0xff] %vm531_vm0, %v613_v55  ;;  %v620_v6 = vld [vmem:[#allocation2 + $0x80] sm:$0xff]  ;;  %v621_v7 = vld [vmem:[#allocation2 + $0x90] sm:$0xff] }
  0x31   : > { %654 = vst.msk [vmem:[#allocation3 + $0x28] sm:$0xff] %vm531_vm0, %v614_v56  ;;  %560 = vst.msk [vmem:[#allocation2 + $0x181] sm:$0xff] %vm531_vm0, %v526_v57  ;;  %v699_v8 = vld [vmem:[#allocation2 + $0x79] sm:$0xff]  ;;  %v700_v9 = vld [vmem:[#allocation2 + $0x81] sm:$0xff] }
  0x32   : > { %561 = vst.msk [vmem:[#allocation2 + $0x189] sm:$0xff] %vm531_vm0, %v527_v58  ;;  %655 = vst.msk [vmem:[#allocation3 + $0x30] sm:$0xff] %vm531_vm0, %v615_v59  ;;  %v622_v10 = vld [vmem:[#allocation2 + $0x98] sm:$0xff]  ;;  %v623_v11 = vld [vmem:[#allocation2 + $0xa8] sm:$0xff] }
  0x33   : > { %656 = vst.msk [vmem:[#allocation3 + $0x38] sm:$0xff] %vm531_vm0, %v616_v60  ;;  %657 = vst.msk [vmem:[#allocation3 + $0x40] sm:$0xff] %vm531_vm0, %v617_v61  ;;  %1022 = vrot.lane.b32.xlu0 %v936_v50, %s5866_s12  ;;  %v940_v12 = vld [vmem:[#allocation2 + $0x7a] sm:$0xff]  ;;  %v941_v13 = vld [vmem:[#allocation2 + $0x82] sm:$0xff] }
  0x34   : > { %658 = vst.msk [vmem:[#allocation3 + $0x48] sm:$0xff] %vm531_vm0, %v618_v62  ;;  %659 = vst.msk [vmem:[#allocation3 + $0x50] sm:$0xff] %vm531_vm0, %v619_v63  ;;  %1024 = vrot.lane.b32.xlu1 %v937_v51, %s5866_s12  ;;  %v624_v14 = vld [vmem:[#allocation2 + $0xb0] sm:$0xff]  ;;  %v702_v16 = vld [vmem:[#allocation2 + $0x99] sm:$0xff] }
  0x35   : > { %660 = vst.msk [vmem:[#allocation3 + $0x58] sm:$0xff] %vm531_vm0, %v620_v6  ;;  %661 = vst.msk [vmem:[#allocation3 + $0x60] sm:$0xff] %vm531_vm0, %v621_v7  ;;  %v701_v15 = vld [vmem:[#allocation2 + $0x91] sm:$0xff]  ;;  %v625_v17 = vld [vmem:[#allocation2 + $0xc0] sm:$0xff] }
  0x36   : > { %662 = vst.msk [vmem:[#allocation3 + $0x68] sm:$0xff] %vm531_vm0, %v622_v10  ;;  %663 = vst.msk [vmem:[#allocation3 + $0x70] sm:$0xff] %vm531_vm0, %v623_v11  ;;  %v942_v18 = vld [vmem:[#allocation2 + $0x92] sm:$0xff]  ;;  %v943_v19 = vld [vmem:[#allocation2 + $0x9a] sm:$0xff] }
  0x37   : > { %785 = vrot.lane.b32.xlu0 %v697_v1, %s5865_s11  ;;  %664 = vst.msk [vmem:[#allocation3 + $0x78] sm:$0xff] %vm531_vm0, %v624_v14  ;;  %665 = vst.msk [vmem:[#allocation3 + $0x80] sm:$0xff] %vm531_vm0, %v625_v17  ;;  %v626_v20 = vld [vmem:[#allocation2 + $0xc8] sm:$0xff]  ;;  %v704_v22 = vld [vmem:[#allocation2 + $0xb1] sm:$0xff] }
  0x38   : > { %787 = vrot.lane.b32.xlu1 %v698_v2, %s5865_s11  ;;  %666 = vst.msk [vmem:[#allocation3 + $0x88] sm:$0xff] %vm531_vm0, %v626_v20  ;;  %v703_v21 = vld [vmem:[#allocation2 + $0xa9] sm:$0xff]  ;;  %v627_v23 = vld [vmem:[#allocation2 + $0xd8] sm:$0xff]  ;;  %v628_v26 = vld [vmem:[#allocation2 + $0xe0] sm:$0xff] }
  0x39   : > { %v944_v24 = vld [vmem:[#allocation2 + $0xaa] sm:$0xff]  ;;  %v945_v25 = vld [vmem:[#allocation2 + $0xb2] sm:$0xff]  ;;  %667 = vst.msk [vmem:[#allocation3 + $0x90] sm:$0xff] %vm531_vm0, %v627_v23  ;;  %668 = vst.msk [vmem:[#allocation3 + $0x98] sm:$0xff] %vm531_vm0, %v628_v26 }
  0x3a   : > { %v705_v27 = vld [vmem:[#allocation2 + $0xc1] sm:$0xff]  ;;  %v706_v28 = vld [vmem:[#allocation2 + $0xc9] sm:$0xff]  ;;  %v630_v32 = vld [vmem:[#allocation2 + $0xf8] sm:$0xff] }
  0x3b   : > { %1026 = vrot.lane.b32.xlu0 %v938_v3, %s5866_s12  ;;  %v629_v29 = vld [vmem:[#allocation2 + $0xf0] sm:$0xff]  ;;  %v946_v30 = vld [vmem:[#allocation2 + $0xc2] sm:$0xff]  ;;  %670 = vst.msk [vmem:[#allocation3 + $0xa8] sm:$0xff] %vm531_vm0, %v630_v32  ;;  %v707_v33 = vld [vmem:[#allocation2 + $0xd9] sm:$0xff] }
  0x3c   : > { %1028 = vrot.lane.b32.xlu1 %v939_v5, %s5866_s12  ;;  %v947_v31 = vld [vmem:[#allocation2 + $0xca] sm:$0xff]  ;;  %669 = vst.msk [vmem:[#allocation3 + $0xa0] sm:$0xff] %vm531_vm0, %v629_v29  ;;  %v708_v34 = vld [vmem:[#allocation2 + $0xe1] sm:$0xff]  ;;  %v710_v43 = vld [vmem:[#allocation2 + $0xf9] sm:$0xff] }
  0x3d   : > { %v5077_v35 = vld [vmem:[%s7746_s3 + $0x20] sm:$0xff]  ;;  %v5078_v36 = vld [vmem:[%s7746_s3 + $0x28] sm:$0xf]  ;;  %v632_v41 = vld [vmem:[#allocation2 + $0x110] sm:$0xff] }
  0x3e   : > { %v6183_v37 = vpack.c.bf16 %v5078_v36, %v5077_v35  ;;  %v631_v38 = vld [vmem:[#allocation2 + $0x108] sm:$0xff]  ;;  %v948_v39 = vld [vmem:[#allocation2 + $0xda] sm:$0xff]  ;;  %672 = vst.msk [vmem:[#allocation3 + $0xb8] sm:$0xff] %vm531_vm0, %v632_v41  ;;  %v709_v42 = vld [vmem:[#allocation2 + $0xf1] sm:$0xff] }
  0x3f   : > { %789 = vrot.lane.b32.xlu0 %v699_v8, %s5865_s11  ;;  %v949_v40 = vld [vmem:[#allocation2 + $0xe2] sm:$0xff]  ;;  %671 = vst.msk [vmem:[#allocation3 + $0xb0] sm:$0xff] %vm531_vm0, %v631_v38  ;;  %v950_v45 = vld [vmem:[#allocation2 + $0xf2] sm:$0xff]  ;;  %v951_v46 = vld [vmem:[#allocation2 + $0xfa] sm:$0xff] }
  0x40   : > { %791 = vrot.lane.b32.xlu1 %v700_v9, %s5865_s11  ;;  %5787 = vmatprep.subr.msk.bf16.mxu0 %vm6033_vm4, %v6183_v37  ;;  %v633_v44 = vld [vmem:[#allocation2 + $0x120] sm:$0xff]  ;;  %v634_v47 = vld [vmem:[#allocation2 + $0x128] sm:$0xff]  ;;  %v712_v49 = vld [vmem:[#allocation2 + $0x111] sm:$0xff] }
  0x41   : > { %673 = vst.msk [vmem:[#allocation3 + $0xc0] sm:$0xff] %vm531_vm0, %v633_v44  ;;  %674 = vst.msk [vmem:[#allocation3 + $0xc8] sm:$0xff] %vm531_vm0, %v634_v47  ;;  %v711_v48 = vld [vmem:[#allocation2 + $0x109] sm:$0xff]  ;;  %v635_v50 = vld [vmem:[#allocation2 + $0x138] sm:$0xff] }
  0x42   : > { %v952_v51 = vld [vmem:[#allocation2 + $0x10a] sm:$0xff]  ;;  %v953_v52 = vld [vmem:[#allocation2 + $0x112] sm:$0xff]  ;;  %675 = vst.msk [vmem:[#allocation3 + $0xd0] sm:$0xff] %vm531_vm0, %v635_v50  ;;  %v636_v53 = vld [vmem:[#allocation2 + $0x140] sm:$0xff] }
  0x43   : > { %1030 = vrot.lane.b32.xlu0 %v940_v12, %s5866_s12  ;;  %676 = vst.msk [vmem:[#allocation3 + $0xd8] sm:$0xff] %vm531_vm0, %v636_v53  ;;  %v713_v54 = vld [vmem:[#allocation2 + $0x121] sm:$0xff]  ;;  %v714_v55 = vld [vmem:[#allocation2 + $0x129] sm:$0xff]  ;;  %v643_v56 = vld [vmem:[#allocation2 + $0x198] sm:$0xff] }
  0x44   : > { %1032 = vrot.lane.b32.xlu1 %v941_v13, %s5866_s12  ;;  %683 = vst.msk [vmem:[#allocation3 + $0x110] sm:$0xff] %vm531_vm0, %v643_v56  ;;  %v954_v57 = vld [vmem:[#allocation2 + $0x122] sm:$0xff]  ;;  %v955_v58 = vld [vmem:[#allocation2 + $0x12a] sm:$0xff]  ;;  %v715_v60 = vld [vmem:[#allocation2 + $0x139] sm:$0xff] }
  0x45   : > { %v644_v59 = vld [vmem:[#allocation2 + $0x1a0] sm:$0xff]  ;;  %v637_v62 = vld [vmem:[#allocation2 + $0x150] sm:$0xff]  ;;  %v638_v2 = vld [vmem:[#allocation2 + $0x158] sm:$0xff] }
  0x46   : > { %684 = vst.msk [vmem:[#allocation3 + $0x118] sm:$0xff] %vm531_vm0, %v644_v59  ;;  %v716_v61 = vld [vmem:[#allocation2 + $0x141] sm:$0xff]  ;;  %677 = vst.msk [vmem:[#allocation3 + $0xe0] sm:$0xff] %vm531_vm0, %v637_v62  ;;  %v723_v1 = vld [vmem:[#allocation2 + $0x199] sm:$0xff] }
  0x47   : > { %793 = vrot.lane.b32.xlu0 %v701_v15, %s5865_s11  ;;  %v956_v63 = vld [vmem:[#allocation2 + $0x13a] sm:$0xff]  ;;  %678 = vst.msk [vmem:[#allocation3 + $0xe8] sm:$0xff] %vm531_vm0, %v638_v2  ;;  %v957_v3 = vld [vmem:[#allocation2 + $0x142] sm:$0xff]  ;;  %v5038_v7 = vld [vmem:[%s7746_s3 + $0x10] sm:$0xff] }
  0x48   : > { %795 = vrot.lane.b32.xlu1 %v702_v16, %s5865_s11  ;;  %v724_v5 = vld [vmem:[#allocation2 + $0x1a1] sm:$0xff]  ;;  %v5039_v8 = vld [vmem:[%s7746_s3 + $0x18] sm:$0xf]  ;;  %v640_v14 = vld [vmem:[#allocation2 + $0x170] sm:$0xff] }
  0x49   : > { %v639_v6 = vld [vmem:[#allocation2 + $0x168] sm:$0xff]  ;;  %v964_v9 = vld [vmem:[#allocation2 + $0x19a] sm:$0xff]  ;;  %v717_v10 = vld [vmem:[#allocation2 + $0x151] sm:$0xff]  ;;  %v6225_v11 = vpack.c.bf16 %v5039_v8, %v5038_v7  ;;  %680 = vst.msk [vmem:[#allocation3 + $0xf8] sm:$0xff] %vm531_vm0, %v640_v14 }
  0x4a   : > { %679 = vst.msk [vmem:[#allocation3 + $0xf0] sm:$0xff] %vm531_vm0, %v639_v6  ;;  %v965_v15 = vld [vmem:[#allocation2 + $0x1a2] sm:$0xff]  ;;  %v718_v16 = vld [vmem:[#allocation2 + $0x159] sm:$0xff]  ;;  %v720_v29 = vld [vmem:[#allocation2 + $0x171] sm:$0xff] }
  0x4b   : > { %1034 = vrot.lane.b32.xlu0 %v942_v18, %s5866_s12  ;;  %5781 = vmatprep.subr.msk.bf16.mxu1 %vm6033_vm4, %v6225_v11  ;;  %v958_v20 = vld [vmem:[#allocation2 + $0x152] sm:$0xff]  ;;  %v959_v23 = vld [vmem:[#allocation2 + $0x15a] sm:$0xff]  ;;  %v719_v26 = vld [vmem:[#allocation2 + $0x169] sm:$0xff] }
  0x4c   : > { %1036 = vrot.lane.b32.xlu1 %v943_v19, %s5866_s12  ;;  %v641_v19 = vld [vmem:[#allocation2 + $0x180] sm:$0xff]  ;;  %v722_v41 = vld [vmem:[#allocation2 + $0x189] sm:$0xff] }
  0x4d   : > { %681 = vst.msk [vmem:[#allocation3 + $0x100] sm:$0xff] %vm531_vm0, %v641_v19  ;;  %v721_v35 = vld [vmem:[#allocation2 + $0x181] sm:$0xff]  ;;  %v963_v44 = vld [vmem:[#allocation2 + $0x18a] sm:$0xff]  ;;  %v726_v50 = vld [vmem:[#allocation2 + $0x1b9] sm:$0xff] }
  0x4f   : > { %797 = vrot.lane.b32.xlu0 %v703_v21, %s5865_s11 }
  0x50   : > { %799 = vrot.lane.b32.xlu1 %v704_v22, %s5865_s11 }
  0x53   : > { %1038 = vrot.lane.b32.xlu0 %v944_v24, %s5866_s12  ;;  %v642_v24 = vld [vmem:[#allocation2 + $0x188] sm:$0xff] }
  0x54   : > { %1040 = vrot.lane.b32.xlu1 %v945_v25, %s5866_s12  ;;  %682 = vst.msk [vmem:[#allocation3 + $0x108] sm:$0xff] %vm531_vm0, %v642_v24 }
  0x57   : > { %801 = vrot.lane.b32.xlu0 %v705_v27, %s5865_s11 }
  0x58   : > { %803 = vrot.lane.b32.xlu1 %v706_v28, %s5865_s11 }
  0x5b   : > { %1042 = vrot.lane.b32.xlu0 %v946_v30, %s5866_s12 }
  0x5c   : > { %1044 = vrot.lane.b32.xlu1 %v947_v31, %s5866_s12  ;;  %v960_v31 = vld [vmem:[#allocation2 + $0x16a] sm:$0xff] }
  0x5f   : > { %805 = vrot.lane.b32.xlu0 %v707_v33, %s5865_s11 }
  0x60   : > { %807 = vrot.lane.b32.xlu1 %v708_v34, %s5865_s11  ;;  %v961_v34 = vld [vmem:[#allocation2 + $0x172] sm:$0xff] }
  0x63   : > { %1046 = vrot.lane.b32.xlu0 %v948_v39, %s5866_s12 }
  0x64   : > { %1048 = vrot.lane.b32.xlu1 %v949_v40, %s5866_s12 }
  0x67   : > { %809 = vrot.lane.b32.xlu0 %v709_v42, %s5865_s11 }
  0x68   : > { %811 = vrot.lane.b32.xlu1 %v710_v43, %s5865_s11 }
  0x6b   : > { %1050 = vrot.lane.b32.xlu0 %v950_v45, %s5866_s12  ;;  %v725_v45 = vld [vmem:[#allocation2 + $0x1b1] sm:$0xff] }
  0x6c   : > { %1052 = vrot.lane.b32.xlu1 %v951_v46, %s5866_s12 }
  0x6f   : > { %813 = vrot.lane.b32.xlu0 %v711_v48, %s5865_s11 }
  0x70   : > { %815 = vrot.lane.b32.xlu1 %v712_v49, %s5865_s11 }
  0x73   : > { %1054 = vrot.lane.b32.xlu0 %v952_v51, %s5866_s12  ;;  %v966_v51 = vld [vmem:[#allocation2 + $0x1b2] sm:$0xff] }
  0x74   : > { %1056 = vrot.lane.b32.xlu1 %v953_v52, %s5866_s12 }
  0x77   : > { %817 = vrot.lane.b32.xlu0 %v713_v54, %s5865_s11  ;;  %v967_v54 = vld [vmem:[#allocation2 + $0x1ba] sm:$0xff] }
  0x78   : > { %819 = vrot.lane.b32.xlu1 %v714_v55, %s5865_s11  ;;  %v727_v55 = vld [vmem:[#allocation2 + $0x1c9] sm:$0xff] }
  0x7b   : > { %1058 = vrot.lane.b32.xlu0 %v954_v57, %s5866_s12 }
  0x7c   : > { %1060 = vrot.lane.b32.xlu1 %v955_v58, %s5866_s12 }
  0x7f   : > { %821 = vrot.lane.b32.xlu0 %v715_v60, %s5865_s11  ;;  %v728_v60 = vld [vmem:[#allocation2 + $0x1d1] sm:$0xff] }
  0x80   : > { %823 = vrot.lane.b32.xlu1 %v716_v61, %s5865_s11  ;;  %v968_v61 = vld [vmem:[#allocation2 + $0x1ca] sm:$0xff] }
  0x81   : > { %v770_v12 = vpop.permute.xlu0 %769 }
  0x82   : > { %v1011_v13 = vpop.permute.xlu1 %1010  ;;  %890 = vst.msk [vmem:[#allocation3] sm:$0xff] %vm889_vm5, %v770_v12 }
  0x83   : > { %1062 = vrot.lane.b32.xlu0 %v956_v63, %s5866_s12  ;;  %1131 = vst.msk [vmem:[#allocation3] sm:$0xff] %vm1130_vm6, %v1011_v13 }
  0x84   : > { %837 = vrot.lane.b32.xlu1 %v723_v1, %s5865_s11  ;;  %v969_v1 = vld [vmem:[#allocation2 + $0x1d2] sm:$0xff] }
  0x85   : > { %v772_v17 = vpop.permute.xlu0 %771 }
  0x86   : > { %v1013_v18 = vpop.permute.xlu1 %1012  ;;  %891 = vst.msk [vmem:[#allocation3 + $0x8] sm:$0xff] %vm889_vm5, %v772_v17  ;;  %v646_v17 = vld [vmem:[#allocation2 + $0x1b8] sm:$0xff] }
  0x87   : > { %1064 = vrot.lane.b32.xlu0 %v957_v3, %s5866_s12  ;;  %1132 = vst.msk [vmem:[#allocation3 + $0x8] sm:$0xff] %vm1130_vm6, %v1013_v18 }
  0x88   : > { %839 = vrot.lane.b32.xlu1 %v724_v5, %s5865_s11  ;;  %686 = vst.msk [vmem:[#allocation3 + $0x128] sm:$0xff] %vm531_vm0, %v646_v17 }
  0x89   : > { %v774_v21 = vpop.permute.xlu0 %773 }
  0x8a   : > { %v776_v22 = vpop.permute.xlu1 %775  ;;  %892 = vst.msk [vmem:[#allocation3 + $0x10] sm:$0xff] %vm889_vm5, %v774_v21  ;;  %v1171_v25 = vld [vmem:[#allocation3] sm:$0xff] }
  0x8b   : > { %1078 = vrot.lane.b32.xlu0 %v964_v9, %s5866_s12  ;;  %893 = vst.msk [vmem:[#allocation3 + $0x18] sm:$0xff] %vm889_vm5, %v776_v22  ;;  %5447 = vmatprep.mubr.msk.f32.mxu0 %vm1216_vm7, %v1171_v25 }
  0x8c   : > { %825 = vrot.lane.b32.xlu1 %v717_v10, %s5865_s11 }
  0x8e   : > { %v1015_v27 = vpop.permute.xlu0 %1014  ;;  %v1172_v30 = vld [vmem:[#allocation3 + $0x8] sm:$0xff] }
  0x8f   : > { %1080 = vrot.lane.b32.xlu0 %v965_v15, %s5866_s12  ;;  %1133 = vst.msk [vmem:[#allocation3 + $0x10] sm:$0xff] %vm1130_vm6, %v1015_v27  ;;  %5448 = vmatmul.mubr.msk.f32.vlgmr.msra.gmra.mrb[0].mxu0 %vm1216_vm7, %v1172_v30 }
  0x90   : > { %827 = vrot.lane.b32.xlu1 %v718_v16, %s5865_s11  ;;  %v1017_v28 = vpop.permute.xlu1 %1016  ;;  %5790 = vmatpush3.bf16.msk.msra.mxu0 %vm6033_vm4, %v6183_v37  ;;  %v962_v37 = vld [vmem:[#allocation2 + $0x182] sm:$0xff]  ;;  %v645_v16 = vld [vmem:[#allocation2 + $0x1b0] sm:$0xff] }
  0x91   : > { %1134 = vst.msk [vmem:[#allocation3 + $0x18] sm:$0xff] %vm1130_vm6, %v1017_v28 }
  0x92   : > { %685 = vst.msk [vmem:[#allocation3 + $0x120] sm:$0xff] %vm531_vm0, %v645_v16 }
  0x93   : > { %1066 = vrot.lane.b32.xlu0 %v958_v20, %s5866_s12 }
  0x94   : > { %1068 = vrot.lane.b32.xlu1 %v959_v23, %s5866_s12 }
  0x96   : > { %v6258_v38 = vld [vmem:[#allocation3 + $0x10] sm:$0xff] }
  0x97   : > { %829 = vrot.lane.b32.xlu0 %v719_v26, %s5865_s11  ;;  %5450 = vmatprep.mubr.msk.f32.mxu0 %vm1216_vm7, %v6258_v38 }
  0x98   : > { %831 = vrot.lane.b32.xlu1 %v720_v29, %s5865_s11  ;;  %v6260_v40 = vld [vmem:[#allocation3 + $0x18] sm:$0xff] }
  0x99   : > { %v778_v32 = vpop.permute.xlu0 %777  ;;  %5451 = vmatmul.mubr.msk.f32.gmra.mrb[2].mxu0 %vm1216_vm7, %v6260_v40 }
  0x9a   : > { %v780_v33 = vpop.permute.xlu1 %779  ;;  %894 = vst.msk [vmem:[#allocation3 + $0x20] sm:$0xff] %vm889_vm5, %v778_v32 }
  0x9b   : > { %895 = vst.msk [vmem:[#allocation3 + $0x28] sm:$0xff] %vm889_vm5, %v780_v33  ;;  %1070 = vrot.lane.b32.xlu0 %v960_v31, %s5866_s12 }
  0x9c   : > { %1072 = vrot.lane.b32.xlu1 %v961_v34, %s5866_s12  ;;  %v647_v34 = vld [vmem:[#allocation2 + $0x1c8] sm:$0xff] }
  0x9d   : > { %v1019_v36 = vpop.permute.xlu0 %1018  ;;  %687 = vst.msk [vmem:[#allocation3 + $0x130] sm:$0xff] %vm531_vm0, %v647_v34 }
  0x9e   : > { %v1021_v39 = vpop.permute.xlu1 %1020  ;;  %1135 = vst.msk [vmem:[#allocation3 + $0x20] sm:$0xff] %vm1130_vm6, %v1019_v36 }
  0x9f   : > { %1136 = vst.msk [vmem:[#allocation3 + $0x28] sm:$0xff] %vm1130_vm6, %v1021_v39  ;;  %833 = vrot.lane.b32.xlu0 %v721_v35, %s5865_s11  ;;  %v648_v35 = vld [vmem:[#allocation2 + $0x1d0] sm:$0xff] }
  0xa0   : > { %835 = vrot.lane.b32.xlu1 %v722_v41, %s5865_s11  ;;  %688 = vst.msk [vmem:[#allocation3 + $0x138] sm:$0xff] %vm531_vm0, %v648_v35 }
  0xa1   : > { %v782_v42 = vpop.permute.xlu0 %781 }
  0xa2   : > { %v784_v43 = vpop.permute.xlu1 %783  ;;  %896 = vst.msk [vmem:[#allocation3 + $0x30] sm:$0xff] %vm889_vm5, %v782_v42 }
  0xa3   : > { %897 = vst.msk [vmem:[#allocation3 + $0x38] sm:$0xff] %vm889_vm5, %v784_v43  ;;  %1074 = vrot.lane.b32.xlu0 %v962_v37, %s5866_s12 }
  0xa4   : > { %1076 = vrot.lane.b32.xlu1 %v963_v44, %s5866_s12 }
  0xa5   : > { %v1023_v46 = vpop.permute.xlu0 %1022  ;;  %v6274_v48 = vld [vmem:[#allocation3 + $0x20] sm:$0xff] }
  0xa6   : > { %v1025_v47 = vpop.permute.xlu1 %1024  ;;  %v6276_v49 = vld [vmem:[#allocation3 + $0x28] sm:$0xff]  ;;  %1137 = vst.msk [vmem:[#allocation3 + $0x30] sm:$0xff] %vm1130_vm6, %v1023_v46  ;;  %5453 = vmatprep.mubr.msk.f32.mxu0 %vm1216_vm7, %v6274_v48 }
  0xa7   : > { %1138 = vst.msk [vmem:[#allocation3 + $0x38] sm:$0xff] %vm1130_vm6, %v1025_v47  ;;  %5454 = vmatmul.mubr.msk.f32.gmra.mrb[4].mxu0 %vm1216_vm7, %v6276_v49  ;;  %841 = vrot.lane.b32.xlu0 %v725_v45, %s5865_s11 }
  0xa8   : > { %843 = vrot.lane.b32.xlu1 %v726_v50, %s5865_s11 }
  0xa9   : > { %v786_v52 = vpop.permute.xlu0 %785 }
  0xaa   : > { %v788_v53 = vpop.permute.xlu1 %787  ;;  %898 = vst.msk [vmem:[#allocation3 + $0x40] sm:$0xff] %vm889_vm5, %v786_v52 }
  0xab   : > { %899 = vst.msk [vmem:[#allocation3 + $0x48] sm:$0xff] %vm889_vm5, %v788_v53  ;;  %1082 = vrot.lane.b32.xlu0 %v966_v51, %s5866_s12 }
  0xac   : > { %1084 = vrot.lane.b32.xlu1 %v967_v54, %s5866_s12 }
  0xad   : > { %v1027_v56 = vpop.permute.xlu0 %1026  ;;  %v6290_v58 = vld [vmem:[#allocation3 + $0x30] sm:$0xff] }
  0xae   : > { %v1029_v57 = vpop.permute.xlu1 %1028  ;;  %v6292_v59 = vld [vmem:[#allocation3 + $0x38] sm:$0xff]  ;;  %1139 = vst.msk [vmem:[#allocation3 + $0x40] sm:$0xff] %vm1130_vm6, %v1027_v56  ;;  %5456 = vmatprep.mubr.msk.f32.mxu0 %vm1216_vm7, %v6290_v58 }
  0xaf   : > { %1140 = vst.msk [vmem:[#allocation3 + $0x48] sm:$0xff] %vm1130_vm6, %v1029_v57  ;;  %5457 = vmatmul.mubr.msk.f32.gmra.mrb[6].mxu0 %vm1216_vm7, %v6292_v59  ;;  %845 = vrot.lane.b32.xlu0 %v727_v55, %s5865_s11 }
  0xb0   : > { %847 = vrot.lane.b32.xlu1 %v728_v60, %s5865_s11 }
  0xb1   : > { %v790_v62 = vpop.permute.xlu0 %789 }
  0xb2   : > { %v792_v63 = vpop.permute.xlu1 %791  ;;  %900 = vst.msk [vmem:[#allocation3 + $0x50] sm:$0xff] %vm889_vm5, %v790_v62 }
  0xb3   : > { %901 = vst.msk [vmem:[#allocation3 + $0x58] sm:$0xff] %vm889_vm5, %v792_v63  ;;  %1086 = vrot.lane.b32.xlu0 %v968_v61, %s5866_s12 }
  0xb4   : > { %1088 = vrot.lane.b32.xlu1 %v969_v1, %s5866_s12 }
  0xb5   : > { %v1031_v2 = vpop.permute.xlu0 %1030  ;;  %v6306_v5 = vld [vmem:[#allocation3 + $0x40] sm:$0xff] }
  0xb6   : > { %v1033_v3 = vpop.permute.xlu1 %1032  ;;  %v6308_v6 = vld [vmem:[#allocation3 + $0x48] sm:$0xff]  ;;  %1141 = vst.msk [vmem:[#allocation3 + $0x50] sm:$0xff] %vm1130_vm6, %v1031_v2  ;;  %5459 = vmatprep.mubr.msk.f32.mxu0 %vm1216_vm7, %v6306_v5 }
  0xb7   : > { %1142 = vst.msk [vmem:[#allocation3 + $0x58] sm:$0xff] %vm1130_vm6, %v1033_v3  ;;  %5460 = vmatmul.mubr.msk.f32.gmra.mrb[8].mxu0 %vm1216_vm7, %v6308_v6 }
  0xb9   : > { %v794_v7 = vpop.permute.xlu0 %793 }
  0xba   : > { %v796_v8 = vpop.permute.xlu1 %795  ;;  %902 = vst.msk [vmem:[#allocation3 + $0x60] sm:$0xff] %vm889_vm5, %v794_v7 }
  0xbb   : > { %903 = vst.msk [vmem:[#allocation3 + $0x68] sm:$0xff] %vm889_vm5, %v796_v8 }
  0xbd   : > { %v1035_v9 = vpop.permute.xlu0 %1034  ;;  %v6318_v12 = vld [vmem:[#allocation3 + $0x50] sm:$0xff] }
  0xbe   : > { %v1037_v10 = vpop.permute.xlu1 %1036  ;;  %v6320_v13 = vld [vmem:[#allocation3 + $0x58] sm:$0xff]  ;;  %1143 = vst.msk [vmem:[#allocation3 + $0x60] sm:$0xff] %vm1130_vm6, %v1035_v9  ;;  %5462 = vmatprep.mubr.msk.f32.mxu0 %vm1216_vm7, %v6318_v12 }
  0xbf   : > { %1144 = vst.msk [vmem:[#allocation3 + $0x68] sm:$0xff] %vm1130_vm6, %v1037_v10  ;;  %5463 = vmatmul.mubr.msk.f32.gmra.mrb[10].mxu0 %vm1216_vm7, %v6320_v13 }
  0xc1   : > { %v798_v14 = vpop.permute.xlu0 %797 }
  0xc2   : > { %v800_v15 = vpop.permute.xlu1 %799  ;;  %904 = vst.msk [vmem:[#allocation3 + $0x70] sm:$0xff] %vm889_vm5, %v798_v14 }
  0xc3   : > { %905 = vst.msk [vmem:[#allocation3 + $0x78] sm:$0xff] %vm889_vm5, %v800_v15 }
  0xc5   : > { %v1039_v18 = vpop.permute.xlu0 %1038  ;;  %v6331_v20 = vld [vmem:[#allocation3 + $0x60] sm:$0xff] }
  0xc6   : > { %v1041_v19 = vpop.permute.xlu1 %1040  ;;  %v6333_v21 = vld [vmem:[#allocation3 + $0x68] sm:$0xff]  ;;  %1145 = vst.msk [vmem:[#allocation3 + $0x70] sm:$0xff] %vm1130_vm6, %v1039_v18  ;;  %5465 = vmatprep.mubr.msk.f32.mxu0 %vm1216_vm7, %v6331_v20 }
  0xc7   : > { %1146 = vst.msk [vmem:[#allocation3 + $0x78] sm:$0xff] %vm1130_vm6, %v1041_v19  ;;  %5466 = vmatmul.mubr.msk.f32.gmra.mrb[12].mxu0 %vm1216_vm7, %v6333_v21 }
  0xc9   : > { %v802_v22 = vpop.permute.xlu0 %801 }
  0xca   : > { %v804_v23 = vpop.permute.xlu1 %803  ;;  %906 = vst.msk [vmem:[#allocation3 + $0x80] sm:$0xff] %vm889_vm5, %v802_v22 }
  0xcb   : > { %907 = vst.msk [vmem:[#allocation3 + $0x88] sm:$0xff] %vm889_vm5, %v804_v23 }
  0xcd   : > { %v1043_v24 = vpop.permute.xlu0 %1042  ;;  %v6344_v26 = vld [vmem:[#allocation3 + $0x70] sm:$0xff] }
  0xce   : > { %v1045_v25 = vpop.permute.xlu1 %1044  ;;  %v6346_v27 = vld [vmem:[#allocation3 + $0x78] sm:$0xff]  ;;  %1147 = vst.msk [vmem:[#allocation3 + $0x80] sm:$0xff] %vm1130_vm6, %v1043_v24  ;;  %5468 = vmatprep.mubr.msk.f32.mxu0 %vm1216_vm7, %v6344_v26 }
  0xcf   : > { %1148 = vst.msk [vmem:[#allocation3 + $0x88] sm:$0xff] %vm1130_vm6, %v1045_v25  ;;  %5469 = vmatmul.mubr.msk.f32.gmra.mrb[14].mxu0 %vm1216_vm7, %v6346_v27 }
  0xd1   : > { %v806_v28 = vpop.permute.xlu0 %805 }
  0xd2   : > { %v808_v29 = vpop.permute.xlu1 %807  ;;  %908 = vst.msk [vmem:[#allocation3 + $0x90] sm:$0xff] %vm889_vm5, %v806_v28 }
  0xd3   : > { %909 = vst.msk [vmem:[#allocation3 + $0x98] sm:$0xff] %vm889_vm5, %v808_v29 }
  0xd5   : > { %v1047_v30 = vpop.permute.xlu0 %1046  ;;  %v6356_v32 = vld [vmem:[#allocation3 + $0x80] sm:$0xff] }
  0xd6   : > { %v1049_v31 = vpop.permute.xlu1 %1048  ;;  %v6358_v33 = vld [vmem:[#allocation3 + $0x88] sm:$0xff]  ;;  %1149 = vst.msk [vmem:[#allocation3 + $0x90] sm:$0xff] %vm1130_vm6, %v1047_v30  ;;  %5471 = vmatprep.mubr.msk.f32.mxu0 %vm1216_vm7, %v6356_v32 }
  0xd7   : > { %1150 = vst.msk [vmem:[#allocation3 + $0x98] sm:$0xff] %vm1130_vm6, %v1049_v31  ;;  %5472 = vmatmul.mubr.msk.f32.gmra.mrb[16].mxu0 %vm1216_vm7, %v6358_v33 }
  0xd9   : > { %v810_v36 = vpop.permute.xlu0 %809 }
  0xda   : > { %v812_v39 = vpop.permute.xlu1 %811  ;;  %910 = vst.msk [vmem:[#allocation3 + $0xa0] sm:$0xff] %vm889_vm5, %v810_v36 }
  0xdb   : > { %911 = vst.msk [vmem:[#allocation3 + $0xa8] sm:$0xff] %vm889_vm5, %v812_v39 }
  0xdd   : > { %v1051_v41 = vpop.permute.xlu0 %1050  ;;  %v6370_v42 = vld [vmem:[#allocation3 + $0x90] sm:$0xff] }
  0xde   : > { %v1053_v37 = vpop.permute.xlu1 %1052  ;;  %v6372_v43 = vld [vmem:[#allocation3 + $0x98] sm:$0xff]  ;;  %1151 = vst.msk [vmem:[#allocation3 + $0xa0] sm:$0xff] %vm1130_vm6, %v1051_v41  ;;  %5474 = vmatprep.mubr.msk.f32.mxu0 %vm1216_vm7, %v6370_v42 }
  0xdf   : > { %1152 = vst.msk [vmem:[#allocation3 + $0xa8] sm:$0xff] %vm1130_vm6, %v1053_v37  ;;  %5475 = vmatmul.mubr.msk.f32.gmra.mrb[18].mxu0 %vm1216_vm7, %v6372_v43 }
  0xe1   : > { %v814_v44 = vpop.permute.xlu0 %813 }
  0xe2   : > { %v816_v45 = vpop.permute.xlu1 %815  ;;  %912 = vst.msk [vmem:[#allocation3 + $0xb0] sm:$0xff] %vm889_vm5, %v814_v44 }
  0xe3   : > { %913 = vst.msk [vmem:[#allocation3 + $0xb8] sm:$0xff] %vm889_vm5, %v816_v45 }
  0xe5   : > { %v1055_v46 = vpop.permute.xlu0 %1054  ;;  %v6382_v50 = vld [vmem:[#allocation3 + $0xa0] sm:$0xff] }
  0xe6   : > { %v1057_v47 = vpop.permute.xlu1 %1056  ;;  %v6384_v51 = vld [vmem:[#allocation3 + $0xa8] sm:$0xff]  ;;  %1153 = vst.msk [vmem:[#allocation3 + $0xb0] sm:$0xff] %vm1130_vm6, %v1055_v46  ;;  %5477 = vmatprep.mubr.msk.f32.mxu0 %vm1216_vm7, %v6382_v50 }
  0xe7   : > { %1154 = vst.msk [vmem:[#allocation3 + $0xb8] sm:$0xff] %vm1130_vm6, %v1057_v47  ;;  %5478 = vmatmul.mubr.msk.f32.gmra.mrb[20].mxu0 %vm1216_vm7, %v6384_v51 }
  0xe9   : > { %v818_v52 = vpop.permute.xlu0 %817 }
  0xea   : > { %v820_v53 = vpop.permute.xlu1 %819  ;;  %914 = vst.msk [vmem:[#allocation3 + $0xc0] sm:$0xff] %vm889_vm5, %v818_v52 }
  0xeb   : > { %915 = vst.msk [vmem:[#allocation3 + $0xc8] sm:$0xff] %vm889_vm5, %v820_v53 }
  0xed   : > { %v1059_v54 = vpop.permute.xlu0 %1058  ;;  %v6394_v56 = vld [vmem:[#allocation3 + $0xb0] sm:$0xff] }
  0xee   : > { %v1061_v55 = vpop.permute.xlu1 %1060  ;;  %v6396_v57 = vld [vmem:[#allocation3 + $0xb8] sm:$0xff]  ;;  %1155 = vst.msk [vmem:[#allocation3 + $0xc0] sm:$0xff] %vm1130_vm6, %v1059_v54  ;;  %5480 = vmatprep.mubr.msk.f32.mxu0 %vm1216_vm7, %v6394_v56 }
  0xef   : > { %1156 = vst.msk [vmem:[#allocation3 + $0xc8] sm:$0xff] %vm1130_vm6, %v1061_v55  ;;  %5481 = vmatmul.mubr.msk.f32.gmra.mrb[22].mxu0 %vm1216_vm7, %v6396_v57 }
  0xf1   : > { %v822_v60 = vpop.permute.xlu0 %821 }
  0xf2   : > { %v824_v61 = vpop.permute.xlu1 %823  ;;  %916 = vst.msk [vmem:[#allocation3 + $0xd0] sm:$0xff] %vm889_vm5, %v822_v60 }
  0xf3   : > { %917 = vst.msk [vmem:[#allocation3 + $0xd8] sm:$0xff] %vm889_vm5, %v824_v61 }
  0xf5   : > { %v1063_v62 = vpop.permute.xlu0 %1062  ;;  %v6406_v1 = vld [vmem:[#allocation3 + $0xc0] sm:$0xff] }
  0xf6   : > { %v838_v63 = vpop.permute.xlu1 %837  ;;  %v6408_v2 = vld [vmem:[#allocation3 + $0xc8] sm:$0xff]  ;;  %1157 = vst.msk [vmem:[#allocation3 + $0xd0] sm:$0xff] %vm1130_vm6, %v1063_v62  ;;  %5483 = vmatprep.mubr.msk.f32.mxu0 %vm1216_vm7, %v6406_v1 }
  0xf7   : > { %924 = vst.msk [vmem:[#allocation3 + $0x110] sm:$0xff] %vm889_vm5, %v838_v63  ;;  %5484 = vmatmul.mubr.msk.f32.gmra.mrb[24].mxu0 %vm1216_vm7, %v6408_v2 }
  0xf9   : > { %v1065_v3 = vpop.permute.xlu0 %1064 }
  0xfa   : > { %v840_v7 = vpop.permute.xlu1 %839  ;;  %1158 = vst.msk [vmem:[#allocation3 + $0xd8] sm:$0xff] %vm1130_vm6, %v1065_v3 }
  0xfb   : > { %925 = vst.msk [vmem:[#allocation3 + $0x118] sm:$0xff] %vm889_vm5, %v840_v7 }
  0xfd   : > { %v1079_v8 = vpop.permute.xlu0 %1078  ;;  %v6418_v10 = vld [vmem:[#allocation3 + $0xd0] sm:$0xff] }
  0xfe   : > { %v826_v9 = vpop.permute.xlu1 %825  ;;  %1165 = vst.msk [vmem:[#allocation3 + $0x110] sm:$0xff] %vm1130_vm6, %v1079_v8  ;;  %5486 = vmatprep.mubr.msk.f32.mxu0 %vm1216_vm7, %v6418_v10 }
  0xff   : > { %918 = vst.msk [vmem:[#allocation3 + $0xe0] sm:$0xff] %vm889_vm5, %v826_v9 }
 0x101   : > { %v1081_v14 = vpop.permute.xlu0 %1080  ;;  %v6424_v16 = vld [vmem:[#allocation3 + $0xd8] sm:$0xff] }
 0x102   : > { %v828_v15 = vpop.permute.xlu1 %827  ;;  %1166 = vst.msk [vmem:[#allocation3 + $0x118] sm:$0xff] %vm1130_vm6, %v1081_v14  ;;  %5487 = vmatmul.mubr.msk.f32.gmra.mrb[26].mxu0 %vm1216_vm7, %v6424_v16 }
 0x103   : > { %919 = vst.msk [vmem:[#allocation3 + $0xe8] sm:$0xff] %vm889_vm5, %v828_v15 }
 0x105   : > { %v1067_v17 = vpop.permute.xlu0 %1066  ;;  %v6430_v18 = vld [vmem:[#allocation3 + $0x110] sm:$0xff] }
 0x106   : > { %1159 = vst.msk [vmem:[#allocation3 + $0xe0] sm:$0xff] %vm1130_vm6, %v1067_v17  ;;  %v1069_v19 = vpop.permute.xlu1 %1068  ;;  %5498 = vmatprep.mubr.msk.f32.mxu1 %vm1216_vm7, %v6430_v18 }
 0x107   : > { %1160 = vst.msk [vmem:[#allocation3 + $0xe8] sm:$0xff] %vm1130_vm6, %v1069_v19 }
 0x109   : > { %v830_v22 = vpop.permute.xlu0 %829  ;;  %v6436_v23 = vld [vmem:[#allocation3 + $0x118] sm:$0xff] }
 0x10a   : > { %920 = vst.msk [vmem:[#allocation3 + $0xf0] sm:$0xff] %vm889_vm5, %v830_v22  ;;  %v832_v24 = vpop.permute.xlu1 %831  ;;  %5499 = vmatmul.mubr.msk.f32.vlgmr.msra.gmra.mrb[0].mxu1 %vm1216_vm7, %v6436_v23 }
 0x10b   : > { %921 = vst.msk [vmem:[#allocation3 + $0xf8] sm:$0xff] %vm889_vm5, %v832_v24  ;;  %5784 = vmatpush3.bf16.msk.msra.mxu1 %vm6033_vm4, %v6225_v11  ;;  %5505 = vmatprep.mubr.msk.f32.mxu1 %vm1216_vm7, %v6258_v38 }
 0x10d   : > { %v1071_v25 = vpop.permute.xlu0 %1070  ;;  %v6447_v28 = vld [vmem:[#allocation3 + $0xe0] sm:$0xff] }
 0x10e   : > { %1161 = vst.msk [vmem:[#allocation3 + $0xf0] sm:$0xff] %vm1130_vm6, %v1071_v25  ;;  %v1073_v29 = vpop.permute.xlu1 %1072  ;;  %5489 = vmatprep.mubr.msk.f32.mxu0 %vm1216_vm7, %v6447_v28  ;;  %5506 = vmatmul.mubr.msk.f32.vlgmr.msra.gmra.mrb[2].mxu1 %vm1216_vm7, %v6260_v40  ;;  %v6454_v30 = vld [vmem:[#allocation3 + $0xe8] sm:$0xff] }
 0x10f   : > { %1162 = vst.msk [vmem:[#allocation3 + $0xf8] sm:$0xff] %vm1130_vm6, %v1073_v29  ;;  %5490 = vmatmul.mubr.msk.f32.gmra.mrb[28].mxu0 %vm1216_vm7, %v6454_v30  ;;  %5508 = vmatprep.mubr.msk.f32.mxu1 %vm1216_vm7, %v6274_v48 }
 0x111   : > { %v834_v11 = vpop.permute.xlu0 %833 }
 0x112   : > { %922 = vst.msk [vmem:[#allocation3 + $0x100] sm:$0xff] %vm889_vm5, %v834_v11  ;;  %v836_v38 = vpop.permute.xlu1 %835  ;;  %5509 = vmatmul.mubr.msk.f32.gmra.mrb[4].mxu1 %vm1216_vm7, %v6276_v49 }
 0x113   : > { %923 = vst.msk [vmem:[#allocation3 + $0x108] sm:$0xff] %vm889_vm5, %v836_v38  ;;  %5511 = vmatprep.mubr.msk.f32.mxu1 %vm1216_vm7, %v6290_v58 }
 0x115   : > { %v1075_v40 = vpop.permute.xlu0 %1074  ;;  %v6467_v31 = vld [vmem:[#allocation3 + $0xf0] sm:$0xff] }
 0x116   : > { %1163 = vst.msk [vmem:[#allocation3 + $0x100] sm:$0xff] %vm1130_vm6, %v1075_v40  ;;  %v1077_v34 = vpop.permute.xlu1 %1076  ;;  %5492 = vmatprep.mubr.msk.f32.mxu0 %vm1216_vm7, %v6467_v31  ;;  %5512 = vmatmul.mubr.msk.f32.gmra.mrb[6].mxu1 %vm1216_vm7, %v6292_v59  ;;  %v6474_v35 = vld [vmem:[#allocation3 + $0xf8] sm:$0xff] }
 0x117   : > { %1164 = vst.msk [vmem:[#allocation3 + $0x108] sm:$0xff] %vm1130_vm6, %v1077_v34  ;;  %5493 = vmatmul.mubr.msk.f32.gmra.mrb[30].mxu0 %vm1216_vm7, %v6474_v35  ;;  %5514 = vmatprep.mubr.msk.f32.mxu1 %vm1216_vm7, %v6306_v5 }
 0x119   : > { %v842_v36 = vpop.permute.xlu0 %841 }
 0x11a   : > { %5515 = vmatmul.mubr.msk.f32.gmra.mrb[8].mxu1 %vm1216_vm7, %v6308_v6  ;;  %926 = vst.msk [vmem:[#allocation3 + $0x120] sm:$0xff] %vm889_vm5, %v842_v36  ;;  %v844_v39 = vpop.permute.xlu1 %843 }
 0x11b   : > { %5517 = vmatprep.mubr.msk.f32.mxu1 %vm1216_vm7, %v6318_v12  ;;  %927 = vst.msk [vmem:[#allocation3 + $0x128] sm:$0xff] %vm889_vm5, %v844_v39 }
 0x11d   : > { %v6487_v41 = vld [vmem:[#allocation3 + $0x100] sm:$0xff]  ;;  %v1083_v37 = vpop.permute.xlu0 %1082 }
 0x11e   : > { %5495 = vmatprep.mubr.msk.f32.mxu0 %vm1216_vm7, %v6487_v41  ;;  %5518 = vmatmul.mubr.msk.f32.gmra.mrb[10].mxu1 %vm1216_vm7, %v6320_v13  ;;  %v6493_v44 = vld [vmem:[#allocation3 + $0x108] sm:$0xff]  ;;  %1167 = vst.msk [vmem:[#allocation3 + $0x120] sm:$0xff] %vm1130_vm6, %v1083_v37  ;;  %v1085_v45 = vpop.permute.xlu1 %1084 }
 0x11f   : > { %5496 = vmatmul.mubr.msk.f32.gmra.mrb[32].mxu0 %vm1216_vm7, %v6493_v44  ;;  %5520 = vmatprep.mubr.msk.f32.mxu1 %vm1216_vm7, %v6331_v20  ;;  %1168 = vst.msk [vmem:[#allocation3 + $0x128] sm:$0xff] %vm1130_vm6, %v1085_v45 }
 0x120   : > { %5563 = vmatprep.mubr.msk.f32.mxu0 %vm1216_vm7, %v6274_v48 }
 0x121   : > { %v846_v46 = vpop.permute.xlu0 %845 }
 0x122   : > { %5521 = vmatmul.mubr.msk.f32.gmra.mrb[12].mxu1 %vm1216_vm7, %v6333_v21  ;;  %928 = vst.msk [vmem:[#allocation3 + $0x130] sm:$0xff] %vm889_vm5, %v846_v46  ;;  %v848_v47 = vpop.permute.xlu1 %847 }
 0x123   : > { %5523 = vmatprep.mubr.msk.f32.mxu1 %vm1216_vm7, %v6344_v26  ;;  %5564 = vmatmul.mubr.msk.f32.vlgmr.msra.gmra.mrb[34].mxu0 %vm1216_vm7, %v6276_v49  ;;  %929 = vst.msk [vmem:[#allocation3 + $0x138] sm:$0xff] %vm889_vm5, %v848_v47 }
 0x124   : > { %5566 = vmatprep.mubr.msk.f32.mxu0 %vm1216_vm7, %v6290_v58 }
 0x125   : > { %v1087_v52 = vpop.permute.xlu0 %1086  ;;  %v1645_v49 = vld [vmem:[#allocation3 + $0x120] sm:$0xff] }
 0x126   : > { %5524 = vmatmul.mubr.msk.f32.gmra.mrb[14].mxu1 %vm1216_vm7, %v6346_v27  ;;  %1169 = vst.msk [vmem:[#allocation3 + $0x130] sm:$0xff] %vm1130_vm6, %v1087_v52  ;;  %v1089_v48 = vpop.permute.xlu1 %1088  ;;  %v1646_v58 = vld [vmem:[#allocation3 + $0x128] sm:$0xff] }
 0x127   : > { %5526 = vmatprep.mubr.msk.f32.mxu1 %vm1216_vm7, %v6356_v32  ;;  %5567 = vmatmul.mubr.msk.f32.gmra.mrb[36].mxu0 %vm1216_vm7, %v6292_v59  ;;  %1170 = vst.msk [vmem:[#allocation3 + $0x138] sm:$0xff] %vm1130_vm6, %v1089_v48 }
 0x128   : > { %5569 = vmatprep.mubr.msk.f32.mxu0 %vm1216_vm7, %v6306_v5 }
 0x12a   : > { %5527 = vmatmul.mubr.msk.f32.gmra.mrb[16].mxu1 %vm1216_vm7, %v6358_v33 }
 0x12b   : > { %5529 = vmatprep.mubr.msk.f32.mxu1 %vm1216_vm7, %v6370_v42  ;;  %5570 = vmatmul.mubr.msk.f32.gmra.mrb[38].mxu0 %vm1216_vm7, %v6308_v6  ;;  %v6624_v6 = vld [vmem:[%s7747_s4] ss:$0 sm:$0xff] }
 0x12c   : > { %5572 = vmatprep.mubr.msk.f32.mxu0 %vm1216_vm7, %v6318_v12 }
 0x12d   : > { %v2149_v59 = vld [vmem:[#allocation3 + $0x130] sm:$0xff] }
 0x12e   : > { %5530 = vmatmul.mubr.msk.f32.gmra.mrb[18].mxu1 %vm1216_vm7, %v6372_v43  ;;  %v2150_v5 = vld [vmem:[#allocation3 + $0x138] sm:$0xff] }
 0x12f   : > { %5532 = vmatprep.mubr.msk.f32.mxu1 %vm1216_vm7, %v6382_v50  ;;  %5573 = vmatmul.mubr.msk.f32.gmra.mrb[40].mxu0 %vm1216_vm7, %v6320_v13 }
 0x130   : > { %5575 = vmatprep.mubr.msk.f32.mxu0 %vm1216_vm7, %v6331_v20 }
 0x132   : > { %5533 = vmatmul.mubr.msk.f32.gmra.mrb[20].mxu1 %vm1216_vm7, %v6384_v51 }
 0x133   : > { %5535 = vmatprep.mubr.msk.f32.mxu1 %vm1216_vm7, %v6394_v56  ;;  %5576 = vmatmul.mubr.msk.f32.gmra.mrb[42].mxu0 %vm1216_vm7, %v6333_v21 }
 0x134   : > { %5578 = vmatprep.mubr.msk.f32.mxu0 %vm1216_vm7, %v6344_v26 }
 0x136   : > { %5536 = vmatmul.mubr.msk.f32.gmra.mrb[22].mxu1 %vm1216_vm7, %v6396_v57 }
 0x137   : > { %5538 = vmatprep.mubr.msk.f32.mxu1 %vm1216_vm7, %v6406_v1  ;;  %5579 = vmatmul.mubr.msk.f32.gmra.mrb[44].mxu0 %vm1216_vm7, %v6346_v27 }
 0x138   : > { %5581 = vmatprep.mubr.msk.f32.mxu0 %vm1216_vm7, %v6356_v32 }
 0x13a   : > { %5539 = vmatmul.mubr.msk.f32.gmra.mrb[24].mxu1 %vm1216_vm7, %v6408_v2 }
 0x13b   : > { %5541 = vmatprep.mubr.msk.f32.mxu1 %vm1216_vm7, %v6418_v10  ;;  %5582 = vmatmul.mubr.msk.f32.gmra.mrb[46].mxu0 %vm1216_vm7, %v6358_v33 }
 0x13c   : > { %5584 = vmatprep.mubr.msk.f32.mxu0 %vm1216_vm7, %v6370_v42 }
 0x13e   : > { %5542 = vmatmul.mubr.msk.f32.gmra.mrb[26].mxu1 %vm1216_vm7, %v6424_v16 }
 0x13f   : > { %5544 = vmatprep.mubr.msk.f32.mxu1 %vm1216_vm7, %v6447_v28  ;;  %5585 = vmatmul.mubr.msk.f32.gmra.mrb[48].mxu0 %vm1216_vm7, %v6372_v43 }
 0x140   : > { %5587 = vmatprep.mubr.msk.f32.mxu0 %vm1216_vm7, %v6382_v50 }
 0x142   : > { %5545 = vmatmul.mubr.msk.f32.gmra.mrb[28].mxu1 %vm1216_vm7, %v6454_v30 }
 0x143   : > { %5547 = vmatprep.mubr.msk.f32.mxu1 %vm1216_vm7, %v6467_v31  ;;  %5588 = vmatmul.mubr.msk.f32.gmra.mrb[50].mxu0 %vm1216_vm7, %v6384_v51 }
 0x144   : > { %5590 = vmatprep.mubr.msk.f32.mxu0 %vm1216_vm7, %v6394_v56 }
 0x146   : > { %5548 = vmatmul.mubr.msk.f32.gmra.mrb[30].mxu1 %vm1216_vm7, %v6474_v35 }
 0x147   : > { %5550 = vmatprep.mubr.msk.f32.mxu1 %vm1216_vm7, %v6487_v41  ;;  %5591 = vmatmul.mubr.msk.f32.gmra.mrb[52].mxu0 %vm1216_vm7, %v6396_v57 }
 0x148   : > { %5593 = vmatprep.mubr.msk.f32.mxu0 %vm1216_vm7, %v6406_v1 }
 0x14a   : > { %5551 = vmatmul.mubr.msk.f32.gmra.mrb[32].mxu1 %vm1216_vm7, %v6493_v44 }
 0x14b   : > { %5553 = vmatprep.mubr.msk.f32.mxu1 %vm1216_vm7, %v6430_v18  ;;  %5594 = vmatmul.mubr.msk.f32.gmra.mrb[54].mxu0 %vm1216_vm7, %v6408_v2 }
 0x14c   : > { %5596 = vmatprep.mubr.msk.f32.mxu0 %vm1216_vm7, %v6418_v10 }
 0x14e   : > { %5554 = vmatmul.mubr.msk.f32.gmra.mrb[34].mxu1 %vm1216_vm7, %v6436_v23 }
 0x14f   : > { %5597 = vmatmul.mubr.msk.f32.gmra.mrb[56].mxu0 %vm1216_vm7, %v6424_v16  ;;  %5556 = vmatprep.mubr.msk.f32.mxu1 %vm1216_vm7, %v1645_v49 }
 0x150   : > { %5599 = vmatprep.mubr.msk.f32.mxu0 %vm1216_vm7, %v6447_v28 }
 0x152   : > { %5557 = vmatmul.mubr.msk.f32.gmra.mrb[36].mxu1 %vm1216_vm7, %v1646_v58 }
 0x153   : > { %5600 = vmatmul.mubr.msk.f32.gmra.mrb[58].mxu0 %vm1216_vm7, %v6454_v30 }
 0x154   : > { %5602 = vmatprep.mubr.msk.f32.mxu0 %vm1216_vm7, %v6467_v31 }
 0x157   : > { %5603 = vmatmul.mubr.msk.f32.gmra.mrb[60].mxu0 %vm1216_vm7, %v6474_v35 }
 0x158   : > { %5605 = vmatprep.mubr.msk.f32.mxu0 %vm1216_vm7, %v6487_v41 }
 0x15b   : > { %5606 = vmatmul.mubr.msk.f32.gmra.mrb[62].mxu0 %vm1216_vm7, %v6493_v44 }
 0x15c   : > { %5608 = vmatprep.mubr.msk.f32.mxu0 %vm1216_vm7, %v6430_v18 }
 0x15f   : > { %5609 = vmatmul.mubr.msk.f32.gmra.mrb[64].mxu0 %vm1216_vm7, %v6436_v23 }
 0x160   : > { %5611 = vmatprep.mubr.msk.f32.mxu0 %vm1216_vm7, %v1645_v49 }
 0x162   : > { %v5449_v12 = vpop.f32.mrb[0].mxu0 }
 0x163   : > { %5612 = vmatmul.mubr.msk.f32.gmra.mrb[66].mxu0 %vm1216_vm7, %v1646_v58  ;;  %v1401_v13 = vadd.f32 %v5449_v12, %v6624_v6  ;;  %v1395_v20 = vpop.f32.mrb[1].mxu0 }
 0x164   : > { %5614 = vmatprep.mubr.msk.f32.mxu0 %vm1216_vm7, %v2149_v59  ;;  %v1396_v21 = vadd.f32 %v6624_v6, %v1395_v20 }
 0x165   : > { %1575 = vst.msk [vmem:[#allocation4 + $0x8] sm:$0xff] %vm531_vm0, %v1401_v13 }
 0x166   : > { %1574 = vst.msk [vmem:[#allocation4] sm:$0xff] %vm531_vm0, %v1396_v21 }
 0x167   : > { %5615 = vmatmul.mubr.msk.f32.gmra.mrb[68].mxu0 %vm1216_vm7, %v2150_v5 }
 0x16c   : > { %v5452_v26 = vpop.f32.mrb[2].mxu0  ;;  %v1648_v5 = vld [vmem:[#allocation4 + $0x8] sm:$0xff] }
 0x16d   : > { %v1411_v27 = vadd.f32 %v5452_v26, %v6624_v6  ;;  %v1405_v32 = vpop.f32.mrb[3].mxu0  ;;  %v1647_v21 = vld [vmem:[#allocation4] sm:$0xff] }
 0x16e   : > { %v1406_v33 = vadd.f32 %v6624_v6, %v1405_v32 }
 0x16f   : > { %1577 = vst.msk [vmem:[#allocation4 + $0x18] sm:$0xff] %vm531_vm0, %v1411_v27 }
 0x170   : > { %1576 = vst.msk [vmem:[#allocation4 + $0x10] sm:$0xff] %vm531_vm0, %v1406_v33 }
 0x17a   : > { %v5455_v42 = vpop.f32.mrb[4].mxu0 }
 0x17b   : > { %v1421_v43 = vadd.f32 %v5455_v42, %v6624_v6  ;;  %v1415_v50 = vpop.f32.mrb[5].mxu0 }
 0x17c   : > { %v1416_v51 = vadd.f32 %v6624_v6, %v1415_v50 }
 0x17d   : > { %1579 = vst.msk [vmem:[#allocation4 + $0x28] sm:$0xff] %vm531_vm0, %v1421_v43  ;;  %v1650_v43 = vld [vmem:[#allocation4 + $0x18] sm:$0xff] }
 0x17e   : > { %1578 = vst.msk [vmem:[#allocation4 + $0x20] sm:$0xff] %vm531_vm0, %v1416_v51 }
 0x182   : > { %v5458_v53 = vpop.f32.mrb[6].mxu0 }
 0x183   : > { %v1431_v54 = vadd.f32 %v5458_v53, %v6624_v6  ;;  %v1425_v55 = vpop.f32.mrb[7].mxu0  ;;  %v1649_v53 = vld [vmem:[#allocation4 + $0x10] sm:$0xff] }
 0x184   : > { %v1426_v56 = vadd.f32 %v6624_v6, %v1425_v55 }
 0x185   : > { %1581 = vst.msk [vmem:[#allocation4 + $0x38] sm:$0xff] %vm531_vm0, %v1431_v54 }
 0x186   : > { %1580 = vst.msk [vmem:[#allocation4 + $0x30] sm:$0xff] %vm531_vm0, %v1426_v56  ;;  %v1652_v56 = vld [vmem:[#allocation4 + $0x28] sm:$0xff] }
 0x18a   : > { %v5461_v57 = vpop.f32.mrb[8].mxu0 }
 0x18b   : > { %v1441_v60 = vadd.f32 %v5461_v57, %v6624_v6  ;;  %v1435_v61 = vpop.f32.mrb[9].mxu0 }
 0x18c   : > { %v1436_v62 = vadd.f32 %v6624_v6, %v1435_v61 }
 0x18d   : > { %1583 = vst.msk [vmem:[#allocation4 + $0x48] sm:$0xff] %vm531_vm0, %v1441_v60 }
 0x18e   : > { %1582 = vst.msk [vmem:[#allocation4 + $0x40] sm:$0xff] %vm531_vm0, %v1436_v62  ;;  %v1651_v62 = vld [vmem:[#allocation4 + $0x20] sm:$0xff] }
 0x192   : > { %v5464_v63 = vpop.f32.mrb[10].mxu0 }
 0x193   : > { %v1451_v1 = vadd.f32 %v5464_v63, %v6624_v6  ;;  %v1445_v2 = vpop.f32.mrb[11].mxu0 }
 0x194   : > { %v1446_v3 = vadd.f32 %v6624_v6, %v1445_v2 }
 0x195   : > { %1585 = vst.msk [vmem:[#allocation4 + $0x58] sm:$0xff] %vm531_vm0, %v1451_v1 }
 0x196   : > { %1584 = vst.msk [vmem:[#allocation4 + $0x50] sm:$0xff] %vm531_vm0, %v1446_v3 }
 0x19a   : > { %v5467_v7 = vpop.f32.mrb[12].mxu0 }
 0x19b   : > { %v1461_v8 = vadd.f32 %v5467_v7, %v6624_v6  ;;  %v1455_v9 = vpop.f32.mrb[13].mxu0 }
 0x19c   : > { %v1456_v10 = vadd.f32 %v6624_v6, %v1455_v9 }
 0x19d   : > { %1587 = vst.msk [vmem:[#allocation4 + $0x68] sm:$0xff] %vm531_vm0, %v1461_v8  ;;  %v1654_v8 = vld [vmem:[#allocation4 + $0x38] sm:$0xff] }
 0x19e   : > { %1586 = vst.msk [vmem:[#allocation4 + $0x60] sm:$0xff] %vm531_vm0, %v1456_v10 }
 0x1a2   : > { %v5470_v14 = vpop.f32.mrb[14].mxu0 }
 0x1a3   : > { %v1471_v15 = vadd.f32 %v5470_v14, %v6624_v6  ;;  %v1465_v16 = vpop.f32.mrb[15].mxu0  ;;  %v1653_v14 = vld [vmem:[#allocation4 + $0x30] sm:$0xff] }
 0x1a4   : > { %v1466_v17 = vadd.f32 %v6624_v6, %v1465_v16 }
 0x1a5   : > { %1589 = vst.msk [vmem:[#allocation4 + $0x78] sm:$0xff] %vm531_vm0, %v1471_v15 }
 0x1a6   : > { %1588 = vst.msk [vmem:[#allocation4 + $0x70] sm:$0xff] %vm531_vm0, %v1466_v17  ;;  %v1656_v17 = vld [vmem:[#allocation4 + $0x48] sm:$0xff] }
 0x1aa   : > { %v5473_v18 = vpop.f32.mrb[16].mxu0 }
 0x1ab   : > { %v1481_v19 = vadd.f32 %v5473_v18, %v6624_v6  ;;  %v1475_v22 = vpop.f32.mrb[17].mxu0 }
 0x1ac   : > { %v1476_v23 = vadd.f32 %v6624_v6, %v1475_v22 }
 0x1ad   : > { %1591 = vst.msk [vmem:[#allocation4 + $0x88] sm:$0xff] %vm531_vm0, %v1481_v19 }
 0x1ae   : > { %1590 = vst.msk [vmem:[#allocation4 + $0x80] sm:$0xff] %vm531_vm0, %v1476_v23  ;;  %v1655_v23 = vld [vmem:[#allocation4 + $0x40] sm:$0xff] }
 0x1b2   : > { %v5476_v24 = vpop.f32.mrb[18].mxu0 }
 0x1b3   : > { %v1491_v25 = vadd.f32 %v5476_v24, %v6624_v6  ;;  %v1485_v28 = vpop.f32.mrb[19].mxu0 }
 0x1b4   : > { %v1486_v29 = vadd.f32 %v6624_v6, %v1485_v28 }
 0x1b5   : > { %1593 = vst.msk [vmem:[#allocation4 + $0x98] sm:$0xff] %vm531_vm0, %v1491_v25 }
 0x1b6   : > { %1592 = vst.msk [vmem:[#allocation4 + $0x90] sm:$0xff] %vm531_vm0, %v1486_v29 }
 0x1ba   : > { %v5479_v30 = vpop.f32.mrb[20].mxu0 }
 0x1bb   : > { %v1501_v11 = vadd.f32 %v5479_v30, %v6624_v6  ;;  %v1495_v38 = vpop.f32.mrb[21].mxu0 }
 0x1bc   : > { %v1496_v40 = vadd.f32 %v6624_v6, %v1495_v38 }
 0x1bd   : > { %1595 = vst.msk [vmem:[#allocation4 + $0xa8] sm:$0xff] %vm531_vm0, %v1501_v11  ;;  %v1658_v11 = vld [vmem:[#allocation4 + $0x58] sm:$0xff] }
 0x1be   : > { %1594 = vst.msk [vmem:[#allocation4 + $0xa0] sm:$0xff] %vm531_vm0, %v1496_v40 }
 0x1c2   : > { %v5482_v31 = vpop.f32.mrb[22].mxu0 }
 0x1c3   : > { %v1511_v34 = vadd.f32 %v5482_v31, %v6624_v6  ;;  %v1505_v35 = vpop.f32.mrb[23].mxu0  ;;  %v1657_v31 = vld [vmem:[#allocation4 + $0x50] sm:$0xff] }
 0x1c4   : > { %v1506_v36 = vadd.f32 %v6624_v6, %v1505_v35 }
 0x1c5   : > { %1597 = vst.msk [vmem:[#allocation4 + $0xb8] sm:$0xff] %vm531_vm0, %v1511_v34 }
 0x1c6   : > { %1596 = vst.msk [vmem:[#allocation4 + $0xb0] sm:$0xff] %vm531_vm0, %v1506_v36 }
 0x1ca   : > { %v5485_v39 = vpop.f32.mrb[24].mxu0 }
 0x1cb   : > { %v1521_v41 = vadd.f32 %v5485_v39, %v6624_v6  ;;  %v1515_v37 = vpop.f32.mrb[25].mxu0 }
 0x1cc   : > { %v1516_v44 = vadd.f32 %v6624_v6, %v1515_v37 }
 0x1cd   : > { %1599 = vst.msk [vmem:[#allocation4 + $0xc8] sm:$0xff] %vm531_vm0, %v1521_v41 }
 0x1ce   : > { %1598 = vst.msk [vmem:[#allocation4 + $0xc0] sm:$0xff] %vm531_vm0, %v1516_v44 }
 0x1d5   : > { %v5488_v45 = vpop.f32.mrb[26].mxu0 }
 0x1d6   : > { %v1531_v46 = vadd.f32 %v5488_v45, %v6624_v6  ;;  %v1525_v47 = vpop.f32.mrb[27].mxu0  ;;  %v3446_v45 = vld [vmem:[%s7748_s5] sm:$0xff] }
 0x1d7   : > { %v1526_v52 = vadd.f32 %v6624_v6, %v1525_v47  ;;  %v1660_v47 = vld [vmem:[#allocation4 + $0x68] sm:$0xff] }
 0x1d8   : > { %1601 = vst.msk [vmem:[#allocation4 + $0xd8] sm:$0xff] %vm531_vm0, %v1531_v46  ;;  %v3447_v46 = vld [vmem:[%s7748_s5 + $0x8] sm:$0xf] }
 0x1d9   : > { %1600 = vst.msk [vmem:[#allocation4 + $0xd0] sm:$0xff] %vm531_vm0, %v1526_v52 }
 0x1dd   : > { %v5500_v48 = vpop.f32.mrb[0].mxu1 }
 0x1de   : > { %v1571_v49 = vadd.f32 %v5500_v48, %v6624_v6  ;;  %v1565_v58 = vpop.f32.mrb[1].mxu1  ;;  %v5791_v48 = vpack.c.bf16 %v3447_v46, %v3446_v45  ;;  %v1668_v45 = vld [vmem:[#allocation4 + $0xa8] sm:$0xff] }
 0x1df   : > { %v1566_v59 = vadd.f32 %v6624_v6, %v1565_v58  ;;  %v1659_v58 = vld [vmem:[#allocation4 + $0x60] sm:$0xff] }
 0x1e0   : > { %1609 = vst.msk [vmem:[#allocation4 + $0x118] sm:$0xff] %vm531_vm0, %v1571_v49  ;;  %5793 = vmatprep.subr.msk.bf16.mxu1 %vm6033_vm4, %v5791_v48 }
 0x1e1   : > { %1608 = vst.msk [vmem:[#allocation4 + $0x110] sm:$0xff] %vm531_vm0, %v1566_v59  ;;  %v5507_v12 = vpop.f32.mrb[2].mxu1  ;;  %5796 = vmatpush3.bf16.msk.msra.mxu1 %vm6033_vm4, %v5791_v48  ;;  %v1667_v48 = vld [vmem:[#allocation4 + $0xa0] sm:$0xff] }
 0x1e2   : > { %v2043_v13 = vadd.f32 %v5507_v12, %v1648_v5  ;;  %v5491_v20 = vpop.f32.mrb[28].mxu0  ;;  %v1863_v26 = vpop.f32.mrb[3].mxu1 }
 0x1e3   : > { %v1541_v27 = vadd.f32 %v5491_v20, %v6624_v6  ;;  %v2042_v32 = vadd.f32 %v1863_v26, %v1647_v21  ;;  %v1535_v33 = vpop.f32.mrb[29].mxu0 }
 0x1e4   : > { %2079 = vst.msk [vmem:[#allocation4 + $0x8] sm:$0xff] %vm531_vm0, %v2043_v13  ;;  %v1536_v42 = vadd.f32 %v6624_v6, %v1535_v33 }
 0x1e5   : > { %1603 = vst.msk [vmem:[#allocation4 + $0xe8] sm:$0xff] %vm531_vm0, %v1541_v27  ;;  %2078 = vst.msk [vmem:[#allocation4] sm:$0xff] %vm531_vm0, %v2042_v32  ;;  %v5510_v50 = vpop.f32.mrb[4].mxu1  ;;  %v1662_v32 = vld [vmem:[#allocation4 + $0x78] sm:$0xff] }
 0x1e6   : > { %1602 = vst.msk [vmem:[#allocation4 + $0xe0] sm:$0xff] %vm531_vm0, %v1536_v42  ;;  %v2045_v51 = vadd.f32 %v5510_v50, %v1650_v43  ;;  %v1873_v54 = vpop.f32.mrb[5].mxu1  ;;  %v1661_v43 = vld [vmem:[#allocation4 + $0x70] sm:$0xff] }
 0x1e7   : > { %v2044_v55 = vadd.f32 %v1873_v54, %v1649_v53 }
 0x1e8   : > { %2081 = vst.msk [vmem:[#allocation4 + $0x18] sm:$0xff] %vm531_vm0, %v2045_v51 }
 0x1e9   : > { %2080 = vst.msk [vmem:[#allocation4 + $0x10] sm:$0xff] %vm531_vm0, %v2044_v55  ;;  %v5513_v57 = vpop.f32.mrb[6].mxu1 }
 0x1ea   : > { %v2047_v60 = vadd.f32 %v5513_v57, %v1652_v56  ;;  %v5494_v61 = vpop.f32.mrb[30].mxu0  ;;  %v1883_v63 = vpop.f32.mrb[7].mxu1 }
 0x1eb   : > { %v1551_v1 = vadd.f32 %v5494_v61, %v6624_v6  ;;  %v2046_v2 = vadd.f32 %v1883_v63, %v1651_v62  ;;  %v1545_v3 = vpop.f32.mrb[31].mxu0  ;;  %v2152_v35 = vld [vmem:[#allocation4 + $0x8] sm:$0xff] }
 0x1ec   : > { %2083 = vst.msk [vmem:[#allocation4 + $0x28] sm:$0xff] %vm531_vm0, %v2047_v60  ;;  %v1546_v7 = vadd.f32 %v6624_v6, %v1545_v3  ;;  %v2151_v37 = vld [vmem:[#allocation4] sm:$0xff]  ;;  %v1664_v61 = vld [vmem:[#allocation4 + $0x88] sm:$0xff] }
 0x1ed   : > { %1605 = vst.msk [vmem:[#allocation4 + $0xf8] sm:$0xff] %vm531_vm0, %v1551_v1  ;;  %2082 = vst.msk [vmem:[#allocation4 + $0x20] sm:$0xff] %vm531_vm0, %v2046_v2  ;;  %v5516_v9 = vpop.f32.mrb[8].mxu1  ;;  %v1663_v2 = vld [vmem:[#allocation4 + $0x80] sm:$0xff] }
 0x1ee   : > { %1604 = vst.msk [vmem:[#allocation4 + $0xf0] sm:$0xff] %vm531_vm0, %v1546_v7  ;;  %v2049_v10 = vadd.f32 %v5516_v9, %v1654_v8  ;;  %v1893_v15 = vpop.f32.mrb[9].mxu1 }
 0x1ef   : > { %v2048_v16 = vadd.f32 %v1893_v15, %v1653_v14  ;;  %v2154_v5 = vld [vmem:[#allocation4 + $0x18] sm:$0xff] }
 0x1f0   : > { %2085 = vst.msk [vmem:[#allocation4 + $0x38] sm:$0xff] %vm531_vm0, %v2049_v10  ;;  %v2153_v21 = vld [vmem:[#allocation4 + $0x10] sm:$0xff] }
 0x1f1   : > { %2084 = vst.msk [vmem:[#allocation4 + $0x30] sm:$0xff] %vm531_vm0, %v2048_v16  ;;  %v5519_v18 = vpop.f32.mrb[10].mxu1 }
 0x1f2   : > { %v2051_v19 = vadd.f32 %v5519_v18, %v1656_v17  ;;  %v5497_v22 = vpop.f32.mrb[32].mxu0  ;;  %v1903_v24 = vpop.f32.mrb[11].mxu1 }
 0x1f3   : > { %v1561_v25 = vadd.f32 %v5497_v22, %v6624_v6  ;;  %v2050_v28 = vadd.f32 %v1903_v24, %v1655_v23  ;;  %v1555_v29 = vpop.f32.mrb[33].mxu0  ;;  %v2156_v51 = vld [vmem:[#allocation4 + $0x28] sm:$0xff] }
 0x1f4   : > { %2087 = vst.msk [vmem:[#allocation4 + $0x48] sm:$0xff] %vm531_vm0, %v2051_v19  ;;  %v1556_v30 = vadd.f32 %v6624_v6, %v1555_v29  ;;  %v2155_v56 = vld [vmem:[#allocation4 + $0x20] sm:$0xff] }
 0x1f5   : > { %1607 = vst.msk [vmem:[#allocation4 + $0x108] sm:$0xff] %vm531_vm0, %v1561_v25  ;;  %2086 = vst.msk [vmem:[#allocation4 + $0x40] sm:$0xff] %vm531_vm0, %v2050_v28  ;;  %v5522_v38 = vpop.f32.mrb[12].mxu1  ;;  %v1666_v25 = vld [vmem:[#allocation4 + $0x98] sm:$0xff] }
 0x1f6   : > { %1606 = vst.msk [vmem:[#allocation4 + $0x100] sm:$0xff] %vm531_vm0, %v1556_v30  ;;  %v2053_v40 = vadd.f32 %v5522_v38, %v1658_v11  ;;  %v1913_v34 = vpop.f32.mrb[13].mxu1  ;;  %v5565_v36 = vpop.f32.mrb[34].mxu0  ;;  %v1665_v11 = vld [vmem:[#allocation4 + $0x90] sm:$0xff] }
 0x1f7   : > { %v2052_v39 = vadd.f32 %v1913_v34, %v1657_v31  ;;  %v2547_v41 = vadd.f32 %v5565_v36, %v2152_v35  ;;  %v2367_v44 = vpop.f32.mrb[35].mxu0  ;;  %v2158_v7 = vld [vmem:[#allocation4 + $0x38] sm:$0xff] }
 0x1f8   : > { %2089 = vst.msk [vmem:[#allocation4 + $0x58] sm:$0xff] %vm531_vm0, %v2053_v40  ;;  %v2546_v6 = vadd.f32 %v2367_v44, %v2151_v37  ;;  %v2157_v15 = vld [vmem:[#allocation4 + $0x30] sm:$0xff] }
 0x1f9   : > { %2088 = vst.msk [vmem:[#allocation4 + $0x50] sm:$0xff] %vm531_vm0, %v2052_v39  ;;  %2583 = vst.msk [vmem:[#allocation4 + $0x8] sm:$0xff] %vm531_vm0, %v2547_v41  ;;  %v5525_v52 = vpop.f32.mrb[14].mxu1 }
 0x1fa   : > { %2836 = vst.msk [vmem:[#allocation4 + $0x8] sm:$0xff] %vm531_vm0, %v5863_v0  ;;  %2582 = vst.msk [vmem:[#allocation4] sm:$0xff] %vm531_vm0, %v2546_v6  ;;  %v2055_v49 = vadd.f32 %v5525_v52, %v1660_v47  ;;  %v1923_v59 = vpop.f32.mrb[15].mxu1  ;;  %v5568_v12 = vpop.f32.mrb[36].mxu0 }
 0x1fb   : > { %2835 = vst.msk [vmem:[#allocation4] sm:$0xff] %vm531_vm0, %v5863_v0  ;;  %v2054_v13 = vadd.f32 %v1923_v59, %v1659_v58  ;;  %v2549_v20 = vadd.f32 %v5568_v12, %v2154_v5  ;;  %v2377_v26 = vpop.f32.mrb[37].mxu0  ;;  %v2160_v40 = vld [vmem:[#allocation4 + $0x48] sm:$0xff] }
 0x1fc   : > { %2091 = vst.msk [vmem:[#allocation4 + $0x68] sm:$0xff] %vm531_vm0, %v2055_v49  ;;  %v2548_v27 = vadd.f32 %v2377_v26, %v2153_v21  ;;  %v2159_v36 = vld [vmem:[#allocation4 + $0x40] sm:$0xff] }
 0x1fd   : > { %2090 = vst.msk [vmem:[#allocation4 + $0x60] sm:$0xff] %vm531_vm0, %v2054_v13  ;;  %2585 = vst.msk [vmem:[#allocation4 + $0x18] sm:$0xff] %vm531_vm0, %v2549_v20  ;;  %v5528_v33 = vpop.f32.mrb[16].mxu1 }
 0x1fe   : > { %2584 = vst.msk [vmem:[#allocation4 + $0x10] sm:$0xff] %vm531_vm0, %v2548_v27  ;;  %v2057_v42 = vadd.f32 %v5528_v33, %v1662_v32  ;;  %v1933_v50 = vpop.f32.mrb[17].mxu1  ;;  %v5571_v53 = vpop.f32.mrb[38].mxu0  ;;  %v1670_v33 = vld [vmem:[#allocation4 + $0xb8] sm:$0xff] }
 0x1ff   : > { %v2056_v54 = vadd.f32 %v1933_v50, %v1661_v43  ;;  %v2551_v55 = vadd.f32 %v5571_v53, %v2156_v51  ;;  %v2387_v57 = vpop.f32.mrb[39].mxu0  ;;  %v2162_v58 = vld [vmem:[#allocation4 + $0x58] sm:$0xff]  ;;  %v1669_v51 = vld [vmem:[#allocation4 + $0xb0] sm:$0xff] }
 0x200   : > { %2093 = vst.msk [vmem:[#allocation4 + $0x78] sm:$0xff] %vm531_vm0, %v2057_v42  ;;  %v2550_v60 = vadd.f32 %v2387_v57, %v2155_v56  ;;  %v2161_v13 = vld [vmem:[#allocation4 + $0x50] sm:$0xff] }
 0x201   : > { %2092 = vst.msk [vmem:[#allocation4 + $0x70] sm:$0xff] %vm531_vm0, %v2056_v54  ;;  %2587 = vst.msk [vmem:[#allocation4 + $0x28] sm:$0xff] %vm531_vm0, %v2551_v55  ;;  %v5531_v62 = vpop.f32.mrb[18].mxu1  ;;  %v2872_v63 = vld [vmem:[#allocation4 + $0x8] sm:$0xff] }
 0x202   : > { %2586 = vst.msk [vmem:[#allocation4 + $0x20] sm:$0xff] %vm531_vm0, %v2550_v60  ;;  %v2059_v1 = vadd.f32 %v5531_v62, %v1664_v61  ;;  %v1943_v3 = vpop.f32.mrb[19].mxu1  ;;  %v5574_v8 = vpop.f32.mrb[40].mxu0  ;;  %2945 = vrot.lane.b32.xlu1 %v2872_v63, %s5865_s11  ;;  %v6735_v9 = vld [vmem:[#allocation4] sm:$0xff]  ;;  %v3198_v17 = vld [vmem:[#allocation4 + $0x9] sm:$0x7f] }
 0x203   : > { %v2058_v10 = vadd.f32 %v1943_v3, %v1663_v2  ;;  %v2553_v14 = vadd.f32 %v5574_v8, %v2158_v7  ;;  %v2397_v16 = vpop.f32.mrb[41].mxu0  ;;  %2943 = vrot.lane.b32.xlu0 %v6735_v9, %s5865_s11  ;;  %v3197_v22 = vld [vmem:[#allocation4 + $0x1] sm:$0xff] }
 0x204   : > { %v2694_v18 = vld [vmem:[#allocation4 + $0x18] sm:$0xff]  ;;  %2095 = vst.msk [vmem:[#allocation4 + $0x88] sm:$0xff] %vm531_vm0, %v2059_v1  ;;  %v2552_v19 = vadd.f32 %v2397_v16, %v2157_v15  ;;  %v2164_v54 = vld [vmem:[#allocation4 + $0x68] sm:$0xff]  ;;  %v2163_v61 = vld [vmem:[#allocation4 + $0x60] sm:$0xff] }
 0x205   : > { %v2730_v23 = vmax.f32 %v2694_v18, 0.0  ;;  %v2693_v24 = vld [vmem:[#allocation4 + $0x10] sm:$0xff]  ;;  %2094 = vst.msk [vmem:[#allocation4 + $0x80] sm:$0xff] %vm531_vm0, %v2058_v10  ;;  %2589 = vst.msk [vmem:[#allocation4 + $0x38] sm:$0xff] %vm531_vm0, %v2553_v14  ;;  %v5534_v28 = vpop.f32.mrb[20].mxu1  ;;  %v1672_v8 = vld [vmem:[#allocation4 + $0xc8] sm:$0xff] }
 0x206   : > { %v2729_v29 = vmax.f32 %v2693_v24, 0.0  ;;  %2588 = vst.msk [vmem:[#allocation4 + $0x30] sm:$0xff] %vm531_vm0, %v2552_v19  ;;  %v2061_v30 = vadd.f32 %v5534_v28, %v1666_v25  ;;  %v1953_v38 = vpop.f32.mrb[21].mxu1  ;;  %v5577_v31 = vpop.f32.mrb[42].mxu0  ;;  %3271 = vrot.lane.b32.xlu1 %v3198_v17, %s5866_s12  ;;  %v1671_v14 = vld [vmem:[#allocation4 + $0xc0] sm:$0xff] }
 0x207   : > { %2838 = vst.msk [vmem:[#allocation4 + $0x18] sm:$0xff] %vm531_vm0, %v2730_v23  ;;  %v2060_v34 = vadd.f32 %v1953_v38, %v1665_v11  ;;  %v2555_v35 = vadd.f32 %v5577_v31, %v2160_v40  ;;  %v2407_v39 = vpop.f32.mrb[43].mxu0  ;;  %3269 = vrot.lane.b32.xlu0 %v3197_v22, %s5866_s12  ;;  %v2166_v18 = vld [vmem:[#allocation4 + $0x78] sm:$0xff] }
 0x208   : > { %2837 = vst.msk [vmem:[#allocation4 + $0x10] sm:$0xff] %vm531_vm0, %v2729_v29  ;;  %v2696_v41 = vld [vmem:[#allocation4 + $0x28] sm:$0xff]  ;;  %2097 = vst.msk [vmem:[#allocation4 + $0x98] sm:$0xff] %vm531_vm0, %v2061_v30  ;;  %v2554_v37 = vadd.f32 %v2407_v39, %v2159_v36  ;;  %v2165_v25 = vld [vmem:[#allocation4 + $0x70] sm:$0xff] }
 0x209   : > { %v2732_v44 = vmax.f32 %v2696_v41, 0.0  ;;  %v2695_v6 = vld [vmem:[#allocation4 + $0x20] sm:$0xff]  ;;  %2096 = vst.msk [vmem:[#allocation4 + $0x90] sm:$0xff] %vm531_vm0, %v2060_v34  ;;  %2591 = vst.msk [vmem:[#allocation4 + $0x48] sm:$0xff] %vm531_vm0, %v2555_v35  ;;  %v5537_v46 = vpop.f32.mrb[22].mxu1  ;;  %v1674_v38 = vld [vmem:[#allocation4 + $0xd8] sm:$0xff] }
 0x20a   : > { %v2731_v47 = vmax.f32 %v2695_v6, 0.0  ;;  %2590 = vst.msk [vmem:[#allocation4 + $0x40] sm:$0xff] %vm531_vm0, %v2554_v37  ;;  %v2063_v52 = vadd.f32 %v5537_v46, %v1668_v45  ;;  %v1963_v49 = vpop.f32.mrb[23].mxu1  ;;  %v5580_v59 = vpop.f32.mrb[44].mxu0  ;;  %v5185_v35 = vld [vmem:[%s7748_s5 + $0x20] sm:$0xff]  ;;  %v1673_v37 = vld [vmem:[#allocation4 + $0xd0] sm:$0xff] }
 0x20b   : > { %2840 = vst.msk [vmem:[#allocation4 + $0x28] sm:$0xff] %vm531_vm0, %v2732_v44  ;;  %v2062_v5 = vadd.f32 %v1963_v49, %v1667_v48  ;;  %v2557_v12 = vadd.f32 %v5580_v59, %v2162_v58  ;;  %v2417_v20 = vpop.f32.mrb[45].mxu0  ;;  %v5186_v36 = vld [vmem:[%s7748_s5 + $0x28] sm:$0xf] }
 0x20c   : > { %2839 = vst.msk [vmem:[#allocation4 + $0x20] sm:$0xff] %vm531_vm0, %v2731_v47  ;;  %v2698_v21 = vld [vmem:[#allocation4 + $0x38] sm:$0xff]  ;;  %2099 = vst.msk [vmem:[#allocation4 + $0xa8] sm:$0xff] %vm531_vm0, %v2063_v52  ;;  %v2556_v26 = vadd.f32 %v2417_v20, %v2161_v13  ;;  %v2168_v6 = vld [vmem:[#allocation4 + $0x88] sm:$0xff]  ;;  %v5803_v47 = vpack.c.bf16 %v5186_v36, %v5185_v35 }
 0x20d   : > { %v2734_v27 = vmax.f32 %v2698_v21, 0.0  ;;  %v2697_v32 = vld [vmem:[#allocation4 + $0x30] sm:$0xff]  ;;  %2098 = vst.msk [vmem:[#allocation4 + $0xa0] sm:$0xff] %vm531_vm0, %v2062_v5  ;;  %2593 = vst.msk [vmem:[#allocation4 + $0x58] sm:$0xff] %vm531_vm0, %v2557_v12  ;;  %v5540_v42 = vpop.f32.mrb[24].mxu1  ;;  %v2167_v49 = vld [vmem:[#allocation4 + $0x80] sm:$0xff] }
 0x20e   : > { %v2733_v43 = vmax.f32 %v2697_v32, 0.0  ;;  %2592 = vst.msk [vmem:[#allocation4 + $0x50] sm:$0xff] %vm531_vm0, %v2556_v26  ;;  %v2065_v50 = vadd.f32 %v5540_v42, %v1670_v33  ;;  %v1973_v53 = vpop.f32.mrb[25].mxu1  ;;  %v5583_v55 = vpop.f32.mrb[46].mxu0  ;;  %v2874_v56 = vld [vmem:[#allocation4 + $0x18] sm:$0xff]  ;;  %5805 = vmatprep.subr.msk.bf16.mxu0 %vm6033_vm4, %v5803_v47  ;;  %v1676_v21 = vld [vmem:[#allocation4 + $0xe8] sm:$0xff] }
 0x20f   : > { %2842 = vst.msk [vmem:[#allocation4 + $0x38] sm:$0xff] %vm531_vm0, %v2734_v27  ;;  %v2064_v57 = vadd.f32 %v1973_v53, %v1669_v51  ;;  %v2559_v60 = vadd.f32 %v5583_v55, %v2164_v54  ;;  %2949 = vrot.lane.b32.xlu1 %v2874_v56, %s5865_s11  ;;  %v2427_v62 = vpop.f32.mrb[47].mxu0  ;;  %v6759_v63 = vld [vmem:[#allocation4 + $0x10] sm:$0xff]  ;;  %v3200_v22 = vld [vmem:[#allocation4 + $0x19] sm:$0x7f]  ;;  %v1675_v27 = vld [vmem:[#allocation4 + $0xe0] sm:$0xff]  ;;  %5808 = vmatpush3.bf16.msk.msra.mxu0 %vm6033_vm4, %v5803_v47 }
 0x210   : > { %2841 = vst.msk [vmem:[#allocation4 + $0x30] sm:$0xff] %vm531_vm0, %v2733_v43  ;;  %v2700_v1 = vld [vmem:[#allocation4 + $0x48] sm:$0xff]  ;;  %2101 = vst.msk [vmem:[#allocation4 + $0xb8] sm:$0xff] %vm531_vm0, %v2065_v50  ;;  %v2558_v2 = vadd.f32 %v2427_v62, %v2163_v61  ;;  %2947 = vrot.lane.b32.xlu0 %v6759_v63, %s5865_s11  ;;  %v3199_v29 = vld [vmem:[#allocation4 + $0x11] sm:$0xff] }
 0x211   : > { %v2736_v3 = vmax.f32 %v2700_v1, 0.0  ;;  %v2699_v7 = vld [vmem:[#allocation4 + $0x40] sm:$0xff]  ;;  %2100 = vst.msk [vmem:[#allocation4 + $0xb0] sm:$0xff] %vm531_vm0, %v2064_v57  ;;  %2595 = vst.msk [vmem:[#allocation4 + $0x68] sm:$0xff] %vm531_vm0, %v2559_v60  ;;  %v5543_v10 = vpop.f32.mrb[26].mxu1  ;;  %v2170_v43 = vld [vmem:[#allocation4 + $0x98] sm:$0xff] }
 0x212   : > { %v2735_v15 = vmax.f32 %v2699_v7, 0.0  ;;  %2594 = vst.msk [vmem:[#allocation4 + $0x60] sm:$0xff] %vm531_vm0, %v2558_v2  ;;  %v2067_v16 = vadd.f32 %v5543_v10, %v1672_v8  ;;  %v1983_v17 = vpop.f32.mrb[27].mxu1  ;;  %v5586_v19 = vpop.f32.mrb[48].mxu0  ;;  %v2876_v46 = vld [vmem:[#allocation4 + $0x28] sm:$0xff]  ;;  %v2169_v55 = vld [vmem:[#allocation4 + $0x90] sm:$0xff] }
 0x213   : > { %2844 = vst.msk [vmem:[#allocation4 + $0x48] sm:$0xff] %vm531_vm0, %v2736_v3  ;;  %v2066_v23 = vadd.f32 %v1983_v17, %v1671_v14  ;;  %v2561_v24 = vadd.f32 %v5586_v19, %v2166_v18  ;;  %3275 = vrot.lane.b32.xlu1 %v3200_v22, %s5866_s12  ;;  %v2437_v28 = vpop.f32.mrb[49].mxu0  ;;  %v6784_v59 = vld [vmem:[#allocation4 + $0x20] sm:$0xff]  ;;  %v3202_v51 = vld [vmem:[#allocation4 + $0x29] sm:$0x7f]  ;;  %v1678_v2 = vld [vmem:[#allocation4 + $0xf8] sm:$0xff] }
 0x214   : > { %2843 = vst.msk [vmem:[#allocation4 + $0x40] sm:$0xff] %vm531_vm0, %v2735_v15  ;;  %v2702_v30 = vld [vmem:[#allocation4 + $0x58] sm:$0xff]  ;;  %2103 = vst.msk [vmem:[#allocation4 + $0xc8] sm:$0xff] %vm531_vm0, %v2067_v16  ;;  %v2560_v11 = vadd.f32 %v2437_v28, %v2165_v25  ;;  %3273 = vrot.lane.b32.xlu0 %v3199_v29, %s5866_s12  ;;  %v3201_v57 = vld [vmem:[#allocation4 + $0x21] sm:$0xff] }
 0x215   : > { %v2738_v40 = vmax.f32 %v2702_v30, 0.0  ;;  %v2701_v31 = vld [vmem:[#allocation4 + $0x50] sm:$0xff]  ;;  %2102 = vst.msk [vmem:[#allocation4 + $0xc0] sm:$0xff] %vm531_vm0, %v2066_v23  ;;  %2597 = vst.msk [vmem:[#allocation4 + $0x78] sm:$0xff] %vm531_vm0, %v2561_v24  ;;  %v5546_v34 = vpop.f32.mrb[28].mxu1  ;;  %v2172_v15 = vld [vmem:[#allocation4 + $0xa8] sm:$0xff] }
 0x216   : > { %v2737_v39 = vmax.f32 %v2701_v31, 0.0  ;;  %2596 = vst.msk [vmem:[#allocation4 + $0x70] sm:$0xff] %vm531_vm0, %v2560_v11  ;;  %v2069_v41 = vadd.f32 %v5546_v34, %v1674_v38  ;;  %v1993_v44 = vpop.f32.mrb[29].mxu1  ;;  %v5589_v45 = vpop.f32.mrb[50].mxu0  ;;  %v1677_v10 = vld [vmem:[#allocation4 + $0xf0] sm:$0xff]  ;;  %v2878_v17 = vld [vmem:[#allocation4 + $0x38] sm:$0xff] }
 0x217   : > { %2846 = vst.msk [vmem:[#allocation4 + $0x58] sm:$0xff] %vm531_vm0, %v2738_v40  ;;  %v2068_v52 = vadd.f32 %v1993_v44, %v1673_v37  ;;  %v2563_v48 = vadd.f32 %v5589_v45, %v2168_v6  ;;  %2953 = vrot.lane.b32.xlu1 %v2876_v46, %s5865_s11  ;;  %v2447_v58 = vpop.f32.mrb[51].mxu0  ;;  %v2171_v22 = vld [vmem:[#allocation4 + $0xa0] sm:$0xff]  ;;  %v6807_v24 = vld [vmem:[#allocation4 + $0x30] sm:$0xff]  ;;  %v1680_v11 = vld [vmem:[#allocation4 + $0x108] sm:$0xff] }
 0x218   : > { %2845 = vst.msk [vmem:[#allocation4 + $0x50] sm:$0xff] %vm531_vm0, %v2737_v39  ;;  %v2704_v5 = vld [vmem:[#allocation4 + $0x68] sm:$0xff]  ;;  %2105 = vst.msk [vmem:[#allocation4 + $0xd8] sm:$0xff] %vm531_vm0, %v2069_v41  ;;  %v2562_v12 = vadd.f32 %v2447_v58, %v2167_v49  ;;  %2951 = vrot.lane.b32.xlu0 %v6784_v59, %s5865_s11  ;;  %v1679_v40 = vld [vmem:[#allocation4 + $0x100] sm:$0xff] }
 0x219   : > { %v2740_v13 = vmax.f32 %v2704_v5, 0.0  ;;  %v2703_v20 = vld [vmem:[#allocation4 + $0x60] sm:$0xff]  ;;  %2104 = vst.msk [vmem:[#allocation4 + $0xd0] sm:$0xff] %vm531_vm0, %v2068_v52  ;;  %2599 = vst.msk [vmem:[#allocation4 + $0x88] sm:$0xff] %vm531_vm0, %v2563_v48  ;;  %v5549_v26 = vpop.f32.mrb[30].mxu1  ;;  %v2174_v36 = vld [vmem:[#allocation4 + $0xb8] sm:$0xff] }
 0x21a   : > { %v2739_v32 = vmax.f32 %v2703_v20, 0.0  ;;  %2598 = vst.msk [vmem:[#allocation4 + $0x80] sm:$0xff] %vm531_vm0, %v2562_v12  ;;  %v2071_v33 = vadd.f32 %v5549_v26, %v1676_v21  ;;  %v2003_v42 = vpop.f32.mrb[31].mxu1  ;;  %v5592_v50 = vpop.f32.mrb[52].mxu0  ;;  %v3204_v41 = vld [vmem:[#allocation4 + $0x39] sm:$0x7f] }
 0x21b   : > { %2848 = vst.msk [vmem:[#allocation4 + $0x68] sm:$0xff] %vm531_vm0, %v2740_v13  ;;  %v2070_v53 = vadd.f32 %v2003_v42, %v1675_v27  ;;  %v2565_v54 = vadd.f32 %v5592_v50, %v2170_v43  ;;  %3279 = vrot.lane.b32.xlu1 %v3202_v51, %s5866_s12  ;;  %v2457_v56 = vpop.f32.mrb[53].mxu0  ;;  %v2173_v6 = vld [vmem:[#allocation4 + $0xb0] sm:$0xff]  ;;  %v1682_v58 = vld [vmem:[#allocation4 + $0x118] sm:$0xff]  ;;  %v2176_v26 = vld [vmem:[#allocation4 + $0xc8] sm:$0xff] }
 0x21c   : > { %2847 = vst.msk [vmem:[#allocation4 + $0x60] sm:$0xff] %vm531_vm0, %v2739_v32  ;;  %v2706_v60 = vld [vmem:[#allocation4 + $0x78] sm:$0xff]  ;;  %2107 = vst.msk [vmem:[#allocation4 + $0xe8] sm:$0xff] %vm531_vm0, %v2071_v33  ;;  %v2564_v61 = vadd.f32 %v2457_v56, %v2169_v55  ;;  %3277 = vrot.lane.b32.xlu0 %v3201_v57, %s5866_s12  ;;  %v1681_v20 = vld [vmem:[#allocation4 + $0x110] sm:$0xff] }
 0x21d   : > { %v2742_v62 = vmax.f32 %v2706_v60, 0.0  ;;  %v2705_v1 = vld [vmem:[#allocation4 + $0x70] sm:$0xff]  ;;  %2106 = vst.msk [vmem:[#allocation4 + $0xe0] sm:$0xff] %vm531_vm0, %v2070_v53  ;;  %2601 = vst.msk [vmem:[#allocation4 + $0x98] sm:$0xff] %vm531_vm0, %v2565_v54  ;;  %v5552_v3 = vpop.f32.mrb[32].mxu1  ;;  %v2880_v32 = vld [vmem:[#allocation4 + $0x48] sm:$0xff] }
 0x21e   : > { %v2741_v7 = vmax.f32 %v2705_v1, 0.0  ;;  %2600 = vst.msk [vmem:[#allocation4 + $0x90] sm:$0xff] %vm531_vm0, %v2564_v61  ;;  %v2073_v8 = vadd.f32 %v5552_v3, %v1678_v2  ;;  %v2013_v14 = vpop.f32.mrb[33].mxu1  ;;  %v5595_v16 = vpop.f32.mrb[54].mxu0  ;;  %v3203_v46 = vld [vmem:[#allocation4 + $0x31] sm:$0xff]  ;;  %v2175_v43 = vld [vmem:[#allocation4 + $0xc0] sm:$0xff] }
 0x21f   : > { %2850 = vst.msk [vmem:[#allocation4 + $0x78] sm:$0xff] %vm531_vm0, %v2742_v62  ;;  %v2072_v18 = vadd.f32 %v2013_v14, %v1677_v10  ;;  %v2567_v19 = vadd.f32 %v5595_v16, %v2172_v15  ;;  %2957 = vrot.lane.b32.xlu1 %v2878_v17, %s5865_s11  ;;  %v2467_v23 = vpop.f32.mrb[55].mxu0  ;;  %v6826_v51 = vld [vmem:[#allocation4 + $0x40] sm:$0xff]  ;;  %v2178_v60 = vld [vmem:[#allocation4 + $0xd8] sm:$0xff]  ;;  %v3206_v62 = vld [vmem:[#allocation4 + $0x49] sm:$0x7f] }
 0x220   : > { %2849 = vst.msk [vmem:[#allocation4 + $0x70] sm:$0xff] %vm531_vm0, %v2741_v7  ;;  %v2708_v25 = vld [vmem:[#allocation4 + $0x88] sm:$0xff]  ;;  %2109 = vst.msk [vmem:[#allocation4 + $0xf8] sm:$0xff] %vm531_vm0, %v2073_v8  ;;  %v2566_v28 = vadd.f32 %v2467_v23, %v2171_v22  ;;  %2955 = vrot.lane.b32.xlu0 %v6807_v24, %s5865_s11  ;;  %v2177_v2 = vld [vmem:[#allocation4 + $0xd0] sm:$0xff] }
 0x221   : > { %v2744_v29 = vmax.f32 %v2708_v25, 0.0  ;;  %v2707_v30 = vld [vmem:[#allocation4 + $0x80] sm:$0xff]  ;;  %2108 = vst.msk [vmem:[#allocation4 + $0xf0] sm:$0xff] %vm531_vm0, %v2072_v18  ;;  %2603 = vst.msk [vmem:[#allocation4 + $0xa8] sm:$0xff] %vm531_vm0, %v2567_v19  ;;  %v5555_v38 = vpop.f32.mrb[34].mxu1  ;;  %v2882_v19 = vld [vmem:[#allocation4 + $0x58] sm:$0xff] }
 0x222   : > { %v2743_v31 = vmax.f32 %v2707_v30, 0.0  ;;  %2602 = vst.msk [vmem:[#allocation4 + $0xa0] sm:$0xff] %vm531_vm0, %v2566_v28  ;;  %v2075_v34 = vadd.f32 %v5555_v38, %v1680_v11  ;;  %v2023_v35 = vpop.f32.mrb[35].mxu1  ;;  %v5598_v39 = vpop.f32.mrb[56].mxu0  ;;  %v3205_v7 = vld [vmem:[#allocation4 + $0x41] sm:$0xff]  ;;  %v6843_v28 = vld [vmem:[#allocation4 + $0x50] sm:$0xff] }
 0x223   : > { %2852 = vst.msk [vmem:[#allocation4 + $0x88] sm:$0xff] %vm531_vm0, %v2744_v29  ;;  %v2074_v37 = vadd.f32 %v2023_v35, %v1679_v40  ;;  %v2569_v44 = vadd.f32 %v5598_v39, %v2174_v36  ;;  %3283 = vrot.lane.b32.xlu1 %v3204_v41, %s5866_s12  ;;  %v2477_v45 = vpop.f32.mrb[57].mxu0  ;;  %v2180_v17 = vld [vmem:[#allocation4 + $0xe8] sm:$0xff]  ;;  %v3208_v35 = vld [vmem:[#allocation4 + $0x59] sm:$0x7f] }
 0x224   : > { %2851 = vst.msk [vmem:[#allocation4 + $0x80] sm:$0xff] %vm531_vm0, %v2743_v31  ;;  %v2710_v47 = vld [vmem:[#allocation4 + $0x98] sm:$0xff]  ;;  %2111 = vst.msk [vmem:[#allocation4 + $0x108] sm:$0xff] %vm531_vm0, %v2075_v34  ;;  %v2568_v52 = vadd.f32 %v2477_v45, %v2173_v6  ;;  %3281 = vrot.lane.b32.xlu0 %v3203_v46, %s5866_s12  ;;  %v2179_v23 = vld [vmem:[#allocation4 + $0xe0] sm:$0xff] }
 0x225   : > { %v2746_v48 = vmax.f32 %v2710_v47, 0.0  ;;  %v2709_v49 = vld [vmem:[#allocation4 + $0x90] sm:$0xff]  ;;  %2110 = vst.msk [vmem:[#allocation4 + $0x100] sm:$0xff] %vm531_vm0, %v2074_v37  ;;  %2605 = vst.msk [vmem:[#allocation4 + $0xb8] sm:$0xff] %vm531_vm0, %v2569_v44  ;;  %v5558_v5 = vpop.f32.mrb[36].mxu1 }
 0x226   : > { %v2745_v12 = vmax.f32 %v2709_v49, 0.0  ;;  %2604 = vst.msk [vmem:[#allocation4 + $0xb0] sm:$0xff] %vm531_vm0, %v2568_v52  ;;  %v2077_v13 = vadd.f32 %v5558_v5, %v1682_v58  ;;  %v2033_v21 = vpop.f32.mrb[37].mxu1  ;;  %v5601_v27 = vpop.f32.mrb[58].mxu0  ;;  %v3207_v37 = vld [vmem:[#allocation4 + $0x51] sm:$0xff]  ;;  %v2884_v49 = vld [vmem:[#allocation4 + $0x68] sm:$0xff] }
 0x227   : > { %2854 = vst.msk [vmem:[#allocation4 + $0x98] sm:$0xff] %vm531_vm0, %v2746_v48  ;;  %v2076_v33 = vadd.f32 %v2033_v21, %v1681_v20  ;;  %v2571_v42 = vadd.f32 %v5601_v27, %v2176_v26  ;;  %2961 = vrot.lane.b32.xlu1 %v2880_v32, %s5865_s11  ;;  %v2487_v50 = vpop.f32.mrb[59].mxu0  ;;  %v2182_v31 = vld [vmem:[#allocation4 + $0xf8] sm:$0xff] }
 0x228   : > { %2853 = vst.msk [vmem:[#allocation4 + $0x90] sm:$0xff] %vm531_vm0, %v2745_v12  ;;  %v2712_v53 = vld [vmem:[#allocation4 + $0xa8] sm:$0xff]  ;;  %2113 = vst.msk [vmem:[#allocation4 + $0x118] sm:$0xff] %vm531_vm0, %v2077_v13  ;;  %v2570_v54 = vadd.f32 %v2487_v50, %v2175_v43  ;;  %2959 = vrot.lane.b32.xlu0 %v6826_v51, %s5865_s11  ;;  %v2181_v39 = vld [vmem:[#allocation4 + $0xf0] sm:$0xff] }
 0x229   : > { %v2748_v55 = vmax.f32 %v2712_v53, 0.0  ;;  %v2711_v56 = vld [vmem:[#allocation4 + $0xa0] sm:$0xff]  ;;  %2112 = vst.msk [vmem:[#allocation4 + $0x110] sm:$0xff] %vm531_vm0, %v2076_v33  ;;  %2607 = vst.msk [vmem:[#allocation4 + $0xc8] sm:$0xff] %vm531_vm0, %v2571_v42  ;;  %v3210_v43 = vld [vmem:[#allocation4 + $0x69] sm:$0x7f] }
 0x22a   : > { %v2747_v57 = vmax.f32 %v2711_v56, 0.0  ;;  %2606 = vst.msk [vmem:[#allocation4 + $0xc0] sm:$0xff] %vm531_vm0, %v2570_v54  ;;  %v5604_v61 = vpop.f32.mrb[60].mxu0  ;;  %v6858_v13 = vld [vmem:[#allocation4 + $0x60] sm:$0xff] }
 0x22b   : > { %2856 = vst.msk [vmem:[#allocation4 + $0xa8] sm:$0xff] %vm531_vm0, %v2748_v55  ;;  %v2573_v1 = vadd.f32 %v5604_v61, %v2178_v60  ;;  %3287 = vrot.lane.b32.xlu1 %v3206_v62, %s5866_s12  ;;  %v2497_v3 = vpop.f32.mrb[61].mxu0  ;;  %v2184_v52 = vld [vmem:[#allocation4 + $0x108] sm:$0xff] }
 0x22c   : > { %2855 = vst.msk [vmem:[#allocation4 + $0xa0] sm:$0xff] %vm531_vm0, %v2747_v57  ;;  %v2714_v8 = vld [vmem:[#allocation4 + $0xb8] sm:$0xff]  ;;  %v2572_v10 = vadd.f32 %v2497_v3, %v2177_v2  ;;  %3285 = vrot.lane.b32.xlu0 %v3205_v7, %s5866_s12  ;;  %v2183_v5 = vld [vmem:[#allocation4 + $0x100] sm:$0xff]  ;;  %v6877_v2 = vld [vmem:[#allocation4 + $0x70] sm:$0xff] }
 0x22d   : > { %v2750_v14 = vmax.f32 %v2714_v8, 0.0  ;;  %v2713_v15 = vld [vmem:[#allocation4 + $0xb0] sm:$0xff]  ;;  %2609 = vst.msk [vmem:[#allocation4 + $0xd8] sm:$0xff] %vm531_vm0, %v2573_v1  ;;  %v3209_v55 = vld [vmem:[#allocation4 + $0x61] sm:$0xff]  ;;  %v2886_v1 = vld [vmem:[#allocation4 + $0x78] sm:$0xff] }
 0x22e   : > { %v2749_v16 = vmax.f32 %v2713_v15, 0.0  ;;  %2608 = vst.msk [vmem:[#allocation4 + $0xd0] sm:$0xff] %vm531_vm0, %v2572_v10  ;;  %v5607_v18 = vpop.f32.mrb[62].mxu0  ;;  %v3211_v15 = vld [vmem:[#allocation4 + $0x71] sm:$0xff] }
 0x22f   : > { %2858 = vst.msk [vmem:[#allocation4 + $0xb8] sm:$0xff] %vm531_vm0, %v2750_v14  ;;  %v2575_v22 = vadd.f32 %v5607_v18, %v2180_v17  ;;  %2965 = vrot.lane.b32.xlu1 %v2882_v19, %s5865_s11  ;;  %v2507_v25 = vpop.f32.mrb[63].mxu0  ;;  %v2186_v33 = vld [vmem:[#allocation4 + $0x118] sm:$0xff]  ;;  %v2888_v19 = vld [vmem:[#allocation4 + $0x88] sm:$0xff] }
 0x230   : > { %2857 = vst.msk [vmem:[#allocation4 + $0xb0] sm:$0xff] %vm531_vm0, %v2749_v16  ;;  %v2716_v29 = vld [vmem:[#allocation4 + $0xc8] sm:$0xff]  ;;  %v2574_v30 = vadd.f32 %v2507_v25, %v2179_v23  ;;  %2963 = vrot.lane.b32.xlu0 %v6843_v28, %s5865_s11  ;;  %v2185_v53 = vld [vmem:[#allocation4 + $0x110] sm:$0xff]  ;;  %v3212_v14 = vld [vmem:[#allocation4 + $0x79] sm:$0x7f] }
 0x231   : > { %v2752_v11 = vmax.f32 %v2716_v29, 0.0  ;;  %v2715_v38 = vld [vmem:[#allocation4 + $0xc0] sm:$0xff]  ;;  %2611 = vst.msk [vmem:[#allocation4 + $0xe8] sm:$0xff] %vm531_vm0, %v2575_v22  ;;  %v5150_v16 = vld [vmem:[%s7748_s5 + $0x10] sm:$0xff]  ;;  %v5151_v17 = vld [vmem:[%s7748_s5 + $0x18] sm:$0xf] }
 0x232   : > { %v2751_v40 = vmax.f32 %v2715_v38, 0.0  ;;  %2610 = vst.msk [vmem:[#allocation4 + $0xe0] sm:$0xff] %vm531_vm0, %v2574_v30  ;;  %v5610_v34 = vpop.f32.mrb[64].mxu0  ;;  %v6892_v18 = vpack.c.bf16 %v5151_v17, %v5150_v16  ;;  %v6895_v22 = vld [vmem:[#allocation4 + $0x80] sm:$0xff]  ;;  %v3214_v23 = vld [vmem:[#allocation4 + $0x89] sm:$0x7f] }
 0x233   : > { %2860 = vst.msk [vmem:[#allocation4 + $0xc8] sm:$0xff] %vm531_vm0, %v2752_v11  ;;  %v2577_v36 = vadd.f32 %v5610_v34, %v2182_v31  ;;  %3291 = vrot.lane.b32.xlu1 %v3208_v35, %s5866_s12  ;;  %v2517_v41 = vpop.f32.mrb[65].mxu0  ;;  %v3213_v25 = vld [vmem:[#allocation4 + $0x81] sm:$0xff]  ;;  %v2890_v29 = vld [vmem:[#allocation4 + $0x98] sm:$0xff]  ;;  %v6905_v30 = vld [vmem:[#allocation4 + $0x90] sm:$0xff] }
 0x234   : > { %2859 = vst.msk [vmem:[#allocation4 + $0xc0] sm:$0xff] %vm531_vm0, %v2751_v40  ;;  %v2718_v44 = vld [vmem:[#allocation4 + $0xd8] sm:$0xff]  ;;  %v2576_v6 = vadd.f32 %v2517_v41, %v2181_v39  ;;  %3289 = vrot.lane.b32.xlu0 %v3207_v37, %s5866_s12  ;;  %5799 = vmatprep.subr.msk.bf16.mxu1 %vm6033_vm4, %v6892_v18  ;;  %v2892_v40 = vld [vmem:[#allocation4 + $0xa8] sm:$0xff]  ;;  %v6912_v31 = vld [vmem:[#allocation4 + $0xa0] sm:$0xff] }
 0x235   : > { %v2754_v45 = vmax.f32 %v2718_v44, 0.0  ;;  %v2717_v46 = vld [vmem:[#allocation4 + $0xd0] sm:$0xff]  ;;  %2613 = vst.msk [vmem:[#allocation4 + $0xf8] sm:$0xff] %vm531_vm0, %v2577_v36  ;;  %v3216_v11 = vld [vmem:[#allocation4 + $0x99] sm:$0x7f]  ;;  %v3217_v35 = vld [vmem:[#allocation4 + $0xa1] sm:$0xff] }
 0x236   : > { %v2753_v47 = vmax.f32 %v2717_v46, 0.0  ;;  %2612 = vst.msk [vmem:[#allocation4 + $0xf0] sm:$0xff] %vm531_vm0, %v2576_v6  ;;  %v5613_v48 = vpop.f32.mrb[66].mxu0  ;;  %v3215_v38 = vld [vmem:[#allocation4 + $0x91] sm:$0xff]  ;;  %v3218_v34 = vld [vmem:[#allocation4 + $0xa9] sm:$0x7f] }
 0x237   : > { %2862 = vst.msk [vmem:[#allocation4 + $0xd8] sm:$0xff] %vm531_vm0, %v2754_v45  ;;  %v2579_v58 = vadd.f32 %v5613_v48, %v2184_v52  ;;  %2969 = vrot.lane.b32.xlu1 %v2884_v49, %s5865_s11  ;;  %v2527_v12 = vpop.f32.mrb[67].mxu0  ;;  %v2894_v36 = vld [vmem:[#allocation4 + $0xb8] sm:$0xff]  ;;  %v6919_v39 = vld [vmem:[#allocation4 + $0xb0] sm:$0xff] }
 0x238   : > { %2861 = vst.msk [vmem:[#allocation4 + $0xd0] sm:$0xff] %vm531_vm0, %v2753_v47  ;;  %v2720_v20 = vld [vmem:[#allocation4 + $0xe8] sm:$0xff]  ;;  %v2578_v21 = vadd.f32 %v2527_v12, %v2183_v5  ;;  %2967 = vrot.lane.b32.xlu0 %v6858_v13, %s5865_s11  ;;  %v3220_v41 = vld [vmem:[#allocation4 + $0xb9] sm:$0x7f]  ;;  %v3219_v37 = vld [vmem:[#allocation4 + $0xb1] sm:$0xff] }
 0x239   : > { %v2756_v26 = vmax.f32 %v2720_v20, 0.0  ;;  %v2719_v27 = vld [vmem:[#allocation4 + $0xe0] sm:$0xff]  ;;  %2615 = vst.msk [vmem:[#allocation4 + $0x108] sm:$0xff] %vm531_vm0, %v2579_v58  ;;  %v3106_v58 = vld [vmem:[#allocation4 + $0x8] sm:$0x7f] }
 0x23a   : > { %v2755_v32 = vmax.f32 %v2719_v27, 0.0  ;;  %2614 = vst.msk [vmem:[#allocation4 + $0x100] sm:$0xff] %vm531_vm0, %v2578_v21  ;;  %v5616_v42 = vpop.f32.mrb[68].mxu0  ;;  %v2896_v44 = vld [vmem:[#allocation4 + $0xc8] sm:$0xff] }
 0x23b   : > { %2864 = vst.msk [vmem:[#allocation4 + $0xe8] sm:$0xff] %vm531_vm0, %v2756_v26  ;;  %v2581_v50 = vadd.f32 %v5616_v42, %v2186_v33  ;;  %3295 = vrot.lane.b32.xlu1 %v3210_v43, %s5866_s12  ;;  %v2537_v54 = vpop.f32.mrb[69].mxu0  ;;  %v6926_v6 = vld [vmem:[#allocation4 + $0xc0] sm:$0xff]  ;;  %v3222_v45 = vld [vmem:[#allocation4 + $0xc9] sm:$0x7f] }
 0x23c   : > { %2863 = vst.msk [vmem:[#allocation4 + $0xe0] sm:$0xff] %vm531_vm0, %v2755_v32  ;;  %v2722_v56 = vld [vmem:[#allocation4 + $0xf8] sm:$0xff]  ;;  %v2580_v57 = vadd.f32 %v2537_v54, %v2185_v53  ;;  %3293 = vrot.lane.b32.xlu0 %v3209_v55, %s5866_s12  ;;  %v3221_v46 = vld [vmem:[#allocation4 + $0xc1] sm:$0xff] }
 0x23d   : > { %v2758_v60 = vmax.f32 %v2722_v56, 0.0  ;;  %v2721_v61 = vld [vmem:[#allocation4 + $0xf0] sm:$0xff]  ;;  %2617 = vst.msk [vmem:[#allocation4 + $0x118] sm:$0xff] %vm531_vm0, %v2581_v50  ;;  %v3108_v56 = vld [vmem:[#allocation4 + $0x18] sm:$0x7f] }
 0x23e   : > { %v2757_v62 = vmax.f32 %v2721_v61, 0.0  ;;  %2870 = vst.msk [vmem:[#allocation4 + $0x118] sm:$0xff] %vm531_vm0, %v5863_v0  ;;  %2616 = vst.msk [vmem:[#allocation4 + $0x110] sm:$0xff] %vm531_vm0, %v2580_v57  ;;  %v2898_v47 = vld [vmem:[#allocation4 + $0xd8] sm:$0xff] }
 0x23f   : > { %2866 = vst.msk [vmem:[#allocation4 + $0xf8] sm:$0xff] %vm531_vm0, %v2758_v60  ;;  %2869 = vst.msk [vmem:[#allocation4 + $0x110] sm:$0xff] %vm531_vm0, %v5863_v0  ;;  %2973 = vrot.lane.b32.xlu1 %v2886_v1, %s5865_s11  ;;  %v6933_v52 = vld [vmem:[#allocation4 + $0xd0] sm:$0xff]  ;;  %v3224_v48 = vld [vmem:[#allocation4 + $0xd9] sm:$0x7f] }
 0x240   : > { %2865 = vst.msk [vmem:[#allocation4 + $0xf0] sm:$0xff] %vm531_vm0, %v2757_v62  ;;  %v2724_v3 = vld [vmem:[#allocation4 + $0x108] sm:$0xff]  ;;  %2971 = vrot.lane.b32.xlu0 %v6877_v2, %s5865_s11  ;;  %v3223_v49 = vld [vmem:[#allocation4 + $0xd1] sm:$0xff] }
 0x241   : > { %v2760_v7 = vmax.f32 %v2724_v3, 0.0  ;;  %v2723_v8 = vld [vmem:[#allocation4 + $0x100] sm:$0xff] }
 0x242   : > { %v2759_v10 = vmax.f32 %v2723_v8, 0.0  ;;  %v2900_v20 = vld [vmem:[#allocation4 + $0xe8] sm:$0xff] }
 0x243   : > { %2868 = vst.msk [vmem:[#allocation4 + $0x108] sm:$0xff] %vm531_vm0, %v2760_v7  ;;  %3299 = vrot.lane.b32.xlu1 %v3212_v14, %s5866_s12  ;;  %v6943_v21 = vld [vmem:[#allocation4 + $0xe0] sm:$0xff]  ;;  %v3226_v32 = vld [vmem:[#allocation4 + $0xe9] sm:$0x7f] }
 0x244   : > { %2867 = vst.msk [vmem:[#allocation4 + $0x100] sm:$0xff] %vm531_vm0, %v2759_v10  ;;  %3297 = vrot.lane.b32.xlu0 %v3211_v15, %s5866_s12  ;;  %v3225_v33 = vld [vmem:[#allocation4 + $0xe1] sm:$0xff] }
 0x245   : > { %v3110_v7 = vld [vmem:[#allocation4 + $0x28] sm:$0x7f]  ;;  %v2906_v10 = vld [vmem:[#allocation4 + $0x118] sm:$0xff] }
 0x246   : > { %v2902_v42 = vld [vmem:[#allocation4 + $0xf8] sm:$0xff]  ;;  %v6996_v15 = vld [vmem:[#allocation4 + $0x110] sm:$0xff] }
 0x247   : > { %2977 = vrot.lane.b32.xlu1 %v2888_v19, %s5865_s11  ;;  %v6958_v43 = vld [vmem:[#allocation4 + $0xf0] sm:$0xff]  ;;  %v3228_v55 = vld [vmem:[#allocation4 + $0xf9] sm:$0x7f] }
 0x248   : > { %2975 = vrot.lane.b32.xlu0 %v6895_v22, %s5865_s11  ;;  %v3227_v57 = vld [vmem:[#allocation4 + $0xf1] sm:$0xff] }
 0x24a   : > { %v2904_v62 = vld [vmem:[#allocation4 + $0x108] sm:$0xff] }
 0x24b   : > { %3303 = vrot.lane.b32.xlu1 %v3214_v23, %s5866_s12  ;;  %v6981_v1 = vld [vmem:[#allocation4 + $0x100] sm:$0xff]  ;;  %v3230_v4 = vld [vmem:[#allocation4 + $0x109] sm:$0x7f]  ;;  %v3231_v23 = vld [vmem:[#allocation4 + $0x111] sm:$0xff] }
 0x24c   : > { %3301 = vrot.lane.b32.xlu0 %v3213_v25, %s5866_s12  ;;  %v3229_v8 = vld [vmem:[#allocation4 + $0x101] sm:$0xff] }
 0x24f   : > { %2981 = vrot.lane.b32.xlu1 %v2890_v29, %s5865_s11  ;;  %v3112_v29 = vld [vmem:[#allocation4 + $0x38] sm:$0x7f] }
 0x250   : > { %2979 = vrot.lane.b32.xlu0 %v6905_v30, %s5865_s11 }
 0x253   : > { %3307 = vrot.lane.b32.xlu1 %v3216_v11, %s5866_s12 }
 0x254   : > { %3305 = vrot.lane.b32.xlu0 %v3215_v38, %s5866_s12 }
 0x257   : > { %2985 = vrot.lane.b32.xlu1 %v2892_v40, %s5865_s11 }
 0x258   : > { %2983 = vrot.lane.b32.xlu0 %v6912_v31, %s5865_s11 }
 0x25b   : > { %3311 = vrot.lane.b32.xlu1 %v3218_v34, %s5866_s12 }
 0x25c   : > { %3309 = vrot.lane.b32.xlu0 %v3217_v35, %s5866_s12 }
 0x25f   : > { %2989 = vrot.lane.b32.xlu1 %v2894_v36, %s5865_s11  ;;  %v3114_v36 = vld [vmem:[#allocation4 + $0x48] sm:$0x7f] }
 0x260   : > { %2987 = vrot.lane.b32.xlu0 %v6919_v39, %s5865_s11 }
 0x263   : > { %3315 = vrot.lane.b32.xlu1 %v3220_v41, %s5866_s12 }
 0x264   : > { %3313 = vrot.lane.b32.xlu0 %v3219_v37, %s5866_s12 }
 0x267   : > { %2993 = vrot.lane.b32.xlu1 %v2896_v44, %s5865_s11 }
 0x268   : > { %2991 = vrot.lane.b32.xlu0 %v6926_v6, %s5865_s11 }
 0x26b   : > { %3319 = vrot.lane.b32.xlu1 %v3222_v45, %s5866_s12 }
 0x26c   : > { %3317 = vrot.lane.b32.xlu0 %v3221_v46, %s5866_s12 }
 0x26f   : > { %2997 = vrot.lane.b32.xlu1 %v2898_v47, %s5865_s11  ;;  %v3116_v47 = vld [vmem:[#allocation4 + $0x58] sm:$0x7f] }
 0x270   : > { %2995 = vrot.lane.b32.xlu0 %v6933_v52, %s5865_s11 }
 0x273   : > { %3323 = vrot.lane.b32.xlu1 %v3224_v48, %s5866_s12 }
 0x274   : > { %3321 = vrot.lane.b32.xlu0 %v3223_v49, %s5866_s12  ;;  %v2946_v5 = vpop.permute.xlu1 %2945 }
 0x275   : > { %3052 = vst.msk [vmem:[#allocation3 + $0x8] sm:$0xff] %vm889_vm5, %v2946_v5  ;;  %v2944_v12 = vpop.permute.xlu0 %2943 }
 0x276   : > { %3143 = vst.msk [vmem:[#allocation3 + $0x9] sm:$0x7f] %vm3142_vm8, %v3106_v58 }
 0x277   : > { %3051 = vst.msk [vmem:[#allocation3] sm:$0xff] %vm889_vm5, %v2944_v12  ;;  %3001 = vrot.lane.b32.xlu1 %v2900_v20, %s5865_s11  ;;  %v3118_v20 = vld [vmem:[#allocation4 + $0x68] sm:$0x7f] }
 0x278   : > { %3179 = vst.msk [vmem:[#allocation3 + $0xf] sm:$0x1] %vm3178_vm9, %v5863_v0  ;;  %2999 = vrot.lane.b32.xlu0 %v6943_v21, %s5865_s11  ;;  %v3272_v26 = vpop.permute.xlu1 %3271 }
 0x279   : > { %3087 = vst.msk [vmem:[#allocation3] sm:$0x1] %vm457_vm1, %v5863_v0  ;;  %v3270_v27 = vpop.permute.xlu0 %3269 }
 0x27a   : > { %3141 = vst.msk [vmem:[#allocation3 + $0x1] sm:$0xff] %vm531_vm0, %v6735_v9 }
 0x27b   : > { %3379 = vst.msk [vmem:[#allocation3 + $0x8] sm:$0x7f] %vm3378_vm10, %v3272_v26  ;;  %3327 = vrot.lane.b32.xlu1 %v3226_v32, %s5866_s12 }
 0x27c   : > { %3377 = vst.msk [vmem:[#allocation3] sm:$0xff] %vm1130_vm6, %v3270_v27  ;;  %3325 = vrot.lane.b32.xlu0 %v3225_v33, %s5866_s12 }
 0x27f   : > { %3005 = vrot.lane.b32.xlu1 %v2902_v42, %s5865_s11 }
 0x280   : > { %3003 = vrot.lane.b32.xlu0 %v6958_v43, %s5865_s11 }
 0x281   : > { %v2950_v50 = vpop.permute.xlu1 %2949 }
 0x282   : > { %v3415_v9 = vld [vmem:[#allocation3 + $0x8] sm:$0xff]  ;;  %3054 = vst.msk [vmem:[#allocation3 + $0x18] sm:$0xff] %vm889_vm5, %v2950_v50  ;;  %v2948_v54 = vpop.permute.xlu0 %2947 }
 0x283   : > { %v3414_v53 = vld [vmem:[#allocation3] sm:$0xff]  ;;  %3053 = vst.msk [vmem:[#allocation3 + $0x10] sm:$0xff] %vm889_vm5, %v2948_v54  ;;  %3331 = vrot.lane.b32.xlu1 %v3228_v55, %s5866_s12 }
 0x284   : > { %5621 = vmatprep.mubr.msk.f32.mxu1 %vm1216_vm7, %v3414_v53  ;;  %3145 = vst.msk [vmem:[#allocation3 + $0x19] sm:$0x7f] %vm3142_vm8, %v3108_v56  ;;  %3329 = vrot.lane.b32.xlu0 %v3227_v57, %s5866_s12  ;;  %v3122_v57 = vld [vmem:[#allocation4 + $0x88] sm:$0x7f] }
 0x285   : > { %5622 = vmatmul.mubr.msk.f32.vlgmr.msra.gmra.mrb[38].mxu1 %vm1216_vm7, %v3415_v9  ;;  %3088 = vst.msk [vmem:[#allocation3 + $0x10] sm:$0x1] %vm457_vm1, %v5863_v0  ;;  %v3276_v60 = vpop.permute.xlu1 %3275  ;;  %v3120_v9 = vld [vmem:[#allocation4 + $0x78] sm:$0x7f] }
 0x286   : > { %3180 = vst.msk [vmem:[#allocation3 + $0x1f] sm:$0x1] %vm3178_vm9, %v5863_v0  ;;  %5802 = vmatpush3.bf16.msk.msra.mxu1 %vm6033_vm4, %v6892_v18  ;;  %v3274_v61 = vpop.permute.xlu0 %3273 }
 0x287   : > { %3144 = vst.msk [vmem:[#allocation3 + $0x11] sm:$0xff] %vm531_vm0, %v6759_v63  ;;  %3009 = vrot.lane.b32.xlu1 %v2904_v62, %s5865_s11 }
 0x288   : > { %3381 = vst.msk [vmem:[#allocation3 + $0x18] sm:$0x7f] %vm3378_vm10, %v3276_v60  ;;  %3007 = vrot.lane.b32.xlu0 %v6981_v1, %s5865_s11 }
 0x289   : > { %3380 = vst.msk [vmem:[#allocation3 + $0x10] sm:$0xff] %vm1130_vm6, %v3274_v61  ;;  %v2954_v3 = vpop.permute.xlu1 %2953 }
 0x28a   : > { %3056 = vst.msk [vmem:[#allocation3 + $0x28] sm:$0xff] %vm889_vm5, %v2954_v3  ;;  %v2952_v63 = vpop.permute.xlu0 %2951 }
 0x28b   : > { %3055 = vst.msk [vmem:[#allocation3 + $0x20] sm:$0xff] %vm889_vm5, %v2952_v63  ;;  %3335 = vrot.lane.b32.xlu1 %v3230_v4, %s5866_s12  ;;  %v3124_v4 = vld [vmem:[#allocation4 + $0x98] sm:$0x7f] }
 0x28c   : > { %3147 = vst.msk [vmem:[#allocation3 + $0x29] sm:$0x7f] %vm3142_vm8, %v3110_v7  ;;  %3333 = vrot.lane.b32.xlu0 %v3229_v8, %s5866_s12 }
 0x28d   : > { %3089 = vst.msk [vmem:[#allocation3 + $0x20] sm:$0x1] %vm457_vm1, %v5863_v0  ;;  %v3280_v14 = vpop.permute.xlu1 %3279 }
 0x28e   : > { %3181 = vst.msk [vmem:[#allocation3 + $0x2f] sm:$0x1] %vm3178_vm9, %v5863_v0  ;;  %v3278_v16 = vpop.permute.xlu0 %3277 }
 0x28f   : > { %3146 = vst.msk [vmem:[#allocation3 + $0x21] sm:$0xff] %vm531_vm0, %v6784_v59  ;;  %v7004_v18 = vld [vmem:[#allocation3 + $0x18] sm:$0xff]  ;;  %3013 = vrot.lane.b32.xlu1 %v2906_v10, %s5865_s11 }
 0x290   : > { %3383 = vst.msk [vmem:[#allocation3 + $0x28] sm:$0x7f] %vm3378_vm10, %v3280_v14  ;;  %v6999_v17 = vld [vmem:[#allocation3 + $0x10] sm:$0xff]  ;;  %3011 = vrot.lane.b32.xlu0 %v6996_v15, %s5865_s11  ;;  %v3232_v59 = vld [vmem:[#allocation4 + $0x119] sm:$0x7f] }
 0x291   : > { %3382 = vst.msk [vmem:[#allocation3 + $0x20] sm:$0xff] %vm1130_vm6, %v3278_v16  ;;  %5624 = vmatprep.mubr.msk.f32.mxu1 %vm1216_vm7, %v6999_v17  ;;  %v2958_v19 = vpop.permute.xlu1 %2957 }
 0x292   : > { %5625 = vmatmul.mubr.msk.f32.gmra.mrb[40].mxu1 %vm1216_vm7, %v7004_v18  ;;  %3058 = vst.msk [vmem:[#allocation3 + $0x38] sm:$0xff] %vm889_vm5, %v2958_v19  ;;  %v2956_v25 = vpop.permute.xlu0 %2955 }
 0x293   : > { %3057 = vst.msk [vmem:[#allocation3 + $0x30] sm:$0xff] %vm889_vm5, %v2956_v25  ;;  %3339 = vrot.lane.b32.xlu1 %v3232_v59, %s5866_s12  ;;  %v3126_v59 = vld [vmem:[#allocation4 + $0xa8] sm:$0x7f] }
 0x294   : > { %3149 = vst.msk [vmem:[#allocation3 + $0x39] sm:$0x7f] %vm3142_vm8, %v3112_v29  ;;  %3337 = vrot.lane.b32.xlu0 %v3231_v23, %s5866_s12 }
 0x295   : > { %3090 = vst.msk [vmem:[#allocation3 + $0x30] sm:$0x1] %vm457_vm1, %v5863_v0  ;;  %v3284_v11 = vpop.permute.xlu1 %3283 }
 0x296   : > { %3182 = vst.msk [vmem:[#allocation3 + $0x3f] sm:$0x1] %vm3178_vm9, %v5863_v0  ;;  %v3282_v38 = vpop.permute.xlu0 %3281 }
 0x297   : > { %3148 = vst.msk [vmem:[#allocation3 + $0x31] sm:$0xff] %vm531_vm0, %v6807_v24  ;;  %v7030_v34 = vld [vmem:[#allocation3 + $0x28] sm:$0xff] }
 0x298   : > { %3385 = vst.msk [vmem:[#allocation3 + $0x38] sm:$0x7f] %vm3378_vm10, %v3284_v11  ;;  %v7023_v40 = vld [vmem:[#allocation3 + $0x20] sm:$0xff] }
 0x299   : > { %3384 = vst.msk [vmem:[#allocation3 + $0x30] sm:$0xff] %vm1130_vm6, %v3282_v38  ;;  %5627 = vmatprep.mubr.msk.f32.mxu1 %vm1216_vm7, %v7023_v40  ;;  %5725 = vmatprep.mubr.msk.f32.mxu0 %vm1216_vm7, %v7023_v40  ;;  %v2962_v24 = vpop.permute.xlu1 %2961  ;;  %v3128_v38 = vld [vmem:[#allocation4 + $0xb8] sm:$0x7f] }
 0x29a   : > { %5628 = vmatmul.mubr.msk.f32.gmra.mrb[42].mxu1 %vm1216_vm7, %v7030_v34  ;;  %5726 = vmatmul.mubr.msk.f32.vlgmr.msra.gmra.mrb[70].mxu0 %vm1216_vm7, %v7030_v34  ;;  %3060 = vst.msk [vmem:[#allocation3 + $0x48] sm:$0xff] %vm889_vm5, %v2962_v24  ;;  %v2960_v35 = vpop.permute.xlu0 %2959 }
 0x29b   : > { %3059 = vst.msk [vmem:[#allocation3 + $0x40] sm:$0xff] %vm889_vm5, %v2960_v35 }
 0x29c   : > { %3151 = vst.msk [vmem:[#allocation3 + $0x49] sm:$0x7f] %vm3142_vm8, %v3114_v36 }
 0x29d   : > { %3091 = vst.msk [vmem:[#allocation3 + $0x40] sm:$0x1] %vm457_vm1, %v5863_v0  ;;  %v3288_v41 = vpop.permute.xlu1 %3287 }
 0x29e   : > { %3183 = vst.msk [vmem:[#allocation3 + $0x4f] sm:$0x1] %vm3178_vm9, %v5863_v0  ;;  %v3286_v37 = vpop.permute.xlu0 %3285 }
 0x29f   : > { %3150 = vst.msk [vmem:[#allocation3 + $0x41] sm:$0xff] %vm531_vm0, %v6826_v51  ;;  %v7053_v45 = vld [vmem:[#allocation3 + $0x38] sm:$0xff] }
 0x2a0   : > { %3387 = vst.msk [vmem:[#allocation3 + $0x48] sm:$0x7f] %vm3378_vm10, %v3288_v41  ;;  %v7046_v44 = vld [vmem:[#allocation3 + $0x30] sm:$0xff] }
 0x2a1   : > { %3386 = vst.msk [vmem:[#allocation3 + $0x40] sm:$0xff] %vm1130_vm6, %v3286_v37  ;;  %5630 = vmatprep.mubr.msk.f32.mxu1 %vm1216_vm7, %v7046_v44  ;;  %5728 = vmatprep.mubr.msk.f32.mxu0 %vm1216_vm7, %v7046_v44  ;;  %v2966_v51 = vpop.permute.xlu1 %2965 }
 0x2a2   : > { %5631 = vmatmul.mubr.msk.f32.gmra.mrb[44].mxu1 %vm1216_vm7, %v7053_v45  ;;  %5729 = vmatmul.mubr.msk.f32.gmra.mrb[72].mxu0 %vm1216_vm7, %v7053_v45  ;;  %3062 = vst.msk [vmem:[#allocation3 + $0x58] sm:$0xff] %vm889_vm5, %v2966_v51  ;;  %v2964_v46 = vpop.permute.xlu0 %2963  ;;  %v3130_v51 = vld [vmem:[#allocation4 + $0xc8] sm:$0x7f] }
 0x2a3   : > { %3061 = vst.msk [vmem:[#allocation3 + $0x50] sm:$0xff] %vm889_vm5, %v2964_v46 }
 0x2a4   : > { %3153 = vst.msk [vmem:[#allocation3 + $0x59] sm:$0x7f] %vm3142_vm8, %v3116_v47 }
 0x2a5   : > { %3092 = vst.msk [vmem:[#allocation3 + $0x50] sm:$0x1] %vm457_vm1, %v5863_v0  ;;  %v3292_v48 = vpop.permute.xlu1 %3291 }
 0x2a6   : > { %3184 = vst.msk [vmem:[#allocation3 + $0x5f] sm:$0x1] %vm3178_vm9, %v5863_v0  ;;  %v3290_v49 = vpop.permute.xlu0 %3289 }
 0x2a7   : > { %3152 = vst.msk [vmem:[#allocation3 + $0x51] sm:$0xff] %vm531_vm0, %v6843_v28  ;;  %v7076_v5 = vld [vmem:[#allocation3 + $0x48] sm:$0xff] }
 0x2a8   : > { %3389 = vst.msk [vmem:[#allocation3 + $0x58] sm:$0x7f] %vm3378_vm10, %v3292_v48  ;;  %v7069_v58 = vld [vmem:[#allocation3 + $0x40] sm:$0xff] }
 0x2a9   : > { %3388 = vst.msk [vmem:[#allocation3 + $0x50] sm:$0xff] %vm1130_vm6, %v3290_v49  ;;  %5633 = vmatprep.mubr.msk.f32.mxu1 %vm1216_vm7, %v7069_v58  ;;  %5731 = vmatprep.mubr.msk.f32.mxu0 %vm1216_vm7, %v7069_v58  ;;  %v2970_v28 = vpop.permute.xlu1 %2969 }
 0x2aa   : > { %5634 = vmatmul.mubr.msk.f32.gmra.mrb[46].mxu1 %vm1216_vm7, %v7076_v5  ;;  %5732 = vmatmul.mubr.msk.f32.gmra.mrb[74].mxu0 %vm1216_vm7, %v7076_v5  ;;  %3064 = vst.msk [vmem:[#allocation3 + $0x68] sm:$0xff] %vm889_vm5, %v2970_v28  ;;  %v2968_v12 = vpop.permute.xlu0 %2967 }
 0x2ab   : > { %3063 = vst.msk [vmem:[#allocation3 + $0x60] sm:$0xff] %vm889_vm5, %v2968_v12  ;;  %v3132_v12 = vld [vmem:[#allocation4 + $0xd8] sm:$0x7f] }
 0x2ac   : > { %3155 = vst.msk [vmem:[#allocation3 + $0x69] sm:$0x7f] %vm3142_vm8, %v3118_v20 }
 0x2ad   : > { %3093 = vst.msk [vmem:[#allocation3 + $0x60] sm:$0x1] %vm457_vm1, %v5863_v0  ;;  %v3296_v26 = vpop.permute.xlu1 %3295 }
 0x2ae   : > { %3185 = vst.msk [vmem:[#allocation3 + $0x6f] sm:$0x1] %vm3178_vm9, %v5863_v0  ;;  %v3294_v27 = vpop.permute.xlu0 %3293 }
 0x2af   : > { %3154 = vst.msk [vmem:[#allocation3 + $0x61] sm:$0xff] %vm531_vm0, %v6858_v13  ;;  %v7099_v33 = vld [vmem:[#allocation3 + $0x58] sm:$0xff] }
 0x2b0   : > { %3391 = vst.msk [vmem:[#allocation3 + $0x68] sm:$0x7f] %vm3378_vm10, %v3296_v26  ;;  %v7092_v32 = vld [vmem:[#allocation3 + $0x50] sm:$0xff] }
 0x2b1   : > { %3390 = vst.msk [vmem:[#allocation3 + $0x60] sm:$0xff] %vm1130_vm6, %v3294_v27  ;;  %5636 = vmatprep.mubr.msk.f32.mxu1 %vm1216_vm7, %v7092_v32  ;;  %5734 = vmatprep.mubr.msk.f32.mxu0 %vm1216_vm7, %v7092_v32  ;;  %v2974_v13 = vpop.permute.xlu1 %2973 }
 0x2b2   : > { %5637 = vmatmul.mubr.msk.f32.gmra.mrb[48].mxu1 %vm1216_vm7, %v7099_v33  ;;  %5735 = vmatmul.mubr.msk.f32.gmra.mrb[76].mxu0 %vm1216_vm7, %v7099_v33  ;;  %3066 = vst.msk [vmem:[#allocation3 + $0x78] sm:$0xff] %vm889_vm5, %v2974_v13  ;;  %v2972_v42 = vpop.permute.xlu0 %2971 }
 0x2b3   : > { %3065 = vst.msk [vmem:[#allocation3 + $0x70] sm:$0xff] %vm889_vm5, %v2972_v42 }
 0x2b4   : > { %3157 = vst.msk [vmem:[#allocation3 + $0x79] sm:$0x7f] %vm3142_vm8, %v3120_v9  ;;  %v3134_v9 = vld [vmem:[#allocation4 + $0xe8] sm:$0x7f] }
 0x2b5   : > { %3094 = vst.msk [vmem:[#allocation3 + $0x70] sm:$0x1] %vm457_vm1, %v5863_v0  ;;  %v3300_v50 = vpop.permute.xlu1 %3299 }
 0x2b6   : > { %3186 = vst.msk [vmem:[#allocation3 + $0x7f] sm:$0x1] %vm3178_vm9, %v5863_v0  ;;  %v3298_v53 = vpop.permute.xlu0 %3297 }
 0x2b7   : > { %3156 = vst.msk [vmem:[#allocation3 + $0x71] sm:$0xff] %vm531_vm0, %v6877_v2  ;;  %v7122_v55 = vld [vmem:[#allocation3 + $0x68] sm:$0xff] }
 0x2b8   : > { %3393 = vst.msk [vmem:[#allocation3 + $0x78] sm:$0x7f] %vm3378_vm10, %v3300_v50  ;;  %v7115_v54 = vld [vmem:[#allocation3 + $0x60] sm:$0xff] }
 0x2b9   : > { %3392 = vst.msk [vmem:[#allocation3 + $0x70] sm:$0xff] %vm1130_vm6, %v3298_v53  ;;  %5639 = vmatprep.mubr.msk.f32.mxu1 %vm1216_vm7, %v7115_v54  ;;  %5737 = vmatprep.mubr.msk.f32.mxu0 %vm1216_vm7, %v7115_v54  ;;  %v2978_v2 = vpop.permute.xlu1 %2977 }
 0x2ba   : > { %5640 = vmatmul.mubr.msk.f32.gmra.mrb[50].mxu1 %vm1216_vm7, %v7122_v55  ;;  %5738 = vmatmul.mubr.msk.f32.gmra.mrb[78].mxu0 %vm1216_vm7, %v7122_v55  ;;  %3068 = vst.msk [vmem:[#allocation3 + $0x88] sm:$0xff] %vm889_vm5, %v2978_v2  ;;  %v2976_v56 = vpop.permute.xlu0 %2975 }
 0x2bb   : > { %3067 = vst.msk [vmem:[#allocation3 + $0x80] sm:$0xff] %vm889_vm5, %v2976_v56 }
 0x2bc   : > { %3159 = vst.msk [vmem:[#allocation3 + $0x89] sm:$0x7f] %vm3142_vm8, %v3122_v57 }
 0x2bd   : > { %3095 = vst.msk [vmem:[#allocation3 + $0x80] sm:$0x1] %vm457_vm1, %v5863_v0  ;;  %v3304_v60 = vpop.permute.xlu1 %3303 }
 0x2be   : > { %3187 = vst.msk [vmem:[#allocation3 + $0x8f] sm:$0x1] %vm3178_vm9, %v5863_v0  ;;  %v3302_v61 = vpop.permute.xlu0 %3301 }
 0x2bf   : > { %3158 = vst.msk [vmem:[#allocation3 + $0x81] sm:$0xff] %vm531_vm0, %v6895_v22  ;;  %v7145_v3 = vld [vmem:[#allocation3 + $0x78] sm:$0xff] }
 0x2c0   : > { %3395 = vst.msk [vmem:[#allocation3 + $0x88] sm:$0x7f] %vm3378_vm10, %v3304_v60  ;;  %v7138_v62 = vld [vmem:[#allocation3 + $0x70] sm:$0xff]  ;;  %v3136_v60 = vld [vmem:[#allocation4 + $0xf8] sm:$0x7f] }
 0x2c1   : > { %3394 = vst.msk [vmem:[#allocation3 + $0x80] sm:$0xff] %vm1130_vm6, %v3302_v61  ;;  %5642 = vmatprep.mubr.msk.f32.mxu1 %vm1216_vm7, %v7138_v62  ;;  %5740 = vmatprep.mubr.msk.f32.mxu0 %vm1216_vm7, %v7138_v62  ;;  %v2982_v22 = vpop.permute.xlu1 %2981 }
 0x2c2   : > { %5643 = vmatmul.mubr.msk.f32.gmra.mrb[52].mxu1 %vm1216_vm7, %v7145_v3  ;;  %5741 = vmatmul.mubr.msk.f32.gmra.mrb[80].mxu0 %vm1216_vm7, %v7145_v3  ;;  %3070 = vst.msk [vmem:[#allocation3 + $0x98] sm:$0xff] %vm889_vm5, %v2982_v22  ;;  %v2980_v63 = vpop.permute.xlu0 %2979 }
 0x2c3   : > { %3069 = vst.msk [vmem:[#allocation3 + $0x90] sm:$0xff] %vm889_vm5, %v2980_v63 }
 0x2c4   : > { %3161 = vst.msk [vmem:[#allocation3 + $0x99] sm:$0x7f] %vm3142_vm8, %v3124_v4 }
 0x2c5   : > { %3096 = vst.msk [vmem:[#allocation3 + $0x90] sm:$0x1] %vm457_vm1, %v5863_v0  ;;  %v3308_v7 = vpop.permute.xlu1 %3307 }
 0x2c6   : > { %3188 = vst.msk [vmem:[#allocation3 + $0x9f] sm:$0x1] %vm3178_vm9, %v5863_v0  ;;  %v3306_v8 = vpop.permute.xlu0 %3305 }
 0x2c7   : > { %3160 = vst.msk [vmem:[#allocation3 + $0x91] sm:$0xff] %vm531_vm0, %v6905_v30  ;;  %v7168_v14 = vld [vmem:[#allocation3 + $0x88] sm:$0xff] }
 0x2c8   : > { %3397 = vst.msk [vmem:[#allocation3 + $0x98] sm:$0x7f] %vm3378_vm10, %v3308_v7  ;;  %v7161_v10 = vld [vmem:[#allocation3 + $0x80] sm:$0xff] }
 0x2c9   : > { %3396 = vst.msk [vmem:[#allocation3 + $0x90] sm:$0xff] %vm1130_vm6, %v3306_v8  ;;  %5645 = vmatprep.mubr.msk.f32.mxu1 %vm1216_vm7, %v7161_v10  ;;  %5743 = vmatprep.mubr.msk.f32.mxu0 %vm1216_vm7, %v7161_v10  ;;  %v2986_v30 = vpop.permute.xlu1 %2985  ;;  %v3138_v8 = vld [vmem:[#allocation4 + $0x108] sm:$0x7f] }
 0x2ca   : > { %5646 = vmatmul.mubr.msk.f32.gmra.mrb[54].mxu1 %vm1216_vm7, %v7168_v14  ;;  %5744 = vmatmul.mubr.msk.f32.gmra.mrb[82].mxu0 %vm1216_vm7, %v7168_v14  ;;  %3072 = vst.msk [vmem:[#allocation3 + $0xa8] sm:$0xff] %vm889_vm5, %v2986_v30  ;;  %v2984_v16 = vpop.permute.xlu0 %2983 }
 0x2cb   : > { %3071 = vst.msk [vmem:[#allocation3 + $0xa0] sm:$0xff] %vm889_vm5, %v2984_v16 }
 0x2cc   : > { %3163 = vst.msk [vmem:[#allocation3 + $0xa9] sm:$0x7f] %vm3142_vm8, %v3126_v59 }
 0x2cd   : > { %3097 = vst.msk [vmem:[#allocation3 + $0xa0] sm:$0x1] %vm457_vm1, %v5863_v0  ;;  %v3312_v19 = vpop.permute.xlu1 %3311 }
 0x2ce   : > { %3189 = vst.msk [vmem:[#allocation3 + $0xaf] sm:$0x1] %vm3178_vm9, %v5863_v0  ;;  %v3310_v23 = vpop.permute.xlu0 %3309 }
 0x2cf   : > { %3162 = vst.msk [vmem:[#allocation3 + $0xa1] sm:$0xff] %vm531_vm0, %v6912_v31  ;;  %v7191_v29 = vld [vmem:[#allocation3 + $0x98] sm:$0xff] }
 0x2d0   : > { %3399 = vst.msk [vmem:[#allocation3 + $0xa8] sm:$0x7f] %vm3378_vm10, %v3312_v19  ;;  %v7184_v25 = vld [vmem:[#allocation3 + $0x90] sm:$0xff] }
 0x2d1   : > { %3398 = vst.msk [vmem:[#allocation3 + $0xa0] sm:$0xff] %vm1130_vm6, %v3310_v23  ;;  %5648 = vmatprep.mubr.msk.f32.mxu1 %vm1216_vm7, %v7184_v25  ;;  %5746 = vmatprep.mubr.msk.f32.mxu0 %vm1216_vm7, %v7184_v25  ;;  %v2990_v31 = vpop.permute.xlu1 %2989  ;;  %v3140_v23 = vld [vmem:[#allocation4 + $0x118] sm:$0x7f] }
 0x2d2   : > { %5649 = vmatmul.mubr.msk.f32.gmra.mrb[56].mxu1 %vm1216_vm7, %v7191_v29  ;;  %5747 = vmatmul.mubr.msk.f32.gmra.mrb[84].mxu0 %vm1216_vm7, %v7191_v29  ;;  %3074 = vst.msk [vmem:[#allocation3 + $0xb8] sm:$0xff] %vm889_vm5, %v2990_v31  ;;  %v2988_v11 = vpop.permute.xlu0 %2987 }
 0x2d3   : > { %3073 = vst.msk [vmem:[#allocation3 + $0xb0] sm:$0xff] %vm889_vm5, %v2988_v11 }
 0x2d4   : > { %3165 = vst.msk [vmem:[#allocation3 + $0xb9] sm:$0x7f] %vm3142_vm8, %v3128_v38 }
 0x2d5   : > { %3098 = vst.msk [vmem:[#allocation3 + $0xb0] sm:$0x1] %vm457_vm1, %v5863_v0  ;;  %v3316_v24 = vpop.permute.xlu1 %3315 }
 0x2d6   : > { %3190 = vst.msk [vmem:[#allocation3 + $0xbf] sm:$0x1] %vm3178_vm9, %v5863_v0  ;;  %v3314_v35 = vpop.permute.xlu0 %3313 }
 0x2d7   : > { %3164 = vst.msk [vmem:[#allocation3 + $0xb1] sm:$0xff] %vm531_vm0, %v6919_v39  ;;  %v7214_v41 = vld [vmem:[#allocation3 + $0xa8] sm:$0xff] }
 0x2d8   : > { %3401 = vst.msk [vmem:[#allocation3 + $0xb8] sm:$0x7f] %vm3378_vm10, %v3316_v24  ;;  %v7207_v36 = vld [vmem:[#allocation3 + $0xa0] sm:$0xff] }
 0x2d9   : > { %3400 = vst.msk [vmem:[#allocation3 + $0xb0] sm:$0xff] %vm1130_vm6, %v3314_v35  ;;  %5651 = vmatprep.mubr.msk.f32.mxu1 %vm1216_vm7, %v7207_v36  ;;  %5749 = vmatprep.mubr.msk.f32.mxu0 %vm1216_vm7, %v7207_v36  ;;  %v2994_v39 = vpop.permute.xlu1 %2993 }
 0x2da   : > { %5652 = vmatmul.mubr.msk.f32.gmra.mrb[58].mxu1 %vm1216_vm7, %v7214_v41  ;;  %5750 = vmatmul.mubr.msk.f32.gmra.mrb[86].mxu0 %vm1216_vm7, %v7214_v41  ;;  %3076 = vst.msk [vmem:[#allocation3 + $0xc8] sm:$0xff] %vm889_vm5, %v2994_v39  ;;  %v2992_v37 = vpop.permute.xlu0 %2991 }
 0x2db   : > { %3075 = vst.msk [vmem:[#allocation3 + $0xc0] sm:$0xff] %vm889_vm5, %v2992_v37 }
 0x2dc   : > { %3167 = vst.msk [vmem:[#allocation3 + $0xc9] sm:$0x7f] %vm3142_vm8, %v3130_v51 }
 0x2dd   : > { %3099 = vst.msk [vmem:[#allocation3 + $0xc0] sm:$0x1] %vm457_vm1, %v5863_v0  ;;  %v3320_v46 = vpop.permute.xlu1 %3319 }
 0x2de   : > { %3191 = vst.msk [vmem:[#allocation3 + $0xcf] sm:$0x1] %vm3178_vm9, %v5863_v0  ;;  %v3318_v47 = vpop.permute.xlu0 %3317 }
 0x2df   : > { %3166 = vst.msk [vmem:[#allocation3 + $0xc1] sm:$0xff] %vm531_vm0, %v6926_v6  ;;  %v7237_v49 = vld [vmem:[#allocation3 + $0xb8] sm:$0xff] }
 0x2e0   : > { %3403 = vst.msk [vmem:[#allocation3 + $0xc8] sm:$0x7f] %vm3378_vm10, %v3320_v46  ;;  %v7230_v48 = vld [vmem:[#allocation3 + $0xb0] sm:$0xff] }
 0x2e1   : > { %3402 = vst.msk [vmem:[#allocation3 + $0xc0] sm:$0xff] %vm1130_vm6, %v3318_v47  ;;  %5654 = vmatprep.mubr.msk.f32.mxu1 %vm1216_vm7, %v7230_v48  ;;  %5752 = vmatprep.mubr.msk.f32.mxu0 %vm1216_vm7, %v7230_v48  ;;  %v2998_v6 = vpop.permute.xlu1 %2997 }
 0x2e2   : > { %5655 = vmatmul.mubr.msk.f32.gmra.mrb[60].mxu1 %vm1216_vm7, %v7237_v49  ;;  %5753 = vmatmul.mubr.msk.f32.gmra.mrb[88].mxu0 %vm1216_vm7, %v7237_v49  ;;  %3078 = vst.msk [vmem:[#allocation3 + $0xd8] sm:$0xff] %vm889_vm5, %v2998_v6  ;;  %v2996_v28 = vpop.permute.xlu0 %2995 }
 0x2e3   : > { %3077 = vst.msk [vmem:[#allocation3 + $0xd0] sm:$0xff] %vm889_vm5, %v2996_v28 }
 0x2e4   : > { %3169 = vst.msk [vmem:[#allocation3 + $0xd9] sm:$0x7f] %vm3142_vm8, %v3132_v12 }
 0x2e5   : > { %3100 = vst.msk [vmem:[#allocation3 + $0xd0] sm:$0x1] %vm457_vm1, %v5863_v0  ;;  %v3324_v20 = vpop.permute.xlu1 %3323 }
 0x2e6   : > { %3192 = vst.msk [vmem:[#allocation3 + $0xdf] sm:$0x1] %vm3178_vm9, %v5863_v0  ;;  %v3322_v26 = vpop.permute.xlu0 %3321 }
 0x2e7   : > { %3168 = vst.msk [vmem:[#allocation3 + $0xd1] sm:$0xff] %vm531_vm0, %v6933_v52  ;;  %v7260_v13 = vld [vmem:[#allocation3 + $0xc8] sm:$0xff] }
 0x2e8   : > { %3405 = vst.msk [vmem:[#allocation3 + $0xd8] sm:$0x7f] %vm3378_vm10, %v3324_v20  ;;  %v7253_v27 = vld [vmem:[#allocation3 + $0xc0] sm:$0xff] }
 0x2e9   : > { %3404 = vst.msk [vmem:[#allocation3 + $0xd0] sm:$0xff] %vm1130_vm6, %v3322_v26  ;;  %5657 = vmatprep.mubr.msk.f32.mxu1 %vm1216_vm7, %v7253_v27  ;;  %5755 = vmatprep.mubr.msk.f32.mxu0 %vm1216_vm7, %v7253_v27  ;;  %v3002_v52 = vpop.permute.xlu1 %3001 }
 0x2ea   : > { %5658 = vmatmul.mubr.msk.f32.gmra.mrb[62].mxu1 %vm1216_vm7, %v7260_v13  ;;  %5756 = vmatmul.mubr.msk.f32.gmra.mrb[90].mxu0 %vm1216_vm7, %v7260_v13  ;;  %3080 = vst.msk [vmem:[#allocation3 + $0xe8] sm:$0xff] %vm889_vm5, %v3002_v52  ;;  %v3000_v42 = vpop.permute.xlu0 %2999 }
 0x2eb   : > { %3079 = vst.msk [vmem:[#allocation3 + $0xe0] sm:$0xff] %vm889_vm5, %v3000_v42 }
 0x2ec   : > { %3171 = vst.msk [vmem:[#allocation3 + $0xe9] sm:$0x7f] %vm3142_vm8, %v3134_v9 }
 0x2ed   : > { %3101 = vst.msk [vmem:[#allocation3 + $0xe0] sm:$0x1] %vm457_vm1, %v5863_v0  ;;  %v3328_v50 = vpop.permute.xlu1 %3327 }
 0x2ee   : > { %3193 = vst.msk [vmem:[#allocation3 + $0xef] sm:$0x1] %vm3178_vm9, %v5863_v0  ;;  %v3326_v53 = vpop.permute.xlu0 %3325 }
 0x2ef   : > { %3170 = vst.msk [vmem:[#allocation3 + $0xe1] sm:$0xff] %vm531_vm0, %v6943_v21  ;;  %v7283_v56 = vld [vmem:[#allocation3 + $0xd8] sm:$0xff] }
 0x2f0   : > { %3407 = vst.msk [vmem:[#allocation3 + $0xe8] sm:$0x7f] %vm3378_vm10, %v3328_v50  ;;  %v7276_v2 = vld [vmem:[#allocation3 + $0xd0] sm:$0xff] }
 0x2f1   : > { %3406 = vst.msk [vmem:[#allocation3 + $0xe0] sm:$0xff] %vm1130_vm6, %v3326_v53  ;;  %5660 = vmatprep.mubr.msk.f32.mxu1 %vm1216_vm7, %v7276_v2  ;;  %5758 = vmatprep.mubr.msk.f32.mxu0 %vm1216_vm7, %v7276_v2  ;;  %v3006_v21 = vpop.permute.xlu1 %3005 }
 0x2f2   : > { %5661 = vmatmul.mubr.msk.f32.gmra.mrb[64].mxu1 %vm1216_vm7, %v7283_v56  ;;  %5759 = vmatmul.mubr.msk.f32.gmra.mrb[92].mxu0 %vm1216_vm7, %v7283_v56  ;;  %3082 = vst.msk [vmem:[#allocation3 + $0xf8] sm:$0xff] %vm889_vm5, %v3006_v21  ;;  %v3004_v57 = vpop.permute.xlu0 %3003 }
 0x2f3   : > { %3081 = vst.msk [vmem:[#allocation3 + $0xf0] sm:$0xff] %vm889_vm5, %v3004_v57 }
 0x2f4   : > { %3173 = vst.msk [vmem:[#allocation3 + $0xf9] sm:$0x7f] %vm3142_vm8, %v3136_v60 }
 0x2f5   : > { %3102 = vst.msk [vmem:[#allocation3 + $0xf0] sm:$0x1] %vm457_vm1, %v5863_v0  ;;  %v3332_v61 = vpop.permute.xlu1 %3331 }
 0x2f6   : > { %3194 = vst.msk [vmem:[#allocation3 + $0xff] sm:$0x1] %vm3178_vm9, %v5863_v0  ;;  %v3330_v22 = vpop.permute.xlu0 %3329 }
 0x2f7   : > { %3172 = vst.msk [vmem:[#allocation3 + $0xf1] sm:$0xff] %vm531_vm0, %v6958_v43  ;;  %v7306_v4 = vld [vmem:[#allocation3 + $0xe8] sm:$0xff] }
 0x2f8   : > { %3409 = vst.msk [vmem:[#allocation3 + $0xf8] sm:$0x7f] %vm3378_vm10, %v3332_v61  ;;  %v7299_v63 = vld [vmem:[#allocation3 + $0xe0] sm:$0xff] }
 0x2f9   : > { %3408 = vst.msk [vmem:[#allocation3 + $0xf0] sm:$0xff] %vm1130_vm6, %v3330_v22  ;;  %5663 = vmatprep.mubr.msk.f32.mxu1 %vm1216_vm7, %v7299_v63  ;;  %5761 = vmatprep.mubr.msk.f32.mxu0 %vm1216_vm7, %v7299_v63  ;;  %v3010_v43 = vpop.permute.xlu1 %3009 }
 0x2fa   : > { %5664 = vmatmul.mubr.msk.f32.gmra.mrb[66].mxu1 %vm1216_vm7, %v7306_v4  ;;  %5762 = vmatmul.mubr.msk.f32.gmra.mrb[94].mxu0 %vm1216_vm7, %v7306_v4  ;;  %3084 = vst.msk [vmem:[#allocation3 + $0x108] sm:$0xff] %vm889_vm5, %v3010_v43  ;;  %v3008_v7 = vpop.permute.xlu0 %3007 }
 0x2fb   : > { %3083 = vst.msk [vmem:[#allocation3 + $0x100] sm:$0xff] %vm889_vm5, %v3008_v7 }
 0x2fc   : > { %3175 = vst.msk [vmem:[#allocation3 + $0x109] sm:$0x7f] %vm3142_vm8, %v3138_v8 }
 0x2fd   : > { %3103 = vst.msk [vmem:[#allocation3 + $0x100] sm:$0x1] %vm457_vm1, %v5863_v0  ;;  %v3336_v30 = vpop.permute.xlu1 %3335 }
 0x2fe   : > { %3195 = vst.msk [vmem:[#allocation3 + $0x10f] sm:$0x1] %vm3178_vm9, %v5863_v0  ;;  %v3334_v16 = vpop.permute.xlu0 %3333 }
 0x2ff   : > { %3174 = vst.msk [vmem:[#allocation3 + $0x101] sm:$0xff] %vm531_vm0, %v6981_v1  ;;  %v3445_v19 = vld [vmem:[#allocation3 + $0xf8] sm:$0xff] }
 0x300   : > { %3411 = vst.msk [vmem:[#allocation3 + $0x108] sm:$0x7f] %vm3378_vm10, %v3336_v30  ;;  %v3444_v59 = vld [vmem:[#allocation3 + $0xf0] sm:$0xff] }
 0x301   : > { %3410 = vst.msk [vmem:[#allocation3 + $0x100] sm:$0xff] %vm1130_vm6, %v3334_v16  ;;  %5666 = vmatprep.mubr.msk.f32.mxu1 %vm1216_vm7, %v3444_v59  ;;  %5764 = vmatprep.mubr.msk.f32.mxu0 %vm1216_vm7, %v3444_v59  ;;  %v3014_v1 = vpop.permute.xlu1 %3013 }
 0x302   : > { %5667 = vmatmul.mubr.msk.f32.gmra.mrb[68].mxu1 %vm1216_vm7, %v3445_v19  ;;  %5765 = vmatmul.mubr.msk.f32.gmra.mrb[96].mxu0 %vm1216_vm7, %v3445_v19  ;;  %v3012_v31 = vpop.permute.xlu0 %3011  ;;  %3086 = vst.msk [vmem:[#allocation3 + $0x118] sm:$0xff] %vm889_vm5, %v3014_v1 }
 0x303   : > { %5673 = vmatprep.mubr.msk.f32.mxu1 %vm1216_vm7, %v6999_v17  ;;  %3085 = vst.msk [vmem:[#allocation3 + $0x110] sm:$0xff] %vm889_vm5, %v3012_v31 }
 0x304   : > { %3177 = vst.msk [vmem:[#allocation3 + $0x119] sm:$0x7f] %vm3142_vm8, %v3140_v23 }
 0x305   : > { %3104 = vst.msk [vmem:[#allocation3 + $0x110] sm:$0x1] %vm457_vm1, %v5863_v0  ;;  %v3340_v17 = vpop.permute.xlu1 %3339 }
 0x306   : > { %5674 = vmatmul.mubr.msk.f32.vlgmr.msra.gmra.mrb[70].mxu1 %vm1216_vm7, %v7004_v18  ;;  %3176 = vst.msk [vmem:[#allocation3 + $0x111] sm:$0xff] %vm531_vm0, %v6996_v15  ;;  %v3338_v38 = vpop.permute.xlu0 %3337 }
 0x307   : > { %3196 = vst.msk [vmem:[#allocation3 + $0x11f] sm:$0x1] %vm3178_vm9, %v5863_v0  ;;  %5676 = vmatprep.mubr.msk.f32.mxu1 %vm1216_vm7, %v7023_v40  ;;  %v4295_v18 = vld [vmem:[#allocation3 + $0x108] sm:$0xff]  ;;  %v7405_v40 = vld [vmem:[%s7749_s6] ss:$0 sm:$0xff] }
 0x308   : > { %v4294_v11 = vld [vmem:[#allocation3 + $0x100] sm:$0xff]  ;;  %3413 = vst.msk [vmem:[#allocation3 + $0x118] sm:$0x7f] %vm3378_vm10, %v3340_v17 }
 0x309   : > { %5767 = vmatprep.mubr.msk.f32.mxu0 %vm1216_vm7, %v4294_v11  ;;  %3412 = vst.msk [vmem:[#allocation3 + $0x110] sm:$0xff] %vm1130_vm6, %v3338_v38 }
 0x30a   : > { %5677 = vmatmul.mubr.msk.f32.gmra.mrb[72].mxu1 %vm1216_vm7, %v7030_v34  ;;  %5768 = vmatmul.mubr.msk.f32.gmra.mrb[98].mxu0 %vm1216_vm7, %v4295_v18 }
 0x30b   : > { %5679 = vmatprep.mubr.msk.f32.mxu1 %vm1216_vm7, %v7046_v44 }
 0x30e   : > { %5680 = vmatmul.mubr.msk.f32.gmra.mrb[74].mxu1 %vm1216_vm7, %v7053_v45 }
 0x30f   : > { %5682 = vmatprep.mubr.msk.f32.mxu1 %vm1216_vm7, %v7069_v58  ;;  %v4297_v0 = vld [vmem:[#allocation3 + $0x118] sm:$0xff] }
 0x310   : > { %v4296_v15 = vld [vmem:[#allocation3 + $0x110] sm:$0xff] }
 0x311   : > { %5770 = vmatprep.mubr.msk.f32.mxu0 %vm1216_vm7, %v4296_v15 }
 0x312   : > { %5683 = vmatmul.mubr.msk.f32.gmra.mrb[76].mxu1 %vm1216_vm7, %v7076_v5  ;;  %5771 = vmatmul.mubr.msk.f32.gmra.mrb[100].mxu0 %vm1216_vm7, %v4297_v0 }
 0x313   : > { %5685 = vmatprep.mubr.msk.f32.mxu1 %vm1216_vm7, %v7092_v32 }
 0x316   : > { %5686 = vmatmul.mubr.msk.f32.gmra.mrb[78].mxu1 %vm1216_vm7, %v7099_v33 }
 0x317   : > { %5688 = vmatprep.mubr.msk.f32.mxu1 %vm1216_vm7, %v7115_v54 }
 0x31a   : > { %5689 = vmatmul.mubr.msk.f32.gmra.mrb[80].mxu1 %vm1216_vm7, %v7122_v55 }
 0x31b   : > { %5691 = vmatprep.mubr.msk.f32.mxu1 %vm1216_vm7, %v7138_v62 }
 0x31e   : > { %5692 = vmatmul.mubr.msk.f32.gmra.mrb[82].mxu1 %vm1216_vm7, %v7145_v3 }
 0x31f   : > { %5694 = vmatprep.mubr.msk.f32.mxu1 %vm1216_vm7, %v7161_v10 }
 0x322   : > { %5695 = vmatmul.mubr.msk.f32.gmra.mrb[84].mxu1 %vm1216_vm7, %v7168_v14 }
 0x323   : > { %5697 = vmatprep.mubr.msk.f32.mxu1 %vm1216_vm7, %v7184_v25 }
 0x326   : > { %5698 = vmatmul.mubr.msk.f32.gmra.mrb[86].mxu1 %vm1216_vm7, %v7191_v29 }
 0x327   : > { %5700 = vmatprep.mubr.msk.f32.mxu1 %vm1216_vm7, %v7207_v36 }
 0x32a   : > { %5701 = vmatmul.mubr.msk.f32.gmra.mrb[88].mxu1 %vm1216_vm7, %v7214_v41 }
 0x32b   : > { %5703 = vmatprep.mubr.msk.f32.mxu1 %vm1216_vm7, %v7230_v48 }
 0x32e   : > { %5704 = vmatmul.mubr.msk.f32.gmra.mrb[90].mxu1 %vm1216_vm7, %v7237_v49 }
 0x32f   : > { %5706 = vmatprep.mubr.msk.f32.mxu1 %vm1216_vm7, %v7253_v27 }
 0x332   : > { %5707 = vmatmul.mubr.msk.f32.gmra.mrb[92].mxu1 %vm1216_vm7, %v7260_v13 }
 0x333   : > { %5709 = vmatprep.mubr.msk.f32.mxu1 %vm1216_vm7, %v7276_v2 }
 0x336   : > { %5710 = vmatmul.mubr.msk.f32.gmra.mrb[94].mxu1 %vm1216_vm7, %v7283_v56 }
 0x337   : > { %5712 = vmatprep.mubr.msk.f32.mxu1 %vm1216_vm7, %v7299_v63 }
 0x33a   : > { %5713 = vmatmul.mubr.msk.f32.gmra.mrb[96].mxu1 %vm1216_vm7, %v7306_v4 }
 0x33b   : > { %5715 = vmatprep.mubr.msk.f32.mxu1 %vm1216_vm7, %v3444_v59 }
 0x33e   : > { %5716 = vmatmul.mubr.msk.f32.gmra.mrb[98].mxu1 %vm1216_vm7, %v3445_v19 }
 0x33f   : > { %5718 = vmatprep.mubr.msk.f32.mxu1 %vm1216_vm7, %v4294_v11 }
 0x342   : > { %5719 = vmatmul.mubr.msk.f32.gmra.mrb[100].mxu1 %vm1216_vm7, %v4295_v18 }
 0x358   : > { %v5623_v34 = vpop.f32.mrb[38].mxu1 }
 0x359   : > { %v3626_v44 = vadd.f32 %v5623_v34, %v7405_v40  ;;  %v3620_v45 = vpop.f32.mrb[39].mxu1 }
 0x35a   : > { %v3621_v58 = vadd.f32 %v7405_v40, %v3620_v45 }
 0x35b   : > { %3780 = vst.msk [vmem:[#allocation4 + $0x8] sm:$0xff] %vm531_vm0, %v3626_v44 }
 0x35c   : > { %3779 = vst.msk [vmem:[#allocation4] sm:$0xff] %vm531_vm0, %v3621_v58 }
 0x365   : > { %v5626_v5 = vpop.f32.mrb[40].mxu1 }
 0x366   : > { %v3636_v32 = vadd.f32 %v5626_v5, %v7405_v40  ;;  %v3630_v33 = vpop.f32.mrb[41].mxu1 }
 0x367   : > { %v3631_v54 = vadd.f32 %v7405_v40, %v3630_v33 }
 0x368   : > { %3782 = vst.msk [vmem:[#allocation4 + $0x18] sm:$0xff] %vm531_vm0, %v3636_v32 }
 0x369   : > { %3781 = vst.msk [vmem:[#allocation4 + $0x10] sm:$0xff] %vm531_vm0, %v3631_v54 }
 0x36d   : > { %v5629_v55 = vpop.f32.mrb[42].mxu1  ;;  %v7415_v62 = vpop.f32.mrb[70].mxu0 }
 0x36e   : > { %v3646_v3 = vadd.f32 %v5629_v55, %v7405_v40  ;;  %v3640_v10 = vpop.f32.mrb[43].mxu1  ;;  %v7418_v14 = vpop.f32.mrb[71].mxu0 }
 0x36f   : > { %v3641_v25 = vadd.f32 %v7405_v40, %v3640_v10 }
 0x370   : > { %3784 = vst.msk [vmem:[#allocation4 + $0x28] sm:$0xff] %vm531_vm0, %v3646_v3 }
 0x371   : > { %3783 = vst.msk [vmem:[#allocation4 + $0x20] sm:$0xff] %vm531_vm0, %v3641_v25 }
 0x375   : > { %v5632_v29 = vpop.f32.mrb[44].mxu1  ;;  %v7423_v24 = vpop.f32.mrb[72].mxu0 }
 0x376   : > { %v3656_v35 = vadd.f32 %v5632_v29, %v7405_v40  ;;  %v3650_v36 = vpop.f32.mrb[45].mxu1  ;;  %v7426_v41 = vpop.f32.mrb[73].mxu0 }
 0x377   : > { %v3651_v39 = vadd.f32 %v7405_v40, %v3650_v36 }
 0x378   : > { %3786 = vst.msk [vmem:[#allocation4 + $0x38] sm:$0xff] %vm531_vm0, %v3656_v35 }
 0x379   : > { %3785 = vst.msk [vmem:[#allocation4 + $0x30] sm:$0xff] %vm531_vm0, %v3651_v39 }
 0x37d   : > { %v5635_v37 = vpop.f32.mrb[46].mxu1  ;;  %v7431_v51 = vpop.f32.mrb[74].mxu0 }
 0x37e   : > { %v3666_v46 = vadd.f32 %v5635_v37, %v7405_v40  ;;  %v3660_v47 = vpop.f32.mrb[47].mxu1  ;;  %v7434_v48 = vpop.f32.mrb[75].mxu0 }
 0x37f   : > { %v3661_v49 = vadd.f32 %v7405_v40, %v3660_v47 }
 0x380   : > { %3788 = vst.msk [vmem:[#allocation4 + $0x48] sm:$0xff] %vm531_vm0, %v3666_v46 }
 0x381   : > { %3787 = vst.msk [vmem:[#allocation4 + $0x40] sm:$0xff] %vm531_vm0, %v3661_v49 }
 0x385   : > { %v5638_v6 = vpop.f32.mrb[48].mxu1  ;;  %v7439_v28 = vpop.f32.mrb[76].mxu0 }
 0x386   : > { %v3676_v12 = vadd.f32 %v5638_v6, %v7405_v40  ;;  %v3670_v20 = vpop.f32.mrb[49].mxu1  ;;  %v7442_v26 = vpop.f32.mrb[77].mxu0 }
 0x387   : > { %v3671_v27 = vadd.f32 %v7405_v40, %v3670_v20 }
 0x388   : > { %3790 = vst.msk [vmem:[#allocation4 + $0x58] sm:$0xff] %vm531_vm0, %v3676_v12 }
 0x389   : > { %3789 = vst.msk [vmem:[#allocation4 + $0x50] sm:$0xff] %vm531_vm0, %v3671_v27 }
 0x38d   : > { %v5641_v13 = vpop.f32.mrb[50].mxu1  ;;  %v7447_v52 = vpop.f32.mrb[78].mxu0 }
 0x38e   : > { %v3686_v42 = vadd.f32 %v5641_v13, %v7405_v40  ;;  %v3680_v9 = vpop.f32.mrb[51].mxu1  ;;  %v7450_v50 = vpop.f32.mrb[79].mxu0 }
 0x38f   : > { %v3681_v53 = vadd.f32 %v7405_v40, %v3680_v9 }
 0x390   : > { %3792 = vst.msk [vmem:[#allocation4 + $0x68] sm:$0xff] %vm531_vm0, %v3686_v42 }
 0x391   : > { %3791 = vst.msk [vmem:[#allocation4 + $0x60] sm:$0xff] %vm531_vm0, %v3681_v53 }
 0x395   : > { %v5644_v2 = vpop.f32.mrb[52].mxu1  ;;  %v7455_v56 = vpop.f32.mrb[80].mxu0 }
 0x396   : > { %v3696_v21 = vadd.f32 %v5644_v2, %v7405_v40  ;;  %v3690_v57 = vpop.f32.mrb[53].mxu1  ;;  %v7458_v60 = vpop.f32.mrb[81].mxu0 }
 0x397   : > { %v3691_v61 = vadd.f32 %v7405_v40, %v3690_v57 }
 0x398   : > { %3794 = vst.msk [vmem:[#allocation4 + $0x78] sm:$0xff] %vm531_vm0, %v3696_v21  ;;  %v3844_v21 = vld [vmem:[#allocation4 + $0x8] sm:$0xff] }
 0x399   : > { %3793 = vst.msk [vmem:[#allocation4 + $0x70] sm:$0xff] %vm531_vm0, %v3691_v61 }
 0x39d   : > { %v5647_v22 = vpop.f32.mrb[54].mxu1  ;;  %v7463_v63 = vpop.f32.mrb[82].mxu0 }
 0x39e   : > { %v3706_v4 = vadd.f32 %v5647_v22, %v7405_v40  ;;  %v3700_v43 = vpop.f32.mrb[55].mxu1  ;;  %v7466_v7 = vpop.f32.mrb[83].mxu0  ;;  %v3843_v22 = vld [vmem:[#allocation4] sm:$0xff] }
 0x39f   : > { %v3701_v8 = vadd.f32 %v7405_v40, %v3700_v43 }
 0x3a0   : > { %3796 = vst.msk [vmem:[#allocation4 + $0x88] sm:$0xff] %vm531_vm0, %v3706_v4 }
 0x3a1   : > { %3795 = vst.msk [vmem:[#allocation4 + $0x80] sm:$0xff] %vm531_vm0, %v3701_v8  ;;  %v3846_v8 = vld [vmem:[#allocation4 + $0x18] sm:$0xff] }
 0x3a5   : > { %v5650_v30 = vpop.f32.mrb[56].mxu1  ;;  %v7471_v16 = vpop.f32.mrb[84].mxu0 }
 0x3a6   : > { %v3716_v59 = vadd.f32 %v5650_v30, %v7405_v40  ;;  %v3710_v19 = vpop.f32.mrb[57].mxu1  ;;  %v7474_v23 = vpop.f32.mrb[85].mxu0 }
 0x3a7   : > { %v3711_v1 = vadd.f32 %v7405_v40, %v3710_v19 }
 0x3a8   : > { %3798 = vst.msk [vmem:[#allocation4 + $0x98] sm:$0xff] %vm531_vm0, %v3716_v59 }
 0x3a9   : > { %3797 = vst.msk [vmem:[#allocation4 + $0x90] sm:$0xff] %vm531_vm0, %v3711_v1 }
 0x3ad   : > { %v5653_v31 = vpop.f32.mrb[58].mxu1  ;;  %v7479_v17 = vpop.f32.mrb[86].mxu0 }
 0x3ae   : > { %v3726_v11 = vadd.f32 %v5653_v31, %v7405_v40  ;;  %v3720_v38 = vpop.f32.mrb[59].mxu1  ;;  %v7482_v18 = vpop.f32.mrb[87].mxu0 }
 0x3af   : > { %v3721_v0 = vadd.f32 %v7405_v40, %v3720_v38  ;;  %v3848_v38 = vld [vmem:[#allocation4 + $0x28] sm:$0xff] }
 0x3b0   : > { %3800 = vst.msk [vmem:[#allocation4 + $0xa8] sm:$0xff] %vm531_vm0, %v3726_v11 }
 0x3b1   : > { %3799 = vst.msk [vmem:[#allocation4 + $0xa0] sm:$0xff] %vm531_vm0, %v3721_v0 }
 0x3b5   : > { %v5656_v15 = vpop.f32.mrb[60].mxu1  ;;  %v7487_v34 = vpop.f32.mrb[88].mxu0 }
 0x3b6   : > { %v3736_v44 = vadd.f32 %v5656_v15, %v7405_v40  ;;  %v3730_v45 = vpop.f32.mrb[61].mxu1  ;;  %v7490_v58 = vpop.f32.mrb[89].mxu0 }
 0x3b7   : > { %v3731_v5 = vadd.f32 %v7405_v40, %v3730_v45 }
 0x3b8   : > { %3802 = vst.msk [vmem:[#allocation4 + $0xb8] sm:$0xff] %vm531_vm0, %v3736_v44  ;;  %v3847_v44 = vld [vmem:[#allocation4 + $0x20] sm:$0xff] }
 0x3b9   : > { %3801 = vst.msk [vmem:[#allocation4 + $0xb0] sm:$0xff] %vm531_vm0, %v3731_v5 }
 0x3bd   : > { %v5659_v32 = vpop.f32.mrb[62].mxu1  ;;  %v7495_v33 = vpop.f32.mrb[90].mxu0 }
 0x3be   : > { %v3746_v54 = vadd.f32 %v5659_v32, %v7405_v40  ;;  %v3740_v55 = vpop.f32.mrb[63].mxu1  ;;  %v7498_v3 = vpop.f32.mrb[91].mxu0 }
 0x3bf   : > { %v3741_v10 = vadd.f32 %v7405_v40, %v3740_v55 }
 0x3c0   : > { %3804 = vst.msk [vmem:[#allocation4 + $0xc8] sm:$0xff] %vm531_vm0, %v3746_v54 }
 0x3c1   : > { %3803 = vst.msk [vmem:[#allocation4 + $0xc0] sm:$0xff] %vm531_vm0, %v3741_v10 }
 0x3c5   : > { %v5662_v25 = vpop.f32.mrb[64].mxu1  ;;  %v7503_v29 = vpop.f32.mrb[92].mxu0 }
 0x3c6   : > { %v3756_v35 = vadd.f32 %v5662_v25, %v7405_v40  ;;  %v3750_v36 = vpop.f32.mrb[65].mxu1  ;;  %v7506_v39 = vpop.f32.mrb[93].mxu0  ;;  %v3850_v25 = vld [vmem:[#allocation4 + $0x38] sm:$0xff] }
 0x3c7   : > { %v3751_v37 = vadd.f32 %v7405_v40, %v3750_v36 }
 0x3c8   : > { %3806 = vst.msk [vmem:[#allocation4 + $0xd8] sm:$0xff] %vm531_vm0, %v3756_v35 }
 0x3c9   : > { %3805 = vst.msk [vmem:[#allocation4 + $0xd0] sm:$0xff] %vm531_vm0, %v3751_v37 }
 0x3cd   : > { %v5665_v46 = vpop.f32.mrb[66].mxu1  ;;  %v7511_v47 = vpop.f32.mrb[94].mxu0 }
 0x3ce   : > { %v3766_v49 = vadd.f32 %v5665_v46, %v7405_v40  ;;  %v3760_v6 = vpop.f32.mrb[67].mxu1  ;;  %v7514_v12 = vpop.f32.mrb[95].mxu0  ;;  %v3849_v46 = vld [vmem:[#allocation4 + $0x30] sm:$0xff] }
 0x3cf   : > { %v3761_v20 = vadd.f32 %v7405_v40, %v3760_v6 }
 0x3d0   : > { %3808 = vst.msk [vmem:[#allocation4 + $0xe8] sm:$0xff] %vm531_vm0, %v3766_v49 }
 0x3d1   : > { %3807 = vst.msk [vmem:[#allocation4 + $0xe0] sm:$0xff] %vm531_vm0, %v3761_v20 }
 0x3d5   : > { %v5668_v27 = vpop.f32.mrb[68].mxu1  ;;  %v7519_v13 = vpop.f32.mrb[96].mxu0 }
 0x3d6   : > { %v3776_v42 = vadd.f32 %v5668_v27, %v7405_v40  ;;  %v3770_v9 = vpop.f32.mrb[69].mxu1  ;;  %v7522_v53 = vpop.f32.mrb[97].mxu0 }
 0x3d7   : > { %v3771_v2 = vadd.f32 %v7405_v40, %v3770_v9  ;;  %v3845_v40 = vld [vmem:[#allocation4 + $0x10] sm:$0xff]  ;;  %v3852_v9 = vld [vmem:[#allocation4 + $0x48] sm:$0xff] }
 0x3d8   : > { %3810 = vst.msk [vmem:[#allocation4 + $0xf8] sm:$0xff] %vm531_vm0, %v3776_v42 }
 0x3d9   : > { %3809 = vst.msk [vmem:[#allocation4 + $0xf0] sm:$0xff] %vm531_vm0, %v3771_v2  ;;  %v5675_v57 = vpop.f32.mrb[70].mxu1 }
 0x3da   : > { %v4203_v61 = vadd.f32 %v5675_v57, %v3844_v21  ;;  %v4043_v4 = vpop.f32.mrb[71].mxu1  ;;  %v3851_v57 = vld [vmem:[#allocation4 + $0x40] sm:$0xff] }
 0x3db   : > { %v4202_v43 = vadd.f32 %v4043_v4, %v3843_v22  ;;  %v4722_v22 = vld [vmem:[%s6047_s10 + $0x8] sm:$0xff] }
 0x3dc   : > { %4235 = vst.msk [vmem:[#allocation4 + $0x8] sm:$0xff] %vm531_vm0, %v4203_v61 }
 0x3dd   : > { %4234 = vst.msk [vmem:[#allocation4] sm:$0xff] %vm531_vm0, %v4202_v43  ;;  %v5678_v30 = vpop.f32.mrb[72].mxu1  ;;  %v7529_v59 = vpop.f32.mrb[98].mxu0  ;;  %v4721_v43 = vld [vmem:[%s6047_s10] sm:$0xff] }
 0x3de   : > { %v4205_v19 = vadd.f32 %v5678_v30, %v3846_v8  ;;  %v4053_v1 = vpop.f32.mrb[73].mxu1  ;;  %v7531_v31 = vpop.f32.mrb[99].mxu0 }
 0x3df   : > { %v4204_v11 = vadd.f32 %v4053_v1, %v3845_v40  ;;  %v3854_v40 = vld [vmem:[#allocation4 + $0x58] sm:$0xff] }
 0x3e0   : > { %4237 = vst.msk [vmem:[#allocation4 + $0x18] sm:$0xff] %vm531_vm0, %v4205_v19 }
 0x3e1   : > { %4236 = vst.msk [vmem:[#allocation4 + $0x10] sm:$0xff] %vm531_vm0, %v4204_v11  ;;  %v5681_v0 = vpop.f32.mrb[74].mxu1 }
 0x3e2   : > { %v4207_v15 = vadd.f32 %v5681_v0, %v3848_v38  ;;  %v4063_v45 = vpop.f32.mrb[75].mxu1  ;;  %v3853_v0 = vld [vmem:[#allocation4 + $0x50] sm:$0xff] }
 0x3e3   : > { %v4299_v5 = vld [vmem:[#allocation4 + $0x8] sm:$0xff]  ;;  %v4206_v32 = vadd.f32 %v4063_v45, %v3847_v44  ;;  %v4724_v45 = vld [vmem:[%s6047_s10 + $0x18] sm:$0xff] }
 0x3e4   : > { %v4658_v54 = vadd.f32 %v7415_v62, %v4299_v5  ;;  %v4298_v55 = vld [vmem:[#allocation4] sm:$0xff]  ;;  %4239 = vst.msk [vmem:[#allocation4 + $0x28] sm:$0xff] %vm531_vm0, %v4207_v15 }
 0x3e5   : > { %v4657_v10 = vadd.f32 %v7418_v14, %v4298_v55  ;;  %4238 = vst.msk [vmem:[#allocation4 + $0x20] sm:$0xff] %vm531_vm0, %v4206_v32  ;;  %v5684_v35 = vpop.f32.mrb[76].mxu1  ;;  %v7539_v36 = vpop.f32.mrb[100].mxu0 }
 0x3e6   : > { %4690 = vst.msk [vmem:[#allocation4 + $0x8] sm:$0xff] %vm531_vm0, %v4658_v54  ;;  %v4209_v37 = vadd.f32 %v5684_v35, %v3850_v25  ;;  %v4073_v49 = vpop.f32.mrb[77].mxu1  ;;  %v7542_v6 = vpop.f32.mrb[101].mxu0  ;;  %v3856_v35 = vld [vmem:[#allocation4 + $0x68] sm:$0xff] }
 0x3e7   : > { %4689 = vst.msk [vmem:[#allocation4] sm:$0xff] %vm531_vm0, %v4657_v10  ;;  %v4301_v62 = vld [vmem:[#allocation4 + $0x18] sm:$0xff]  ;;  %v4208_v20 = vadd.f32 %v4073_v49, %v3849_v46 }
 0x3e8   : > { %v4660_v14 = vadd.f32 %v7423_v24, %v4301_v62  ;;  %v4300_v27 = vld [vmem:[#allocation4 + $0x10] sm:$0xff]  ;;  %4241 = vst.msk [vmem:[#allocation4 + $0x38] sm:$0xff] %vm531_vm0, %v4209_v37  ;;  %v3855_v62 = vld [vmem:[#allocation4 + $0x60] sm:$0xff] }
 0x3e9   : > { %v4659_v42 = vadd.f32 %v7426_v41, %v4300_v27  ;;  %4240 = vst.msk [vmem:[#allocation4 + $0x30] sm:$0xff] %vm531_vm0, %v4208_v20  ;;  %v5687_v2 = vpop.f32.mrb[78].mxu1  ;;  %v4726_v27 = vld [vmem:[%s6047_s10 + $0x28] sm:$0xff] }
 0x3ea   : > { %4692 = vst.msk [vmem:[#allocation4 + $0x18] sm:$0xff] %vm531_vm0, %v4660_v14  ;;  %v4211_v21 = vadd.f32 %v5687_v2, %v3852_v9  ;;  %v4083_v61 = vpop.f32.mrb[79].mxu1 }
 0x3eb   : > { %4691 = vst.msk [vmem:[#allocation4 + $0x10] sm:$0xff] %vm531_vm0, %v4659_v42  ;;  %v4303_v4 = vld [vmem:[#allocation4 + $0x28] sm:$0xff]  ;;  %v4210_v24 = vadd.f32 %v4083_v61, %v3851_v57 }
 0x3ec   : > { %v4662_v8 = vadd.f32 %v7431_v51, %v4303_v4  ;;  %v4302_v41 = vld [vmem:[#allocation4 + $0x20] sm:$0xff]  ;;  %4243 = vst.msk [vmem:[#allocation4 + $0x48] sm:$0xff] %vm531_vm0, %v4211_v21 }
 0x3ed   : > { %v4754_v30 = vld [vmem:[#allocation4 + $0x8] sm:$0xff]  ;;  %v4661_v19 = vadd.f32 %v7434_v48, %v4302_v41  ;;  %4242 = vst.msk [vmem:[#allocation4 + $0x40] sm:$0xff] %vm531_vm0, %v4210_v24  ;;  %v5690_v1 = vpop.f32.mrb[80].mxu1  ;;  %v4723_v48 = vld [vmem:[%s6047_s10 + $0x10] sm:$0xff] }
 0x3ee   : > { %v4786_v51 = vadd.f32 %v4754_v30, %v4722_v22  ;;  %v4753_v11 = vld [vmem:[#allocation4] sm:$0xff]  ;;  %4694 = vst.msk [vmem:[#allocation4 + $0x28] sm:$0xff] %vm531_vm0, %v4662_v8  ;;  %v4213_v38 = vadd.f32 %v5690_v1, %v3854_v40  ;;  %v4093_v15 = vpop.f32.mrb[81].mxu1  ;;  %v3858_v22 = vld [vmem:[#allocation4 + $0x78] sm:$0xff]  ;;  %v3857_v8 = vld [vmem:[#allocation4 + $0x70] sm:$0xff] }
 0x3ef   : > { %v4785_v44 = vadd.f32 %v4753_v11, %v4721_v43  ;;  %4693 = vst.msk [vmem:[#allocation4 + $0x20] sm:$0xff] %vm531_vm0, %v4661_v19  ;;  %v4305_v5 = vld [vmem:[#allocation4 + $0x38] sm:$0xff]  ;;  %v4212_v32 = vadd.f32 %v4093_v15, %v3853_v0  ;;  %v3860_v15 = vld [vmem:[#allocation4 + $0x88] sm:$0xff] }
 0x3f0   : > { %4818 = vst.msk [vmem:[%s7560_s20 + $0x8] sm:$0xff] %vm531_vm0, %v4786_v51  ;;  %v4664_v54 = vadd.f32 %v7439_v28, %v4305_v5  ;;  %v4304_v55 = vld [vmem:[#allocation4 + $0x30] sm:$0xff]  ;;  %4245 = vst.msk [vmem:[#allocation4 + $0x58] sm:$0xff] %vm531_vm0, %v4213_v38  ;;  %v4728_v19 = vld [vmem:[%s6047_s10 + $0x38] sm:$0xff] }
 0x3f1   : > { %4817 = vst.msk [vmem:[%s7560_s20] sm:$0xff] %vm531_vm0, %v4785_v44  ;;  %v4756_v10 = vld [vmem:[#allocation4 + $0x18] sm:$0xff]  ;;  %v4663_v25 = vadd.f32 %v7442_v26, %v4304_v55  ;;  %4244 = vst.msk [vmem:[#allocation4 + $0x50] sm:$0xff] %vm531_vm0, %v4212_v32  ;;  %v5693_v37 = vpop.f32.mrb[82].mxu1  ;;  %v4725_v26 = vld [vmem:[%s6047_s10 + $0x20] sm:$0xff] }
 0x3f2   : > { %v4788_v46 = vadd.f32 %v4756_v10, %v4724_v45  ;;  %v4755_v49 = vld [vmem:[#allocation4 + $0x10] sm:$0xff]  ;;  %4696 = vst.msk [vmem:[#allocation4 + $0x38] sm:$0xff] %vm531_vm0, %v4664_v54  ;;  %v4215_v28 = vadd.f32 %v5693_v37, %v3856_v35  ;;  %v4103_v20 = vpop.f32.mrb[83].mxu1  ;;  %v3859_v32 = vld [vmem:[#allocation4 + $0x80] sm:$0xff]  ;;  %v4730_v55 = vld [vmem:[%s6047_s10 + $0x48] sm:$0xff] }
 0x3f3   : > { %v4787_v14 = vadd.f32 %v4755_v49, %v4723_v48  ;;  %4695 = vst.msk [vmem:[#allocation4 + $0x30] sm:$0xff] %vm531_vm0, %v4663_v25  ;;  %v4307_v42 = vld [vmem:[#allocation4 + $0x48] sm:$0xff]  ;;  %v4214_v9 = vadd.f32 %v4103_v20, %v3855_v62 }
 0x3f4   : > { %4820 = vst.msk [vmem:[%s7560_s20 + $0x18] sm:$0xff] %vm531_vm0, %v4788_v46  ;;  %v4666_v2 = vadd.f32 %v7447_v52, %v4307_v42  ;;  %v4306_v21 = vld [vmem:[#allocation4 + $0x40] sm:$0xff]  ;;  %4247 = vst.msk [vmem:[#allocation4 + $0x68] sm:$0xff] %vm531_vm0, %v4215_v28  ;;  %v3862_v28 = vld [vmem:[#allocation4 + $0x98] sm:$0xff] }
 0x3f5   : > { %4819 = vst.msk [vmem:[%s7560_s20 + $0x10] sm:$0xff] %vm531_vm0, %v4787_v14  ;;  %v4758_v57 = vld [vmem:[#allocation4 + $0x28] sm:$0xff]  ;;  %v4665_v61 = vadd.f32 %v7450_v50, %v4306_v21  ;;  %4246 = vst.msk [vmem:[#allocation4 + $0x60] sm:$0xff] %vm531_vm0, %v4214_v9  ;;  %v5696_v4 = vpop.f32.mrb[84].mxu1  ;;  %v4727_v50 = vld [vmem:[%s6047_s10 + $0x30] sm:$0xff] }
 0x3f6   : > { %v4790_v24 = vadd.f32 %v4758_v57, %v4726_v27  ;;  %v4757_v43 = vld [vmem:[#allocation4 + $0x20] sm:$0xff]  ;;  %4698 = vst.msk [vmem:[#allocation4 + $0x48] sm:$0xff] %vm531_vm0, %v4666_v2  ;;  %v4217_v52 = vadd.f32 %v5696_v4, %v3858_v22  ;;  %v4113_v41 = vpop.f32.mrb[85].mxu1  ;;  %v3861_v27 = vld [vmem:[#allocation4 + $0x90] sm:$0xff] }
 0x3f7   : > { %v4789_v30 = vadd.f32 %v4757_v43, %v4725_v26  ;;  %4697 = vst.msk [vmem:[#allocation4 + $0x40] sm:$0xff] %vm531_vm0, %v4665_v61  ;;  %v4309_v40 = vld [vmem:[#allocation4 + $0x58] sm:$0xff]  ;;  %v4216_v1 = vadd.f32 %v4113_v41, %v3857_v8  ;;  %v3863_v41 = vld [vmem:[#allocation4 + $0xa0] sm:$0xff] }
 0x3f8   : > { %4822 = vst.msk [vmem:[%s7560_s20 + $0x28] sm:$0xff] %vm531_vm0, %v4790_v24  ;;  %v4668_v51 = vadd.f32 %v7455_v56, %v4309_v40  ;;  %v4308_v11 = vld [vmem:[#allocation4 + $0x50] sm:$0xff]  ;;  %4249 = vst.msk [vmem:[#allocation4 + $0x78] sm:$0xff] %vm531_vm0, %v4217_v52  ;;  %v4732_v26 = vld [vmem:[%s6047_s10 + $0x58] sm:$0xff] }
 0x3f9   : > { %4821 = vst.msk [vmem:[%s7560_s20 + $0x20] sm:$0xff] %vm531_vm0, %v4789_v30  ;;  %v4760_v38 = vld [vmem:[#allocation4 + $0x38] sm:$0xff]  ;;  %v4667_v0 = vadd.f32 %v7458_v60, %v4308_v11  ;;  %4248 = vst.msk [vmem:[#allocation4 + $0x70] sm:$0xff] %vm531_vm0, %v4216_v1  ;;  %v5699_v44 = vpop.f32.mrb[86].mxu1  ;;  %v4729_v60 = vld [vmem:[%s6047_s10 + $0x40] sm:$0xff] }
 0x3fa   : > { %v4792_v45 = vadd.f32 %v4760_v38, %v4728_v19  ;;  %v4759_v5 = vld [vmem:[#allocation4 + $0x30] sm:$0xff]  ;;  %4700 = vst.msk [vmem:[#allocation4 + $0x58] sm:$0xff] %vm531_vm0, %v4668_v51  ;;  %v4219_v56 = vadd.f32 %v5699_v44, %v3860_v15  ;;  %v4123_v48 = vpop.f32.mrb[87].mxu1  ;;  %v3864_v24 = vld [vmem:[#allocation4 + $0xa8] sm:$0xff]  ;;  %v3866_v15 = vld [vmem:[#allocation4 + $0xb8] sm:$0xff] }
 0x3fb   : > { %v4791_v54 = vadd.f32 %v4759_v5, %v4727_v50  ;;  %4699 = vst.msk [vmem:[#allocation4 + $0x50] sm:$0xff] %vm531_vm0, %v4667_v0  ;;  %v4311_v10 = vld [vmem:[#allocation4 + $0x68] sm:$0xff]  ;;  %v4218_v25 = vadd.f32 %v4123_v48, %v3859_v32 }
 0x3fc   : > { %4824 = vst.msk [vmem:[%s7560_s20 + $0x38] sm:$0xff] %vm531_vm0, %v4792_v45  ;;  %v4670_v35 = vadd.f32 %v7463_v63, %v4311_v10  ;;  %v4310_v37 = vld [vmem:[#allocation4 + $0x60] sm:$0xff]  ;;  %4251 = vst.msk [vmem:[#allocation4 + $0x88] sm:$0xff] %vm531_vm0, %v4219_v56  ;;  %v4734_v40 = vld [vmem:[%s6047_s10 + $0x68] sm:$0xff] }
 0x3fd   : > { %4823 = vst.msk [vmem:[%s7560_s20 + $0x30] sm:$0xff] %vm531_vm0, %v4791_v54  ;;  %v4762_v46 = vld [vmem:[#allocation4 + $0x48] sm:$0xff]  ;;  %v4669_v49 = vadd.f32 %v7466_v7, %v4310_v37  ;;  %4250 = vst.msk [vmem:[#allocation4 + $0x80] sm:$0xff] %vm531_vm0, %v4218_v25  ;;  %v5702_v62 = vpop.f32.mrb[88].mxu1  ;;  %v4731_v7 = vld [vmem:[%s6047_s10 + $0x50] sm:$0xff] }
 0x3fe   : > { %v4794_v20 = vadd.f32 %v4762_v46, %v4730_v55  ;;  %v4761_v14 = vld [vmem:[#allocation4 + $0x40] sm:$0xff]  ;;  %4702 = vst.msk [vmem:[#allocation4 + $0x68] sm:$0xff] %vm531_vm0, %v4670_v35  ;;  %v4221_v63 = vadd.f32 %v5702_v62, %v3862_v28  ;;  %v4133_v42 = vpop.f32.mrb[89].mxu1  ;;  %v3865_v56 = vld [vmem:[#allocation4 + $0xb0] sm:$0xff]  ;;  %v4736_v54 = vld [vmem:[%s6047_s10 + $0x78] sm:$0xff] }
 0x3ff   : > { %v4793_v9 = vadd.f32 %v4761_v14, %v4729_v60  ;;  %4701 = vst.msk [vmem:[#allocation4 + $0x60] sm:$0xff] %vm531_vm0, %v4669_v49  ;;  %v4313_v2 = vld [vmem:[#allocation4 + $0x78] sm:$0xff]  ;;  %v4220_v21 = vadd.f32 %v4133_v42, %v3861_v27  ;;  %v3868_v46 = vld [vmem:[#allocation4 + $0xc8] sm:$0xff] }
 0x400   : > { %4826 = vst.msk [vmem:[%s7560_s20 + $0x48] sm:$0xff] %vm531_vm0, %v4794_v20  ;;  %v4672_v57 = vadd.f32 %v7471_v16, %v4313_v2  ;;  %v4312_v61 = vld [vmem:[#allocation4 + $0x70] sm:$0xff]  ;;  %4253 = vst.msk [vmem:[#allocation4 + $0x98] sm:$0xff] %vm531_vm0, %v4221_v63  ;;  %v3867_v20 = vld [vmem:[#allocation4 + $0xc0] sm:$0xff] }
 0x401   : > { %4825 = vst.msk [vmem:[%s7560_s20 + $0x40] sm:$0xff] %vm531_vm0, %v4793_v9  ;;  %v4764_v22 = vld [vmem:[#allocation4 + $0x58] sm:$0xff]  ;;  %v4671_v4 = vadd.f32 %v7474_v23, %v4312_v61  ;;  %4252 = vst.msk [vmem:[#allocation4 + $0x90] sm:$0xff] %vm531_vm0, %v4220_v21  ;;  %v5705_v43 = vpop.f32.mrb[90].mxu1  ;;  %v4733_v23 = vld [vmem:[%s6047_s10 + $0x60] sm:$0xff] }
 0x402   : > { %v4796_v52 = vadd.f32 %v4764_v22, %v4732_v26  ;;  %v4763_v8 = vld [vmem:[#allocation4 + $0x50] sm:$0xff]  ;;  %4704 = vst.msk [vmem:[#allocation4 + $0x78] sm:$0xff] %vm531_vm0, %v4672_v57  ;;  %v4223_v16 = vadd.f32 %v5705_v43, %v3864_v24  ;;  %v4143_v30 = vpop.f32.mrb[91].mxu1  ;;  %v4738_v27 = vld [vmem:[%s6047_s10 + $0x88] sm:$0xff]  ;;  %v3870_v57 = vld [vmem:[#allocation4 + $0xd8] sm:$0xff] }
 0x403   : > { %v4795_v19 = vadd.f32 %v4763_v8, %v4731_v7  ;;  %4703 = vst.msk [vmem:[#allocation4 + $0x70] sm:$0xff] %vm531_vm0, %v4671_v4  ;;  %v4315_v1 = vld [vmem:[#allocation4 + $0x88] sm:$0xff]  ;;  %v4222_v50 = vadd.f32 %v4143_v30, %v3863_v41  ;;  %v3869_v24 = vld [vmem:[#allocation4 + $0xd0] sm:$0xff]  ;;  %v4740_v8 = vld [vmem:[%s6047_s10 + $0x98] sm:$0xff] }
 0x404   : > { %4828 = vst.msk [vmem:[%s7560_s20 + $0x58] sm:$0xff] %vm531_vm0, %v4796_v52  ;;  %v4674_v51 = vadd.f32 %v7479_v17, %v4315_v1  ;;  %v4314_v11 = vld [vmem:[#allocation4 + $0x80] sm:$0xff]  ;;  %4255 = vst.msk [vmem:[#allocation4 + $0xa8] sm:$0xff] %vm531_vm0, %v4223_v16 }
 0x405   : > { %4827 = vst.msk [vmem:[%s7560_s20 + $0x50] sm:$0xff] %vm531_vm0, %v4795_v19  ;;  %v4766_v38 = vld [vmem:[#allocation4 + $0x68] sm:$0xff]  ;;  %v4673_v0 = vadd.f32 %v7482_v18, %v4314_v11  ;;  %4254 = vst.msk [vmem:[#allocation4 + $0xa0] sm:$0xff] %vm531_vm0, %v4222_v50  ;;  %v5708_v44 = vpop.f32.mrb[92].mxu1  ;;  %v4735_v18 = vld [vmem:[%s6047_s10 + $0x70] sm:$0xff] }
 0x406   : > { %v4798_v45 = vadd.f32 %v4766_v38, %v4734_v40  ;;  %v4765_v5 = vld [vmem:[#allocation4 + $0x60] sm:$0xff]  ;;  %4706 = vst.msk [vmem:[#allocation4 + $0x88] sm:$0xff] %vm531_vm0, %v4674_v51  ;;  %v4225_v17 = vadd.f32 %v5708_v44, %v3866_v15  ;;  %v4153_v32 = vpop.f32.mrb[93].mxu1  ;;  %v3872_v50 = vld [vmem:[#allocation4 + $0xe8] sm:$0xff] }
 0x407   : > { %v4797_v48 = vadd.f32 %v4765_v5, %v4733_v23  ;;  %4705 = vst.msk [vmem:[#allocation4 + $0x80] sm:$0xff] %vm531_vm0, %v4673_v0  ;;  %v4317_v55 = vld [vmem:[#allocation4 + $0x98] sm:$0xff]  ;;  %v4224_v10 = vadd.f32 %v4153_v32, %v3865_v56  ;;  %v3871_v38 = vld [vmem:[#allocation4 + $0xe0] sm:$0xff]  ;;  %v4742_v44 = vld [vmem:[%s6047_s10 + $0xa8] sm:$0xff] }
 0x408   : > { %4830 = vst.msk [vmem:[%s7560_s20 + $0x68] sm:$0xff] %vm531_vm0, %v4798_v45  ;;  %v4676_v25 = vadd.f32 %v7487_v34, %v4317_v55  ;;  %v4316_v60 = vld [vmem:[#allocation4 + $0x90] sm:$0xff]  ;;  %4257 = vst.msk [vmem:[#allocation4 + $0xb8] sm:$0xff] %vm531_vm0, %v4225_v17 }
 0x409   : > { %4829 = vst.msk [vmem:[%s7560_s20 + $0x60] sm:$0xff] %vm531_vm0, %v4797_v48  ;;  %v4768_v35 = vld [vmem:[#allocation4 + $0x78] sm:$0xff]  ;;  %v4675_v37 = vadd.f32 %v7490_v58, %v4316_v60  ;;  %4256 = vst.msk [vmem:[#allocation4 + $0xb0] sm:$0xff] %vm531_vm0, %v4224_v10  ;;  %v5711_v49 = vpop.f32.mrb[94].mxu1  ;;  %v4737_v58 = vld [vmem:[%s6047_s10 + $0x80] sm:$0xff] }
 0x40a   : > { %v4800_v28 = vadd.f32 %v4768_v35, %v4736_v54  ;;  %v4767_v62 = vld [vmem:[#allocation4 + $0x70] sm:$0xff]  ;;  %4708 = vst.msk [vmem:[#allocation4 + $0x98] sm:$0xff] %vm531_vm0, %v4676_v25  ;;  %v4227_v34 = vadd.f32 %v5711_v49, %v3868_v46  ;;  %v4163_v14 = vpop.f32.mrb[95].mxu1  ;;  %v3874_v54 = vld [vmem:[#allocation4 + $0xf8] sm:$0xff] }
 0x40b   : > { %v4799_v63 = vadd.f32 %v4767_v62, %v4735_v18  ;;  %4707 = vst.msk [vmem:[#allocation4 + $0x90] sm:$0xff] %vm531_vm0, %v4675_v37  ;;  %v4319_v42 = vld [vmem:[#allocation4 + $0xa8] sm:$0xff]  ;;  %v4226_v9 = vadd.f32 %v4163_v14, %v3867_v20  ;;  %v3873_v25 = vld [vmem:[#allocation4 + $0xf0] sm:$0xff]  ;;  %v4744_v37 = vld [vmem:[%s6047_s10 + $0xb8] sm:$0xff] }
 0x40c   : > { %4832 = vst.msk [vmem:[%s7560_s20 + $0x78] sm:$0xff] %vm531_vm0, %v4800_v28  ;;  %v4678_v26 = vadd.f32 %v7495_v33, %v4319_v42  ;;  %v4318_v2 = vld [vmem:[#allocation4 + $0xa0] sm:$0xff]  ;;  %4259 = vst.msk [vmem:[#allocation4 + $0xc8] sm:$0xff] %vm531_vm0, %v4227_v34  ;;  %v4743_v49 = vld [vmem:[%s6047_s10 + $0xb0] sm:$0xff] }
 0x40d   : > { %4831 = vst.msk [vmem:[%s7560_s20 + $0x70] sm:$0xff] %vm531_vm0, %v4799_v63  ;;  %v4770_v21 = vld [vmem:[#allocation4 + $0x88] sm:$0xff]  ;;  %v4677_v7 = vadd.f32 %v7498_v3, %v4318_v2  ;;  %4258 = vst.msk [vmem:[#allocation4 + $0xc0] sm:$0xff] %vm531_vm0, %v4226_v9  ;;  %v5714_v61 = vpop.f32.mrb[96].mxu1  ;;  %v4739_v3 = vld [vmem:[%s6047_s10 + $0x90] sm:$0xff] }
 0x40e   : > { %v4802_v22 = vadd.f32 %v4770_v21, %v4738_v27  ;;  %v4769_v4 = vld [vmem:[#allocation4 + $0x80] sm:$0xff]  ;;  %4710 = vst.msk [vmem:[#allocation4 + $0xa8] sm:$0xff] %vm531_vm0, %v4678_v26  ;;  %v4229_v33 = vadd.f32 %v5714_v61, %v3870_v57  ;;  %v4173_v43 = vpop.f32.mrb[97].mxu1  ;;  %v4746_v42 = vld [vmem:[%s6047_s10 + $0xc8] sm:$0xff]  ;;  %v4748_v61 = vld [vmem:[%s6047_s10 + $0xd8] sm:$0xff] }
 0x40f   : > { %v4801_v52 = vadd.f32 %v4769_v4, %v4737_v58  ;;  %4709 = vst.msk [vmem:[#allocation4 + $0xa0] sm:$0xff] %vm531_vm0, %v4677_v7  ;;  %v4321_v16 = vld [vmem:[#allocation4 + $0xb8] sm:$0xff]  ;;  %v4228_v41 = vadd.f32 %v4173_v43, %v3869_v24  ;;  %v4745_v9 = vld [vmem:[%s6047_s10 + $0xc0] sm:$0xff] }
 0x410   : > { %4834 = vst.msk [vmem:[%s7560_s20 + $0x88] sm:$0xff] %vm531_vm0, %v4802_v22  ;;  %v4680_v30 = vadd.f32 %v7503_v29, %v4321_v16  ;;  %v4320_v19 = vld [vmem:[#allocation4 + $0xb0] sm:$0xff]  ;;  %4261 = vst.msk [vmem:[#allocation4 + $0xd8] sm:$0xff] %vm531_vm0, %v4229_v33  ;;  %v4750_v16 = vld [vmem:[%s6047_s10 + $0xe8] sm:$0xff] }
 0x411   : > { %4833 = vst.msk [vmem:[%s7560_s20 + $0x80] sm:$0xff] %vm531_vm0, %v4801_v52  ;;  %v4772_v40 = vld [vmem:[#allocation4 + $0x98] sm:$0xff]  ;;  %v4679_v1 = vadd.f32 %v7506_v39, %v4320_v19  ;;  %4260 = vst.msk [vmem:[#allocation4 + $0xd0] sm:$0xff] %vm531_vm0, %v4228_v41  ;;  %v5717_v23 = vpop.f32.mrb[98].mxu1  ;;  %v4741_v39 = vld [vmem:[%s6047_s10 + $0xa0] sm:$0xff] }
 0x412   : > { %v4804_v51 = vadd.f32 %v4772_v40, %v4740_v8  ;;  %v4771_v11 = vld [vmem:[#allocation4 + $0x90] sm:$0xff]  ;;  %4712 = vst.msk [vmem:[#allocation4 + $0xb8] sm:$0xff] %vm531_vm0, %v4680_v30  ;;  %v4231_v29 = vadd.f32 %v5717_v23, %v3872_v50  ;;  %v4183_v0 = vpop.f32.mrb[99].mxu1  ;;  %v4752_v19 = vld [vmem:[%s6047_s10 + $0xf8] sm:$0xff] }
 0x413   : > { %v4803_v15 = vadd.f32 %v4771_v11, %v4739_v3  ;;  %4711 = vst.msk [vmem:[#allocation4 + $0xb0] sm:$0xff] %vm531_vm0, %v4679_v1  ;;  %v4323_v45 = vld [vmem:[#allocation4 + $0xc8] sm:$0xff]  ;;  %v4230_v5 = vadd.f32 %v4183_v0, %v3871_v38  ;;  %v4751_v40 = vld [vmem:[%s6047_s10 + $0xf0] sm:$0xff] }
 0x414   : > { %4836 = vst.msk [vmem:[%s7560_s20 + $0x98] sm:$0xff] %vm531_vm0, %v4804_v51  ;;  %v4682_v17 = vadd.f32 %v7511_v47, %v4323_v45  ;;  %v4322_v56 = vld [vmem:[#allocation4 + $0xc0] sm:$0xff]  ;;  %4263 = vst.msk [vmem:[#allocation4 + $0xe8] sm:$0xff] %vm531_vm0, %v4231_v29 }
 0x415   : > { %4835 = vst.msk [vmem:[%s7560_s20 + $0x90] sm:$0xff] %vm531_vm0, %v4803_v15  ;;  %v4774_v32 = vld [vmem:[#allocation4 + $0xa8] sm:$0xff]  ;;  %v4681_v48 = vadd.f32 %v7514_v12, %v4322_v56  ;;  %4262 = vst.msk [vmem:[#allocation4 + $0xe0] sm:$0xff] %vm531_vm0, %v4230_v5  ;;  %v5720_v55 = vpop.f32.mrb[100].mxu1 }
 0x416   : > { %v4806_v10 = vadd.f32 %v4774_v32, %v4742_v44  ;;  %v4773_v18 = vld [vmem:[#allocation4 + $0xa0] sm:$0xff]  ;;  %4714 = vst.msk [vmem:[#allocation4 + $0xc8] sm:$0xff] %vm531_vm0, %v4682_v17  ;;  %v4233_v47 = vadd.f32 %v5720_v55, %v3874_v54  ;;  %v4193_v60 = vpop.f32.mrb[101].mxu1 }
 0x417   : > { %v4805_v35 = vadd.f32 %v4773_v18, %v4741_v39  ;;  %4713 = vst.msk [vmem:[#allocation4 + $0xc0] sm:$0xff] %vm531_vm0, %v4681_v48  ;;  %v4325_v46 = vld [vmem:[#allocation4 + $0xd8] sm:$0xff]  ;;  %v4232_v12 = vadd.f32 %v4193_v60, %v3873_v25 }
 0x418   : > { %4838 = vst.msk [vmem:[%s7560_s20 + $0xa8] sm:$0xff] %vm531_vm0, %v4806_v10  ;;  %v4684_v28 = vadd.f32 %v7519_v13, %v4325_v46  ;;  %v4324_v62 = vld [vmem:[#allocation4 + $0xd0] sm:$0xff]  ;;  %4265 = vst.msk [vmem:[#allocation4 + $0xf8] sm:$0xff] %vm531_vm0, %v4233_v47 }
 0x419   : > { %4837 = vst.msk [vmem:[%s7560_s20 + $0xa0] sm:$0xff] %vm531_vm0, %v4805_v35  ;;  %v4776_v34 = vld [vmem:[#allocation4 + $0xb8] sm:$0xff]  ;;  %v4683_v20 = vadd.f32 %v7522_v53, %v4324_v62  ;;  %4264 = vst.msk [vmem:[#allocation4 + $0xf0] sm:$0xff] %vm531_vm0, %v4232_v12 }
 0x41a   : > { %v4808_v14 = vadd.f32 %v4776_v34, %v4744_v37  ;;  %v4775_v63 = vld [vmem:[#allocation4 + $0xb0] sm:$0xff]  ;;  %4716 = vst.msk [vmem:[#allocation4 + $0xd8] sm:$0xff] %vm531_vm0, %v4684_v28 }
 0x41b   : > { %v4807_v27 = vadd.f32 %v4775_v63, %v4743_v49  ;;  %4715 = vst.msk [vmem:[#allocation4 + $0xd0] sm:$0xff] %vm531_vm0, %v4683_v20  ;;  %v4327_v13 = vld [vmem:[#allocation4 + $0xe8] sm:$0xff] }
 0x41c   : > { %4840 = vst.msk [vmem:[%s7560_s20 + $0xb8] sm:$0xff] %vm531_vm0, %v4808_v14  ;;  %v4686_v58 = vadd.f32 %v7529_v59, %v4327_v13  ;;  %v4326_v53 = vld [vmem:[#allocation4 + $0xe0] sm:$0xff]  ;;  %v4747_v59 = vld [vmem:[%s6047_s10 + $0xd0] sm:$0xff] }
 0x41d   : > { %4839 = vst.msk [vmem:[%s7560_s20 + $0xb0] sm:$0xff] %vm531_vm0, %v4807_v27  ;;  %v4778_v26 = vld [vmem:[#allocation4 + $0xc8] sm:$0xff]  ;;  %v4685_v2 = vadd.f32 %v7531_v31, %v4326_v53 }
 0x41e   : > { %v4810_v21 = vadd.f32 %v4778_v26, %v4746_v42  ;;  %v4777_v7 = vld [vmem:[#allocation4 + $0xc0] sm:$0xff]  ;;  %4718 = vst.msk [vmem:[#allocation4 + $0xe8] sm:$0xff] %vm531_vm0, %v4686_v58 }
 0x41f   : > { %v4809_v57 = vadd.f32 %v4777_v7, %v4745_v9  ;;  %4717 = vst.msk [vmem:[#allocation4 + $0xe0] sm:$0xff] %vm531_vm0, %v4685_v2  ;;  %v4329_v22 = vld [vmem:[#allocation4 + $0xf8] sm:$0xff] }
 0x420   : > { %4842 = vst.msk [vmem:[%s7560_s20 + $0xc8] sm:$0xff] %vm531_vm0, %v4810_v21  ;;  %v4688_v4 = vadd.f32 %v7539_v36, %v4329_v22  ;;  %v4328_v33 = vld [vmem:[#allocation4 + $0xf0] sm:$0xff]  ;;  %v4749_v36 = vld [vmem:[%s6047_s10 + $0xe0] sm:$0xff] }
 0x421   : > { %4841 = vst.msk [vmem:[%s7560_s20 + $0xc0] sm:$0xff] %vm531_vm0, %v4809_v57  ;;  %v4780_v31 = vld [vmem:[#allocation4 + $0xd8] sm:$0xff]  ;;  %v4687_v24 = vadd.f32 %v7542_v6, %v4328_v33 }
 0x422   : > { %v4812_v43 = vadd.f32 %v4780_v31, %v4748_v61  ;;  %v4779_v52 = vld [vmem:[#allocation4 + $0xd0] sm:$0xff]  ;;  %4720 = vst.msk [vmem:[#allocation4 + $0xf8] sm:$0xff] %vm531_vm0, %v4688_v4 }
 0x423   : > { %v4811_v8 = vadd.f32 %v4779_v52, %v4747_v59  ;;  %4719 = vst.msk [vmem:[#allocation4 + $0xf0] sm:$0xff] %vm531_vm0, %v4687_v24 }
 0x424   : > { %4844 = vst.msk [vmem:[%s7560_s20 + $0xd8] sm:$0xff] %vm531_vm0, %v4812_v43 }
 0x425   : > { %4843 = vst.msk [vmem:[%s7560_s20 + $0xd0] sm:$0xff] %vm531_vm0, %v4811_v8  ;;  %v4782_v41 = vld [vmem:[#allocation4 + $0xe8] sm:$0xff] }
 0x426   : > { %v4814_v3 = vadd.f32 %v4782_v41, %v4750_v16  ;;  %v4781_v6 = vld [vmem:[#allocation4 + $0xe0] sm:$0xff] }
 0x427   : > { %v4813_v30 = vadd.f32 %v4781_v6, %v4749_v36 }
 0x428   : > { %4846 = vst.msk [vmem:[%s7560_s20 + $0xe8] sm:$0xff] %vm531_vm0, %v4814_v3 }
 0x429   : > { %4845 = vst.msk [vmem:[%s7560_s20 + $0xe0] sm:$0xff] %vm531_vm0, %v4813_v30  ;;  %v4784_v1 = vld [vmem:[#allocation4 + $0xf8] sm:$0xff] }
 0x42a   : > { %v4816_v50 = vadd.f32 %v4784_v1, %v4752_v19  ;;  %v4783_v23 = vld [vmem:[#allocation4 + $0xf0] sm:$0xff] }
 0x42b   : > { %v4815_v51 = vadd.f32 %v4783_v23, %v4751_v40 }
 0x42c   : > { %4848 = vst.msk [vmem:[%s7560_s20 + $0xf8] sm:$0xff] %vm531_vm0, %v4816_v50 }
 0x42d   : > { %4847 = vst.msk [vmem:[%s7560_s20 + $0xf0] sm:$0xff] %vm531_vm0, %v4815_v51 }
 0x42e PF: > { %s17_s2 = sadd.s32 1, %s5861_s2   ;;  %s7753_s24 = smov %s5857_s1 }
 0x42f   : > { %p14_p5 = scmp.ge.s32.totalorder %s17_s2, 4   ;;  %s7754_s1 = smov %s7756_s25 }
 0x431   :  { %16 = sbr.rel (!%p14_p5) target bundleno = 2 (0x2), region = 92 }

</bundles_post_ra>
